<compile_context>
chip_gen: v6e
topology: v6e:2x2x1
jax: 0.10.0
libtpu: 0.0.40
codegen_flags: <defaults>
</compile_context>

<pallas_src>
import functools

import numpy as np
import jax
import jax.numpy as jnp
from jax.experimental import pallas as pl
from jax.experimental.pallas import tpu as pltpu


# ----------------------------------------------------------------------------
# wrapper-side constant builders (run once under jit, outside the kernel)
# ----------------------------------------------------------------------------

def _spatial_conv_matrices(wconv, H, W):
    """Fold the 7x7 (2->1, pad=3) conv into two (H*W, H*W) matmul matrices.

    out_flat = cmax_flat @ Kmax + cmean_flat @ Kmean   (zero padding implicit)
    wconv: (2, 7, 7); channel 0 multiplies the channel-max map, channel 1 the
    channel-mean map (torch ChannelPool order: max first, mean second).
    """
    HW = H * W
    idx = jnp.arange(HW)
    iy, ix = idx // W, idx % W
    dy = iy[:, None] - iy[None, :] + 3          # (HW_in, HW_out)
    dx = ix[:, None] - ix[None, :] + 3
    valid = (dy >= 0) & (dy < 7) & (dx >= 0) & (dx < 7)
    dyc = jnp.clip(dy, 0, 6)
    dxc = jnp.clip(dx, 0, 6)
    kmax = jnp.where(valid, wconv[0][dyc, dxc], 0.0).astype(jnp.float32)
    kmean = jnp.where(valid, wconv[1][dyc, dxc], 0.0).astype(jnp.float32)
    return kmax, kmean


# ----------------------------------------------------------------------------
# fused CBAM kernel: one grid step == TB batch elements
# ----------------------------------------------------------------------------

def _cbam_kernel(x_ref, w1_ref, b1_ref, w2_ref, b2_ref, kmax_ref, kmean_ref,
                 bs_ref, o_ref, *, TB, C):
    x = x_ref[...]                                          # (TB*C, HW) f32

    # ---------------- ChannelGate (batched via block-diagonal MLP) ----------
    avg_col = jnp.mean(x, axis=1, keepdims=True)            # (TB*C, 1)
    max_col = jnp.max(x, axis=1, keepdims=True)             # (TB*C, 1)
    pools = jnp.concatenate([avg_col, max_col], axis=1)     # (TB*C, 2)

    h = jnp.dot(w1_ref[...], pools, preferred_element_type=jnp.float32)
    h = jnp.maximum(h + b1_ref[...], 0.0)                   # (TB*Ch, 2)
    o = jnp.dot(w2_ref[...], h, preferred_element_type=jnp.float32)
    o = o + b2_ref[...]                                     # (TB*C, 2)
    catt = jax.nn.sigmoid(o[:, 0:1] + o[:, 1:2])            # (TB*C, 1)
    x_cg = x * catt                                         # (TB*C, HW)

    # ---------------- SpatialGate -------------------------------------------
    # Channel max / mean per batch element via static, sublane-aligned slices.
    cmax_rows, cmean_rows = [], []
    for t in range(TB):
        blk = x_cg[t * C:(t + 1) * C, :]                    # (C, HW)
        cmax_rows.append(jnp.max(blk, axis=0, keepdims=True))
        cmean_rows.append(jnp.mean(blk, axis=0, keepdims=True))
    cmax = jnp.concatenate(cmax_rows, axis=0)               # (TB, HW)
    cmean = jnp.concatenate(cmean_rows, axis=0)             # (TB, HW)

    # 7x7 "same" conv (2 -> 1 channels) as two MXU matmuls against the
    # precomputed Toeplitz matrices (zero padding already folded in).
    sacc = (jnp.dot(cmax, kmax_ref[...], preferred_element_type=jnp.float32)
            + jnp.dot(cmean, kmean_ref[...], preferred_element_type=jnp.float32))
    sscale = jax.nn.sigmoid(sacc + bs_ref[0])               # (TB, HW)

    # Apply the spatial scale per batch element; each store is a full-lane slab.
    for t in range(TB):
        o_ref[t * C:(t + 1) * C, :] = (
            x_cg[t * C:(t + 1) * C, :] * sscale[t:t + 1, :])


# ----------------------------------------------------------------------------
# wrapper
# ----------------------------------------------------------------------------

def cbam_forward(x, params, *, tb_max=8):
    """x: (B, C, H, W) float32 NCHW -> (B, C, H, W) float32."""
    B, C, H, W = x.shape
    HW = H * W
    Ch = params["w1"].shape[0]
    assert C % 8 == 0, "kernel assumes gate_channels is a multiple of 8"

    # Largest batch-tile TB <= tb_max that divides B (keeps grid exact).
    # With C=32, HW=256 a TB=8 block is 256 KiB; in+out double buffers stay
    # ~1 MiB, far under any generation's VMEM budget (incl. v7x).
    TB = 1
    for t in range(1, min(tb_max, B) + 1):
        if B % t == 0:
            TB = t
    G = B // TB

    x_flat = x.reshape(B * C, HW)            # free row-major view, no transpose

    # Block-diagonal MLP weights: one matmul handles all TB batch elements.
    eye = jnp.eye(TB, dtype=jnp.float32)
    w1b = jnp.kron(eye, params["w1"].astype(jnp.float32))    # (TB*Ch, TB*C)
    w2b = jnp.kron(eye, params["w2"].astype(jnp.float32))    # (TB*C, TB*Ch)
    b1t = jnp.tile(params["b1"].astype(jnp.float32), (TB, 1))
    b2t = jnp.tile(params["b2"].astype(jnp.float32), (TB, 1))
    kmax, kmean = _spatial_conv_matrices(params["ws"], H, W)
    bs = params["bs"].astype(jnp.float32)

    kernel = functools.partial(_cbam_kernel, TB=TB, C=C)
    grid_spec = pltpu.PrefetchScalarGridSpec(
        num_scalar_prefetch=0,
        grid=(G,),
        in_specs=[
            pl.BlockSpec((TB * C, HW), lambda g: (g, 0)),           # x tile
            pl.BlockSpec((TB * Ch, TB * C), lambda g: (0, 0)),      # mlp W1 blkdiag
            pl.BlockSpec((TB * Ch, 1), lambda g: (0, 0)),           # mlp b1 tiled
            pl.BlockSpec((TB * C, TB * Ch), lambda g: (0, 0)),      # mlp W2 blkdiag
            pl.BlockSpec((TB * C, 1), lambda g: (0, 0)),            # mlp b2 tiled
            pl.BlockSpec((HW, HW), lambda g: (0, 0)),               # conv mat (max)
            pl.BlockSpec((HW, HW), lambda g: (0, 0)),               # conv mat (mean)
            pl.BlockSpec(memory_space=pltpu.MemorySpace.SMEM),      # conv bias (1,)
        ],
        out_specs=pl.BlockSpec((TB * C, HW), lambda g: (g, 0)),
    )
    out_flat = pl.pallas_call(
        kernel,
        out_shape=jax.ShapeDtypeStruct((B * C, HW), jnp.float32),
        grid_spec=grid_spec,
        compiler_params=pltpu.CompilerParams(
            dimension_semantics=("parallel",),
        ),
    )(x_flat, w1b, b1t, w2b, b2t, kmax, kmean, bs)
    return out_flat.reshape(B, C, H, W)


# ----------------------------------------------------------------------------
# pure-JAX reference (matches the PyTorch module's forward)
# ----------------------------------------------------------------------------

def cbam_reference(x, params):
    B, C, H, W = x.shape
    hi = jax.lax.Precision.HIGHEST

    avg = jnp.mean(x, axis=(2, 3))                            # (B, C)
    mx = jnp.max(x, axis=(2, 3))                              # (B, C)

    def mlp(v):
        h = jnp.maximum(
            jnp.dot(v, params["w1"].T, precision=hi) + params["b1"][:, 0], 0.0)
        return jnp.dot(h, params["w2"].T, precision=hi) + params["b2"][:, 0]

    catt = jax.nn.sigmoid(mlp(avg) + mlp(mx))                 # (B, C)
    xc = x * catt[:, :, None, None]

    cmax = jnp.max(xc, axis=1)                                # (B, H, W)
    cmean = jnp.mean(xc, axis=1)
    pmax = jnp.pad(cmax, ((0, 0), (3, 3), (3, 3)))
    pmean = jnp.pad(cmean, ((0, 0), (3, 3), (3, 3)))
    wc = params["ws"]                                         # (2, 7, 7)
    s = jnp.zeros((B, H, W), jnp.float32)
    for dy in range(7):
        for dx in range(7):
            s = s + wc[0, dy, dx] * pmax[:, dy:dy + H, dx:dx + W]
            s = s + wc[1, dy, dx] * pmean[:, dy:dy + H, dx:dx + W]
    sscale = jax.nn.sigmoid(s + params["bs"][0])
    return xc * sscale[:, None, :, :]


def init_params(key, C):
    Ch = max(C // 16, 1)                      # reduction_ratio = 16
    ks = jax.random.split(key, 6)
    rnd = lambda k, s: (0.1 * jax.random.normal(k, s)).astype(jnp.float32)
    return dict(
        w1=rnd(ks[0], (Ch, C)),               # torch nn.Linear(C, Ch).weight
        b1=rnd(ks[1], (Ch, 1)),
        w2=rnd(ks[2], (C, Ch)),               # torch nn.Linear(Ch, C).weight
        b2=rnd(ks[3], (C, 1)),
        ws=rnd(ks[4], (2, 7, 7)),             # SpatialGate 7x7 conv weight (max, mean)
        bs=rnd(ks[5], (1,)),                  # SpatialGate conv bias
    )


if __name__ == "__main__":
    # C=32 so reduction_ratio=16 gives a valid hidden width (2); B=16 so the
    # batch-tiled grid (TB=8) has 2 steps and exercises the megacore path.
    B, C, H, W = 16, 32, 16, 16

    key = jax.random.PRNGKey(0)
    kx, kp = jax.random.split(key)
    x = jax.random.normal(kx, (B, C, H, W), jnp.float32)
    params = init_params(kp, C)

    out = jax.jit(cbam_forward)(x, params)
    out = jax.block_until_ready(out)
    assert out.shape == (B, C, H, W) and out.dtype == jnp.float32

    ref = jax.jit(cbam_reference)(x, params)
    # Kernel matmuls run at default MXU precision; accept a slightly looser
    # tolerance than the f32-exact reference.
    np.testing.assert_allclose(np.asarray(out), np.asarray(ref),
                               rtol=5e-3, atol=5e-3)

    print("KERNEL_OK")
</pallas_src>

<mosaic_0001>
module attributes {stable_mosaic.version = 11 : i64} {
  func.func @_cbam_kernel(%arg0: i32, %arg1: memref<256x256xf32, #tpu.memory_space<vmem>>, %arg2: memref<16x256xf32, #tpu.memory_space<vmem>>, %arg3: memref<16x1xf32, #tpu.memory_space<vmem>>, %arg4: memref<256x16xf32, #tpu.memory_space<vmem>>, %arg5: memref<256x1xf32, #tpu.memory_space<vmem>>, %arg6: memref<256x256xf32, #tpu.memory_space<vmem>>, %arg7: memref<256x256xf32, #tpu.memory_space<vmem>>, %arg8: memref<1xf32, #tpu.memory_space<smem>>, %arg9: memref<256x256xf32, #tpu.memory_space<vmem>>) attributes {dimension_semantics = [#tpu.dimension_semantics<parallel>], iteration_bounds = array<i64: 2>, scalar_prefetch = 0 : i64, scratch_operands = 0 : i64, tpu.core_type = #tpu.core_type<tc>, window_params = [{transform_indices = @transform_0, window_bounds = array<i64: 256, 256>}, {pipeline_mode = #tpu.pipeline_mode<synchronous>, transform_indices = @transform_1, window_bounds = array<i64: 16, 256>}, {pipeline_mode = #tpu.pipeline_mode<synchronous>, transform_indices = @transform_2, window_bounds = array<i64: 16, 1>}, {pipeline_mode = #tpu.pipeline_mode<synchronous>, transform_indices = @transform_3, window_bounds = array<i64: 256, 16>}, {pipeline_mode = #tpu.pipeline_mode<synchronous>, transform_indices = @transform_4, window_bounds = array<i64: 256, 1>}, {pipeline_mode = #tpu.pipeline_mode<synchronous>, transform_indices = @transform_5, window_bounds = array<i64: 256, 256>}, {pipeline_mode = #tpu.pipeline_mode<synchronous>, transform_indices = @transform_6, window_bounds = array<i64: 256, 256>}, {transform_indices = @transform_7, window_bounds = array<i64: 1>}, {transform_indices = @transform_8, window_bounds = array<i64: 256, 256>}]} {
    %c0 = arith.constant 0 : index
    %c0_0 = arith.constant 0 : index
    %0 = vector.load %arg1[%c0, %c0_0] : memref<256x256xf32, #tpu.memory_space<vmem>>, vector<256x256xf32>
    %cst = arith.constant dense<0.000000e+00> : vector<256xf32>
    %1 = vector.multi_reduction <add>, %0, %cst [1] : vector<256x256xf32> to vector<256xf32>
    %2 = vector.shape_cast %1 : vector<256xf32> to vector<256x1xf32>
    %cst_1 = arith.constant 2.560000e+02 : f32
    %3 = vector.broadcast %cst_1 : f32 to vector<256x1xf32>
    %4 = arith.divf %2, %3 : vector<256x1xf32>
    %cst_2 = arith.constant dense<0xFF800000> : vector<256xf32>
    %5 = vector.multi_reduction <maximumf>, %0, %cst_2 [1] : vector<256x256xf32> to vector<256xf32>
    %6 = vector.shape_cast %5 : vector<256xf32> to vector<256x1xf32>
    %7 = tpu.concatenate %4, %6 in 1 : vector<256x1xf32>, vector<256x1xf32> -> vector<256x2xf32>
    %c0_3 = arith.constant 0 : index
    %c0_4 = arith.constant 0 : index
    %8 = vector.load %arg2[%c0_3, %c0_4] : memref<16x256xf32, #tpu.memory_space<vmem>>, vector<16x256xf32>
    %cst_5 = arith.constant dense<0.000000e+00> : vector<16x2xf32>
    %9 = tpu.matmul %8, %7, %cst_5 {dimension_numbers = #tpu.dot_dimension_numbers<[1], [0], [0], [1], [0, 0, 1, 1], [], []>} : vector<16x256xf32>, vector<256x2xf32>, vector<16x2xf32> -> vector<16x2xf32>
    %c0_6 = arith.constant 0 : index
    %c0_7 = arith.constant 0 : index
    %10 = vector.load %arg3[%c0_6, %c0_7] : memref<16x1xf32, #tpu.memory_space<vmem>>, vector<16x1xf32>
    %11 = vector.broadcast %10 : vector<16x1xf32> to vector<16x2xf32>
    %12 = arith.addf %9, %11 : vector<16x2xf32>
    %cst_8 = arith.constant 0.000000e+00 : f32
    %13 = vector.broadcast %cst_8 : f32 to vector<16x2xf32>
    %14 = arith.maximumf %12, %13 : vector<16x2xf32>
    %c0_9 = arith.constant 0 : index
    %c0_10 = arith.constant 0 : index
    %15 = vector.load %arg4[%c0_9, %c0_10] : memref<256x16xf32, #tpu.memory_space<vmem>>, vector<256x16xf32>
    %cst_11 = arith.constant dense<0.000000e+00> : vector<256x2xf32>
    %16 = tpu.matmul %15, %14, %cst_11 {dimension_numbers = #tpu.dot_dimension_numbers<[1], [0], [0], [1], [0, 0, 1, 1], [], []>} : vector<256x16xf32>, vector<16x2xf32>, vector<256x2xf32> -> vector<256x2xf32>
    %c0_12 = arith.constant 0 : index
    %c0_13 = arith.constant 0 : index
    %17 = vector.load %arg5[%c0_12, %c0_13] : memref<256x1xf32, #tpu.memory_space<vmem>>, vector<256x1xf32>
    %18 = vector.broadcast %17 : vector<256x1xf32> to vector<256x2xf32>
    %19 = arith.addf %16, %18 : vector<256x2xf32>
    %20 = vector.extract_strided_slice %19 {offsets = [0, 0], sizes = [256, 1], strides = [1, 1]} : vector<256x2xf32> to vector<256x1xf32>
    %21 = vector.extract_strided_slice %19 {offsets = [0, 1], sizes = [256, 1], strides = [1, 1]} : vector<256x2xf32> to vector<256x1xf32>
    %22 = arith.addf %20, %21 : vector<256x1xf32>
    %23 = arith.negf %22 : vector<256x1xf32>
    %24 = math.exp %23 : vector<256x1xf32>
    %cst_14 = arith.constant 1.000000e+00 : f32
    %25 = vector.broadcast %cst_14 : f32 to vector<256x1xf32>
    %26 = arith.addf %25, %24 : vector<256x1xf32>
    %27 = arith.divf %25, %26 : vector<256x1xf32>
    %28 = vector.broadcast %27 : vector<256x1xf32> to vector<256x256xf32>
    %29 = arith.mulf %0, %28 : vector<256x256xf32>
    %30 = vector.extract_strided_slice %29 {offsets = [0, 0], sizes = [32, 256], strides = [1, 1]} : vector<256x256xf32> to vector<32x256xf32>
    %cst_15 = arith.constant dense<0xFF800000> : vector<256xf32>
    %31 = vector.multi_reduction <maximumf>, %30, %cst_15 [0] : vector<32x256xf32> to vector<256xf32>
    %32 = vector.shape_cast %31 : vector<256xf32> to vector<1x256xf32>
    %cst_16 = arith.constant dense<0.000000e+00> : vector<256xf32>
    %33 = vector.multi_reduction <add>, %30, %cst_16 [0] : vector<32x256xf32> to vector<256xf32>
    %34 = vector.shape_cast %33 : vector<256xf32> to vector<1x256xf32>
    %cst_17 = arith.constant 3.200000e+01 : f32
    %35 = vector.broadcast %cst_17 : f32 to vector<1x256xf32>
    %36 = arith.divf %34, %35 : vector<1x256xf32>
    %37 = vector.extract_strided_slice %29 {offsets = [32, 0], sizes = [32, 256], strides = [1, 1]} : vector<256x256xf32> to vector<32x256xf32>
    %cst_18 = arith.constant dense<0xFF800000> : vector<256xf32>
    %38 = vector.multi_reduction <maximumf>, %37, %cst_18 [0] : vector<32x256xf32> to vector<256xf32>
    %39 = vector.shape_cast %38 : vector<256xf32> to vector<1x256xf32>
    %cst_19 = arith.constant dense<0.000000e+00> : vector<256xf32>
    %40 = vector.multi_reduction <add>, %37, %cst_19 [0] : vector<32x256xf32> to vector<256xf32>
    %41 = vector.shape_cast %40 : vector<256xf32> to vector<1x256xf32>
    %cst_20 = arith.constant 3.200000e+01 : f32
    %42 = vector.broadcast %cst_20 : f32 to vector<1x256xf32>
    %43 = arith.divf %41, %42 : vector<1x256xf32>
    %44 = vector.extract_strided_slice %29 {offsets = [64, 0], sizes = [32, 256], strides = [1, 1]} : vector<256x256xf32> to vector<32x256xf32>
    %cst_21 = arith.constant dense<0xFF800000> : vector<256xf32>
    %45 = vector.multi_reduction <maximumf>, %44, %cst_21 [0] : vector<32x256xf32> to vector<256xf32>
    %46 = vector.shape_cast %45 : vector<256xf32> to vector<1x256xf32>
    %cst_22 = arith.constant dense<0.000000e+00> : vector<256xf32>
    %47 = vector.multi_reduction <add>, %44, %cst_22 [0] : vector<32x256xf32> to vector<256xf32>
    %48 = vector.shape_cast %47 : vector<256xf32> to vector<1x256xf32>
    %cst_23 = arith.constant 3.200000e+01 : f32
    %49 = vector.broadcast %cst_23 : f32 to vector<1x256xf32>
    %50 = arith.divf %48, %49 : vector<1x256xf32>
    %51 = vector.extract_strided_slice %29 {offsets = [96, 0], sizes = [32, 256], strides = [1, 1]} : vector<256x256xf32> to vector<32x256xf32>
    %cst_24 = arith.constant dense<0xFF800000> : vector<256xf32>
    %52 = vector.multi_reduction <maximumf>, %51, %cst_24 [0] : vector<32x256xf32> to vector<256xf32>
    %53 = vector.shape_cast %52 : vector<256xf32> to vector<1x256xf32>
    %cst_25 = arith.constant dense<0.000000e+00> : vector<256xf32>
    %54 = vector.multi_reduction <add>, %51, %cst_25 [0] : vector<32x256xf32> to vector<256xf32>
    %55 = vector.shape_cast %54 : vector<256xf32> to vector<1x256xf32>
    %cst_26 = arith.constant 3.200000e+01 : f32
    %56 = vector.broadcast %cst_26 : f32 to vector<1x256xf32>
    %57 = arith.divf %55, %56 : vector<1x256xf32>
    %58 = vector.extract_strided_slice %29 {offsets = [128, 0], sizes = [32, 256], strides = [1, 1]} : vector<256x256xf32> to vector<32x256xf32>
    %cst_27 = arith.constant dense<0xFF800000> : vector<256xf32>
    %59 = vector.multi_reduction <maximumf>, %58, %cst_27 [0] : vector<32x256xf32> to vector<256xf32>
    %60 = vector.shape_cast %59 : vector<256xf32> to vector<1x256xf32>
    %cst_28 = arith.constant dense<0.000000e+00> : vector<256xf32>
    %61 = vector.multi_reduction <add>, %58, %cst_28 [0] : vector<32x256xf32> to vector<256xf32>
    %62 = vector.shape_cast %61 : vector<256xf32> to vector<1x256xf32>
    %cst_29 = arith.constant 3.200000e+01 : f32
    %63 = vector.broadcast %cst_29 : f32 to vector<1x256xf32>
    %64 = arith.divf %62, %63 : vector<1x256xf32>
    %65 = vector.extract_strided_slice %29 {offsets = [160, 0], sizes = [32, 256], strides = [1, 1]} : vector<256x256xf32> to vector<32x256xf32>
    %cst_30 = arith.constant dense<0xFF800000> : vector<256xf32>
    %66 = vector.multi_reduction <maximumf>, %65, %cst_30 [0] : vector<32x256xf32> to vector<256xf32>
    %67 = vector.shape_cast %66 : vector<256xf32> to vector<1x256xf32>
    %cst_31 = arith.constant dense<0.000000e+00> : vector<256xf32>
    %68 = vector.multi_reduction <add>, %65, %cst_31 [0] : vector<32x256xf32> to vector<256xf32>
    %69 = vector.shape_cast %68 : vector<256xf32> to vector<1x256xf32>
    %cst_32 = arith.constant 3.200000e+01 : f32
    %70 = vector.broadcast %cst_32 : f32 to vector<1x256xf32>
    %71 = arith.divf %69, %70 : vector<1x256xf32>
    %72 = vector.extract_strided_slice %29 {offsets = [192, 0], sizes = [32, 256], strides = [1, 1]} : vector<256x256xf32> to vector<32x256xf32>
    %cst_33 = arith.constant dense<0xFF800000> : vector<256xf32>
    %73 = vector.multi_reduction <maximumf>, %72, %cst_33 [0] : vector<32x256xf32> to vector<256xf32>
    %74 = vector.shape_cast %73 : vector<256xf32> to vector<1x256xf32>
    %cst_34 = arith.constant dense<0.000000e+00> : vector<256xf32>
    %75 = vector.multi_reduction <add>, %72, %cst_34 [0] : vector<32x256xf32> to vector<256xf32>
    %76 = vector.shape_cast %75 : vector<256xf32> to vector<1x256xf32>
    %cst_35 = arith.constant 3.200000e+01 : f32
    %77 = vector.broadcast %cst_35 : f32 to vector<1x256xf32>
    %78 = arith.divf %76, %77 : vector<1x256xf32>
    %79 = vector.extract_strided_slice %29 {offsets = [224, 0], sizes = [32, 256], strides = [1, 1]} : vector<256x256xf32> to vector<32x256xf32>
    %cst_36 = arith.constant dense<0xFF800000> : vector<256xf32>
    %80 = vector.multi_reduction <maximumf>, %79, %cst_36 [0] : vector<32x256xf32> to vector<256xf32>
    %81 = vector.shape_cast %80 : vector<256xf32> to vector<1x256xf32>
    %cst_37 = arith.constant dense<0.000000e+00> : vector<256xf32>
    %82 = vector.multi_reduction <add>, %79, %cst_37 [0] : vector<32x256xf32> to vector<256xf32>
    %83 = vector.shape_cast %82 : vector<256xf32> to vector<1x256xf32>
    %cst_38 = arith.constant 3.200000e+01 : f32
    %84 = vector.broadcast %cst_38 : f32 to vector<1x256xf32>
    %85 = arith.divf %83, %84 : vector<1x256xf32>
    %86 = tpu.concatenate %32, %39, %46, %53, %60, %67, %74, %81 in 0 : vector<1x256xf32>, vector<1x256xf32>, vector<1x256xf32>, vector<1x256xf32>, vector<1x256xf32>, vector<1x256xf32>, vector<1x256xf32>, vector<1x256xf32> -> vector<8x256xf32>
    %87 = tpu.concatenate %36, %43, %50, %57, %64, %71, %78, %85 in 0 : vector<1x256xf32>, vector<1x256xf32>, vector<1x256xf32>, vector<1x256xf32>, vector<1x256xf32>, vector<1x256xf32>, vector<1x256xf32>, vector<1x256xf32> -> vector<8x256xf32>
    %c0_39 = arith.constant 0 : index
    %c0_40 = arith.constant 0 : index
    %88 = vector.load %arg6[%c0_39, %c0_40] : memref<256x256xf32, #tpu.memory_space<vmem>>, vector<256x256xf32>
    %cst_41 = arith.constant dense<0.000000e+00> : vector<8x256xf32>
    %89 = tpu.matmul %86, %88, %cst_41 {dimension_numbers = #tpu.dot_dimension_numbers<[1], [0], [0], [1], [0, 0, 1, 1], [], []>} : vector<8x256xf32>, vector<256x256xf32>, vector<8x256xf32> -> vector<8x256xf32>
    %c0_42 = arith.constant 0 : index
    %c0_43 = arith.constant 0 : index
    %90 = vector.load %arg7[%c0_42, %c0_43] : memref<256x256xf32, #tpu.memory_space<vmem>>, vector<256x256xf32>
    %cst_44 = arith.constant dense<0.000000e+00> : vector<8x256xf32>
    %91 = tpu.matmul %87, %90, %cst_44 {dimension_numbers = #tpu.dot_dimension_numbers<[1], [0], [0], [1], [0, 0, 1, 1], [], []>} : vector<8x256xf32>, vector<256x256xf32>, vector<8x256xf32> -> vector<8x256xf32>
    %92 = arith.addf %89, %91 : vector<8x256xf32>
    %c0_45 = arith.constant 0 : index
    %93 = memref.load %arg8[%c0_45] : memref<1xf32, #tpu.memory_space<smem>>
    %94 = vector.broadcast %93 : f32 to vector<8x256xf32>
    %95 = arith.addf %92, %94 : vector<8x256xf32>
    %96 = arith.negf %95 : vector<8x256xf32>
    %97 = math.exp %96 : vector<8x256xf32>
    %cst_46 = arith.constant 1.000000e+00 : f32
    %98 = vector.broadcast %cst_46 : f32 to vector<8x256xf32>
    %99 = arith.addf %98, %97 : vector<8x256xf32>
    %100 = arith.divf %98, %99 : vector<8x256xf32>
    %101 = vector.extract_strided_slice %29 {offsets = [0, 0], sizes = [32, 256], strides = [1, 1]} : vector<256x256xf32> to vector<32x256xf32>
    %102 = vector.extract_strided_slice %100 {offsets = [0, 0], sizes = [1, 256], strides = [1, 1]} : vector<8x256xf32> to vector<1x256xf32>
    %103 = vector.broadcast %102 : vector<1x256xf32> to vector<32x256xf32>
    %104 = arith.mulf %101, %103 : vector<32x256xf32>
    %c0_47 = arith.constant 0 : index
    %c0_48 = arith.constant 0 : index
    %105 = vector.load %arg9[%c0_47, %c0_48] : memref<256x256xf32, #tpu.memory_space<vmem>>, vector<32x256xf32>
    tpu.vector_store %arg9[%c0_47, %c0_48], %104 {strides = array<i32>} : memref<256x256xf32, #tpu.memory_space<vmem>>, vector<32x256xf32>,
    %106 = vector.extract_strided_slice %29 {offsets = [32, 0], sizes = [32, 256], strides = [1, 1]} : vector<256x256xf32> to vector<32x256xf32>
    %107 = vector.extract_strided_slice %100 {offsets = [1, 0], sizes = [1, 256], strides = [1, 1]} : vector<8x256xf32> to vector<1x256xf32>
    %108 = vector.broadcast %107 : vector<1x256xf32> to vector<32x256xf32>
    %109 = arith.mulf %106, %108 : vector<32x256xf32>
    %c32 = arith.constant 32 : index
    %c0_49 = arith.constant 0 : index
    %110 = vector.load %arg9[%c32, %c0_49] : memref<256x256xf32, #tpu.memory_space<vmem>>, vector<32x256xf32>
    tpu.vector_store %arg9[%c32, %c0_49], %109 {strides = array<i32>} : memref<256x256xf32, #tpu.memory_space<vmem>>, vector<32x256xf32>,
    %111 = vector.extract_strided_slice %29 {offsets = [64, 0], sizes = [32, 256], strides = [1, 1]} : vector<256x256xf32> to vector<32x256xf32>
    %112 = vector.extract_strided_slice %100 {offsets = [2, 0], sizes = [1, 256], strides = [1, 1]} : vector<8x256xf32> to vector<1x256xf32>
    %113 = vector.broadcast %112 : vector<1x256xf32> to vector<32x256xf32>
    %114 = arith.mulf %111, %113 : vector<32x256xf32>
    %c64 = arith.constant 64 : index
    %c0_50 = arith.constant 0 : index
    %115 = vector.load %arg9[%c64, %c0_50] : memref<256x256xf32, #tpu.memory_space<vmem>>, vector<32x256xf32>
    tpu.vector_store %arg9[%c64, %c0_50], %114 {strides = array<i32>} : memref<256x256xf32, #tpu.memory_space<vmem>>, vector<32x256xf32>,
    %116 = vector.extract_strided_slice %29 {offsets = [96, 0], sizes = [32, 256], strides = [1, 1]} : vector<256x256xf32> to vector<32x256xf32>
    %117 = vector.extract_strided_slice %100 {offsets = [3, 0], sizes = [1, 256], strides = [1, 1]} : vector<8x256xf32> to vector<1x256xf32>
    %118 = vector.broadcast %117 : vector<1x256xf32> to vector<32x256xf32>
    %119 = arith.mulf %116, %118 : vector<32x256xf32>
    %c96 = arith.constant 96 : index
    %c0_51 = arith.constant 0 : index
    %120 = vector.load %arg9[%c96, %c0_51] : memref<256x256xf32, #tpu.memory_space<vmem>>, vector<32x256xf32>
    tpu.vector_store %arg9[%c96, %c0_51], %119 {strides = array<i32>} : memref<256x256xf32, #tpu.memory_space<vmem>>, vector<32x256xf32>,
    %121 = vector.extract_strided_slice %29 {offsets = [128, 0], sizes = [32, 256], strides = [1, 1]} : vector<256x256xf32> to vector<32x256xf32>
    %122 = vector.extract_strided_slice %100 {offsets = [4, 0], sizes = [1, 256], strides = [1, 1]} : vector<8x256xf32> to vector<1x256xf32>
    %123 = vector.broadcast %122 : vector<1x256xf32> to vector<32x256xf32>
    %124 = arith.mulf %121, %123 : vector<32x256xf32>
    %c128 = arith.constant 128 : index
    %c0_52 = arith.constant 0 : index
    %125 = vector.load %arg9[%c128, %c0_52] : memref<256x256xf32, #tpu.memory_space<vmem>>, vector<32x256xf32>
    tpu.vector_store %arg9[%c128, %c0_52], %124 {strides = array<i32>} : memref<256x256xf32, #tpu.memory_space<vmem>>, vector<32x256xf32>,
    %126 = vector.extract_strided_slice %29 {offsets = [160, 0], sizes = [32, 256], strides = [1, 1]} : vector<256x256xf32> to vector<32x256xf32>
    %127 = vector.extract_strided_slice %100 {offsets = [5, 0], sizes = [1, 256], strides = [1, 1]} : vector<8x256xf32> to vector<1x256xf32>
    %128 = vector.broadcast %127 : vector<1x256xf32> to vector<32x256xf32>
    %129 = arith.mulf %126, %128 : vector<32x256xf32>
    %c160 = arith.constant 160 : index
    %c0_53 = arith.constant 0 : index
    %130 = vector.load %arg9[%c160, %c0_53] : memref<256x256xf32, #tpu.memory_space<vmem>>, vector<32x256xf32>
    tpu.vector_store %arg9[%c160, %c0_53], %129 {strides = array<i32>} : memref<256x256xf32, #tpu.memory_space<vmem>>, vector<32x256xf32>,
    %131 = vector.extract_strided_slice %29 {offsets = [192, 0], sizes = [32, 256], strides = [1, 1]} : vector<256x256xf32> to vector<32x256xf32>
    %132 = vector.extract_strided_slice %100 {offsets = [6, 0], sizes = [1, 256], strides = [1, 1]} : vector<8x256xf32> to vector<1x256xf32>
    %133 = vector.broadcast %132 : vector<1x256xf32> to vector<32x256xf32>
    %134 = arith.mulf %131, %133 : vector<32x256xf32>
    %c192 = arith.constant 192 : index
    %c0_54 = arith.constant 0 : index
    %135 = vector.load %arg9[%c192, %c0_54] : memref<256x256xf32, #tpu.memory_space<vmem>>, vector<32x256xf32>
    tpu.vector_store %arg9[%c192, %c0_54], %134 {strides = array<i32>} : memref<256x256xf32, #tpu.memory_space<vmem>>, vector<32x256xf32>,
    %136 = vector.extract_strided_slice %29 {offsets = [224, 0], sizes = [32, 256], strides = [1, 1]} : vector<256x256xf32> to vector<32x256xf32>
    %137 = vector.extract_strided_slice %100 {offsets = [7, 0], sizes = [1, 256], strides = [1, 1]} : vector<8x256xf32> to vector<1x256xf32>
    %138 = vector.broadcast %137 : vector<1x256xf32> to vector<32x256xf32>
    %139 = arith.mulf %136, %138 : vector<32x256xf32>
    %c224 = arith.constant 224 : index
    %c0_55 = arith.constant 0 : index
    %140 = vector.load %arg9[%c224, %c0_55] : memref<256x256xf32, #tpu.memory_space<vmem>>, vector<32x256xf32>
    tpu.vector_store %arg9[%c224, %c0_55], %139 {strides = array<i32>} : memref<256x256xf32, #tpu.memory_space<vmem>>, vector<32x256xf32>,
    return
  }
  func.func @transform_0(%arg0: i32) -> (i32, i32) {
    %c0_i32 = arith.constant 0 : i32
    %c0_i32_0 = arith.constant 0 : i32
    return %arg0, %c0_i32 : i32, i32
  }
  func.func @transform_1(%arg0: i32) -> (i32, i32) {
    %c0_i32 = arith.constant 0 : i32
    %c0_i32_0 = arith.constant 0 : i32
    %c0_i32_1 = arith.constant 0 : i32
    return %c0_i32, %c0_i32_0 : i32, i32
  }
  func.func @transform_2(%arg0: i32) -> (i32, i32) {
    %c0_i32 = arith.constant 0 : i32
    %c0_i32_0 = arith.constant 0 : i32
    %c0_i32_1 = arith.constant 0 : i32
    return %c0_i32, %c0_i32_0 : i32, i32
  }
  func.func @transform_3(%arg0: i32) -> (i32, i32) {
    %c0_i32 = arith.constant 0 : i32
    %c0_i32_0 = arith.constant 0 : i32
    %c0_i32_1 = arith.constant 0 : i32
    return %c0_i32, %c0_i32_0 : i32, i32
  }
  func.func @transform_4(%arg0: i32) -> (i32, i32) {
    %c0_i32 = arith.constant 0 : i32
    %c0_i32_0 = arith.constant 0 : i32
    %c0_i32_1 = arith.constant 0 : i32
    return %c0_i32, %c0_i32_0 : i32, i32
  }
  func.func @transform_5(%arg0: i32) -> (i32, i32) {
    %c0_i32 = arith.constant 0 : i32
    %c0_i32_0 = arith.constant 0 : i32
    %c0_i32_1 = arith.constant 0 : i32
    return %c0_i32, %c0_i32_0 : i32, i32
  }
  func.func @transform_6(%arg0: i32) -> (i32, i32) {
    %c0_i32 = arith.constant 0 : i32
    %c0_i32_0 = arith.constant 0 : i32
    %c0_i32_1 = arith.constant 0 : i32
    return %c0_i32, %c0_i32_0 : i32, i32
  }
  func.func @transform_7(%arg0: i32) -> i32 {
    %c0_i32 = arith.constant 0 : i32
    %c0_i32_0 = arith.constant 0 : i32
    return %c0_i32 : i32
  }
  func.func @transform_8(%arg0: i32) -> (i32, i32) {
    %c0_i32 = arith.constant 0 : i32
    %c0_i32_0 = arith.constant 0 : i32
    return %arg0, %c0_i32 : i32, i32
  }
}

</mosaic_0001>

<bundles_post_ra>
// kernel: cbam_forward.1
= control target key start
LH: loop header
LB: loop body
LE: loop exit
PB: predicated region body
PF: predicated region fallthrough
CT: control target
= control target key end

     0   :  { %s3203_s29 = smov 0   ;;  %s4718_s0 = inlined_call_operand.vmem [shape: f32[512,256], index: 0, kind: input, shape index: {}]   ;;  %s4719_s1 = inlined_call_operand.vmem [shape: f32[16,256], index: 1, kind: input, shape index: {}]   ;;  %s4720_s2 = inlined_call_operand.vmem [shape: f32[16,1], index: 2, kind: input, shape index: {}]   ;;  %s4721_s3 = inlined_call_operand.vmem [shape: f32[256,16], index: 3, kind: input, shape index: {}]   ;;  %s4722_s4 = inlined_call_operand.vmem [shape: f32[256,1], index: 4, kind: input, shape index: {}]   ;;  %s4723_s5 = inlined_call_operand.vmem [shape: f32[256,256], index: 5, kind: input, shape index: {}]   ;;  %s4724_s6 = inlined_call_operand.vmem [shape: f32[256,256], index: 6, kind: input, shape index: {}]   ;;  %s4725_s7 = inlined_call_operand.<no memory space> [shape: f32[1], index: 7, kind: input, shape index: {}]   ;;  %s4726_s8 = inlined_call_operand.vmem [shape: f32[512,256], index: 8, kind: output, shape index: {}]  }
   0x1   :  { %13 = sst [smem:[#allocation2]] %s4725_s7 }
   0x2 LB: > { %s2728_s30 = sadd.s32 4294967295, %s3151_s29   ;;  %p2732_p0 = scmp.ge.s32.totalorder %s3151_s29, 1  ;;  %s3151_s29 = sphi %s3203_s29, %s19_s29  }
   0x3   : > { %p265_p1 = scmp.lt.s32.totalorder %s3151_s29, 3 }
   0x5   : > { %p266_p2 = pnand %p2732_p0, %p265_p1 }
   0x7   : > { %269 = sbr.rel (%p266_p2) target bundleno = 1338 (0x53a), region = 52 }
   0xc   : > { %s2733_s9 = sshll.u32 %s2728_s30, 5  ;;  %vm604_vm0 = vcmask 7168   ;;  %vm954_vm1 = vcmask 130048   ;;  %s3154_s20 = smov 127   ;;  %vm2157_vm2 = vcmask 1040384   ;;  %vm2163_vm3 = vcmask 1042432  }
   0xd   : > { %p302_p3 = scmp.lt.s32.totalorder %s2733_s9, 63  ;;  %vm2160_vm4 = vcmask 1041408   ;;  %vm2166_vm5 = vcmask 1043456   ;;  %vm2169_vm6 = vcmask 1044480   ;;  %vm2172_vm7 = vcmask 1045504  }
   0xe   : > { %vm2175_vm8 = vcmask 1046528  }
   0xf   : > { %s4886_s9 = smov (!%p302_p3, %s2733_s9), 63 }
  0x10   : > { %s2807_s7 = sshll.u32 %s4886_s9, 4 }
  0x11   : > { %s3219_s12 = scalar_lea.vmem %s4718_s0, %s2807_s7  ;;  %s4561_s13 = scalar_lea.vmem %s4726_s8, %s2807_s7 }
  0x12   : > { %v377_v0 = vld [vmem:[%s3219_s12 + $0x1f0] sm:$0xff]  ;;  %v378_v1 = vld [vmem:[%s3219_s12 + $0x1f8] sm:$0xff]  ;;  %v375_v2 = vld [vmem:[%s3219_s12 + $0x1e0] sm:$0xff] }
  0x13   : > { %v472_v3 = vadd.f32 %v378_v1, %v377_v0  ;;  %v376_v4 = vld [vmem:[%s3219_s12 + $0x1e8] sm:$0xff]  ;;  %v345_v5 = vld [vmem:[%s3219_s12 + $0xf0] sm:$0xff]  ;;  %v346_v6 = vld [vmem:[%s3219_s12 + $0xf8] sm:$0xff]  ;;  %v601_v9 = vmax.f32 %v377_v0, %v378_v1 }
  0x14   : > { %v469_v7 = vadd.f32 %v376_v4, %v375_v2  ;;  %v424_v8 = vadd.f32 %v346_v6, %v345_v5  ;;  %v343_v10 = vld [vmem:[%s3219_s12 + $0xe0] sm:$0xff]  ;;  %v344_v11 = vld [vmem:[%s3219_s12 + $0xe8] sm:$0xff]  ;;  %v553_v13 = vmax.f32 %v345_v5, %v346_v6  ;;  %v373_v14 = vld [vmem:[%s3219_s12 + $0x1d0] sm:$0xff]  ;;  %v598_v17 = vmax.f32 %v375_v2, %v376_v4 }
  0x15   : > { %473 = vadd.xlane.f32.xlu0 %v472_v3  ;;  %v421_v12 = vadd.f32 %v344_v11, %v343_v10  ;;  %v374_v15 = vld [vmem:[%s3219_s12 + $0x1d8] sm:$0xff]  ;;  %v341_v18 = vld [vmem:[%s3219_s12 + $0xd0] sm:$0xff]  ;;  %v550_v21 = vmax.f32 %v343_v10, %v344_v11  ;;  %v371_v22 = vld [vmem:[%s3219_s12 + $0x1c0] sm:$0xff] }
  0x16   : > { %470 = vadd.xlane.f32.xlu1 %v469_v7  ;;  %v466_v16 = vadd.f32 %v374_v15, %v373_v14  ;;  %v342_v19 = vld [vmem:[%s3219_s12 + $0xd8] sm:$0xff]  ;;  %v372_v23 = vld [vmem:[%s3219_s12 + $0x1c8] sm:$0xff]  ;;  %v595_v25 = vmax.f32 %v373_v14, %v374_v15  ;;  %v339_v26 = vld [vmem:[%s3219_s12 + $0xc0] sm:$0xff] }
  0x17   : > { %v418_v20 = vadd.f32 %v342_v19, %v341_v18  ;;  %v463_v24 = vadd.f32 %v372_v23, %v371_v22  ;;  %v340_v27 = vld [vmem:[%s3219_s12 + $0xc8] sm:$0xff]  ;;  %v547_v29 = vmax.f32 %v341_v18, %v342_v19  ;;  %v369_v30 = vld [vmem:[%s3219_s12 + $0x1b0] sm:$0xff]  ;;  %v370_v31 = vld [vmem:[%s3219_s12 + $0x1b8] sm:$0xff]  ;;  %v592_v33 = vmax.f32 %v371_v22, %v372_v23 }
  0x18   : > { %v415_v28 = vadd.f32 %v340_v27, %v339_v26  ;;  %v460_v32 = vadd.f32 %v370_v31, %v369_v30  ;;  %v337_v34 = vld [vmem:[%s3219_s12 + $0xb0] sm:$0xff]  ;;  %v338_v35 = vld [vmem:[%s3219_s12 + $0xb8] sm:$0xff]  ;;  %v544_v37 = vmax.f32 %v339_v26, %v340_v27  ;;  %v367_v38 = vld [vmem:[%s3219_s12 + $0x1a0] sm:$0xff]  ;;  %v589_v41 = vmax.f32 %v369_v30, %v370_v31 }
  0x19   : > { %425 = vadd.xlane.f32.xlu0 %v424_v8  ;;  %v412_v36 = vadd.f32 %v338_v35, %v337_v34  ;;  %v368_v39 = vld [vmem:[%s3219_s12 + $0x1a8] sm:$0xff]  ;;  %v335_v42 = vld [vmem:[%s3219_s12 + $0xa0] sm:$0xff]  ;;  %v541_v45 = vmax.f32 %v337_v34, %v338_v35  ;;  %v365_v46 = vld [vmem:[%s3219_s12 + $0x190] sm:$0xff] }
  0x1a   : > { %602 = vmax.xlane.f32.xlu1 %v601_v9  ;;  %v457_v40 = vadd.f32 %v368_v39, %v367_v38  ;;  %v336_v43 = vld [vmem:[%s3219_s12 + $0xa8] sm:$0xff]  ;;  %v366_v47 = vld [vmem:[%s3219_s12 + $0x198] sm:$0xff]  ;;  %v586_v49 = vmax.f32 %v367_v38, %v368_v39  ;;  %v333_v50 = vld [vmem:[%s3219_s12 + $0x90] sm:$0xff] }
  0x1b   : > { %v409_v44 = vadd.f32 %v336_v43, %v335_v42  ;;  %v454_v48 = vadd.f32 %v366_v47, %v365_v46  ;;  %v334_v51 = vld [vmem:[%s3219_s12 + $0x98] sm:$0xff]  ;;  %v538_v53 = vmax.f32 %v335_v42, %v336_v43  ;;  %v363_v54 = vld [vmem:[%s3219_s12 + $0x180] sm:$0xff]  ;;  %v364_v55 = vld [vmem:[%s3219_s12 + $0x188] sm:$0xff]  ;;  %v583_v57 = vmax.f32 %v365_v46, %v366_v47 }
  0x1c   : > { %v406_v52 = vadd.f32 %v334_v51, %v333_v50  ;;  %v451_v56 = vadd.f32 %v364_v55, %v363_v54  ;;  %v331_v58 = vld [vmem:[%s3219_s12 + $0x80] sm:$0xff]  ;;  %v332_v59 = vld [vmem:[%s3219_s12 + $0x88] sm:$0xff]  ;;  %v535_v61 = vmax.f32 %v333_v50, %v334_v51  ;;  %v361_v62 = vld [vmem:[%s3219_s12 + $0x170] sm:$0xff]  ;;  %v580_v1 = vmax.f32 %v363_v54, %v364_v55 }
  0x1d   : > { %422 = vadd.xlane.f32.xlu0 %v421_v12  ;;  %v403_v60 = vadd.f32 %v332_v59, %v331_v58  ;;  %v362_v63 = vld [vmem:[%s3219_s12 + $0x178] sm:$0xff]  ;;  %v329_v2 = vld [vmem:[%s3219_s12 + $0x70] sm:$0xff]  ;;  %v532_v5 = vmax.f32 %v331_v58, %v332_v59  ;;  %v359_v6 = vld [vmem:[%s3219_s12 + $0x160] sm:$0xff] }
  0x1e   : > { %554 = vmax.xlane.f32.xlu1 %v553_v13  ;;  %v448_v0 = vadd.f32 %v362_v63, %v361_v62  ;;  %v330_v3 = vld [vmem:[%s3219_s12 + $0x78] sm:$0xff]  ;;  %v360_v7 = vld [vmem:[%s3219_s12 + $0x168] sm:$0xff]  ;;  %v577_v9 = vmax.f32 %v361_v62, %v362_v63  ;;  %v327_v10 = vld [vmem:[%s3219_s12 + $0x60] sm:$0xff] }
  0x1f   : > { %v400_v4 = vadd.f32 %v330_v3, %v329_v2  ;;  %v445_v8 = vadd.f32 %v360_v7, %v359_v6  ;;  %v328_v11 = vld [vmem:[%s3219_s12 + $0x68] sm:$0xff]  ;;  %v529_v13 = vmax.f32 %v329_v2, %v330_v3  ;;  %v357_v14 = vld [vmem:[%s3219_s12 + $0x150] sm:$0xff]  ;;  %v358_v15 = vld [vmem:[%s3219_s12 + $0x158] sm:$0xff]  ;;  %v3153_v3 = vmov 0  }
  0x20   : > { %v397_v12 = vadd.f32 %v328_v11, %v327_v10  ;;  %v325_v18 = vld [vmem:[%s3219_s12 + $0x50] sm:$0xff]  ;;  %v326_v19 = vld [vmem:[%s3219_s12 + $0x58] sm:$0xff]  ;;  %v355_v22 = vld [vmem:[%s3219_s12 + $0x140] sm:$0xff]  ;;  %2944 = vset.pattern.permute.xlu1 %v3153_v3  ;;  %2943 = vset.pattern.permute.xlu0 %v3153_v3 }
  0x21   : > { %467 = vadd.xlane.f32.xlu0 %v466_v16  ;;  %v442_v16 = vadd.f32 %v358_v15, %v357_v14  ;;  %v356_v23 = vld [vmem:[%s3219_s12 + $0x148] sm:$0xff]  ;;  %v323_v26 = vld [vmem:[%s3219_s12 + $0x40] sm:$0xff]  ;;  %v353_v30 = vld [vmem:[%s3219_s12 + $0x130] sm:$0xff] }
  0x22   : > { %599 = vmax.xlane.f32.xlu1 %v598_v17  ;;  %v574_v17 = vmax.f32 %v359_v6, %v360_v7  ;;  %v324_v27 = vld [vmem:[%s3219_s12 + $0x48] sm:$0xff]  ;;  %v354_v31 = vld [vmem:[%s3219_s12 + $0x138] sm:$0xff]  ;;  %v321_v34 = vld [vmem:[%s3219_s12 + $0x30] sm:$0xff] }
  0x23   : > { %v322_v35 = vld [vmem:[%s3219_s12 + $0x38] sm:$0xff]  ;;  %v351_v38 = vld [vmem:[%s3219_s12 + $0x120] sm:$0xff]  ;;  %v352_v39 = vld [vmem:[%s3219_s12 + $0x128] sm:$0xff] }
  0x24   : > { %v319_v42 = vld [vmem:[%s3219_s12 + $0x20] sm:$0xff]  ;;  %v320_v43 = vld [vmem:[%s3219_s12 + $0x28] sm:$0xff]  ;;  %v349_v46 = vld [vmem:[%s3219_s12 + $0x110] sm:$0xff] }
  0x25   : > { %419 = vadd.xlane.f32.xlu0 %v418_v20  ;;  %v394_v20 = vadd.f32 %v326_v19, %v325_v18  ;;  %v350_v47 = vld [vmem:[%s3219_s12 + $0x118] sm:$0xff]  ;;  %v317_v50 = vld [vmem:[%s3219_s12 + $0x10] sm:$0xff]  ;;  %v347_v54 = vld [vmem:[%s3219_s12 + $0x100] sm:$0xff] }
  0x26   : > { %551 = vmax.xlane.f32.xlu1 %v550_v21  ;;  %v526_v21 = vmax.f32 %v327_v10, %v328_v11  ;;  %v318_v51 = vld [vmem:[%s3219_s12 + $0x18] sm:$0xff]  ;;  %v348_v55 = vld [vmem:[%s3219_s12 + $0x108] sm:$0xff]  ;;  %v315_v58 = vld [vmem:[%s3219_s12] sm:$0xff] }
  0x27   : > { %v316_v59 = vld [vmem:[%s3219_s12 + $0x8] sm:$0xff]  ;;  %v556_v62 = vmax.f32 %v347_v54, %v348_v55 }
  0x28   : > { %v508_v63 = vmax.f32 %v315_v58, %v316_v59  ;;  %v642_v10 = vld [vmem:[%s4720_s2 + $0x8] sm:$0xff] }
  0x29   : > { %464 = vadd.xlane.f32.xlu0 %v463_v24  ;;  %v439_v24 = vadd.f32 %v356_v23, %v355_v22 }
  0x2a   : > { %596 = vmax.xlane.f32.xlu1 %v595_v25  ;;  %v571_v25 = vmax.f32 %v357_v14, %v358_v15  ;;  %v763_v15 = vld [vmem:[%s4722_s4 + $0x8] sm:$0xff] }
  0x2d   : > { %416 = vadd.xlane.f32.xlu0 %v415_v28  ;;  %v391_v28 = vadd.f32 %v324_v27, %v323_v26 }
  0x2e   : > { %548 = vmax.xlane.f32.xlu1 %v547_v29  ;;  %v523_v29 = vmax.f32 %v325_v18, %v326_v19 }
  0x31   : > { %461 = vadd.xlane.f32.xlu0 %v460_v32  ;;  %v436_v32 = vadd.f32 %v354_v31, %v353_v30 }
  0x32   : > { %593 = vmax.xlane.f32.xlu1 %v592_v33  ;;  %v568_v33 = vmax.f32 %v355_v22, %v356_v23  ;;  %v775_v22 = vld [vmem:[%s4722_s4 + $0x68] sm:$0xff] }
  0x35   : > { %413 = vadd.xlane.f32.xlu0 %v412_v36  ;;  %v388_v36 = vadd.f32 %v322_v35, %v321_v34 }
  0x36   : > { %545 = vmax.xlane.f32.xlu1 %v544_v37  ;;  %v520_v37 = vmax.f32 %v323_v26, %v324_v27  ;;  %v767_v27 = vld [vmem:[%s4722_s4 + $0x28] sm:$0xff] }
  0x39   : > { %458 = vadd.xlane.f32.xlu0 %v457_v40  ;;  %v433_v40 = vadd.f32 %v352_v39, %v351_v38 }
  0x3a   : > { %590 = vmax.xlane.f32.xlu1 %v589_v41  ;;  %v565_v41 = vmax.f32 %v353_v30, %v354_v31 }
  0x3d   : > { %410 = vadd.xlane.f32.xlu0 %v409_v44  ;;  %v385_v44 = vadd.f32 %v320_v43, %v319_v42 }
  0x3e   : > { %542 = vmax.xlane.f32.xlu1 %v541_v45  ;;  %v517_v45 = vmax.f32 %v321_v34, %v322_v35  ;;  %v765_v34 = vld [vmem:[%s4722_s4 + $0x18] sm:$0xff] }
  0x41   : > { %455 = vadd.xlane.f32.xlu0 %v454_v48  ;;  %v430_v48 = vadd.f32 %v350_v47, %v349_v46 }
  0x42   : > { %587 = vmax.xlane.f32.xlu1 %v586_v49  ;;  %v562_v49 = vmax.f32 %v351_v38, %v352_v39  ;;  %v771_v39 = vld [vmem:[%s4722_s4 + $0x48] sm:$0xff] }
  0x45   : > { %407 = vadd.xlane.f32.xlu0 %v406_v52  ;;  %v382_v52 = vadd.f32 %v318_v51, %v317_v50 }
  0x46   : > { %539 = vmax.xlane.f32.xlu1 %v538_v53  ;;  %v514_v53 = vmax.f32 %v319_v42, %v320_v43 }
  0x49   : > { %452 = vadd.xlane.f32.xlu0 %v451_v56  ;;  %v427_v56 = vadd.f32 %v348_v55, %v347_v54 }
  0x4a   : > { %584 = vmax.xlane.f32.xlu1 %v583_v57  ;;  %v559_v57 = vmax.f32 %v349_v46, %v350_v47  ;;  %v783_v46 = vld [vmem:[%s4722_s4 + $0xa8] sm:$0xff] }
  0x4d   : > { %404 = vadd.xlane.f32.xlu0 %v403_v60  ;;  %v379_v60 = vadd.f32 %v316_v59, %v315_v58  ;;  %v787_v58 = vld [vmem:[%s4722_s4 + $0xc8] sm:$0xff] }
  0x4e   : > { %536 = vmax.xlane.f32.xlu1 %v535_v61  ;;  %v511_v61 = vmax.f32 %v317_v50, %v318_v51  ;;  %v774_v51 = vld [vmem:[%s4722_s4 + $0x60] sm:$0xff] }
  0x51   : > { %449 = vadd.xlane.f32.xlu0 %v448_v0  ;;  %v638_v0 = vld [vmem:[%s4719_s1 + $0x8] sm:$0xff] }
  0x52   : > { %581 = vmax.xlane.f32.xlu1 %v580_v1  ;;  %717 = vmatprep.mubr.f32.mxu0 %v638_v0  ;;  %v784_v0 = vld [vmem:[%s4722_s4 + $0xb0] sm:$0xff] }
  0x55   : > { %401 = vadd.xlane.f32.xlu0 %v400_v4  ;;  %v641_v4 = vld [vmem:[%s4720_s2] sm:$0xff] }
  0x56   : > { %533 = vmax.xlane.f32.xlu1 %v532_v5 }
  0x59   : > { %446 = vadd.xlane.f32.xlu0 %v445_v8 }
  0x5a   : > { %578 = vmax.xlane.f32.xlu1 %v577_v9  ;;  %v762_v9 = vld [vmem:[%s4722_s4] sm:$0xff] }
  0x5d   : > { %398 = vadd.xlane.f32.xlu0 %v397_v12 }
  0x5e   : > { %530 = vmax.xlane.f32.xlu1 %v529_v13 }
  0x61   : > { %443 = vadd.xlane.f32.xlu0 %v442_v16  ;;  %v768_v16 = vld [vmem:[%s4722_s4 + $0x30] sm:$0xff] }
  0x62   : > { %575 = vmax.xlane.f32.xlu1 %v574_v17 }
  0x65   : > { %395 = vadd.xlane.f32.xlu0 %v394_v20 }
  0x66   : > { %527 = vmax.xlane.f32.xlu1 %v526_v21  ;;  %v766_v21 = vld [vmem:[%s4722_s4 + $0x20] sm:$0xff] }
  0x69   : > { %440 = vadd.xlane.f32.xlu0 %v439_v24 }
  0x6a   : > { %572 = vmax.xlane.f32.xlu1 %v571_v25 }
  0x6d   : > { %392 = vadd.xlane.f32.xlu0 %v391_v28  ;;  %v778_v28 = vld [vmem:[%s4722_s4 + $0x80] sm:$0xff] }
  0x6e   : > { %524 = vmax.xlane.f32.xlu1 %v523_v29 }
  0x71   : > { %437 = vadd.xlane.f32.xlu0 %v436_v32 }
  0x72   : > { %569 = vmax.xlane.f32.xlu1 %v568_v33  ;;  %v770_v33 = vld [vmem:[%s4722_s4 + $0x40] sm:$0xff] }
  0x75   : > { %389 = vadd.xlane.f32.xlu0 %v388_v36 }
  0x76   : > { %521 = vmax.xlane.f32.xlu1 %v520_v37 }
  0x79   : > { %434 = vadd.xlane.f32.xlu0 %v433_v40  ;;  %v776_v40 = vld [vmem:[%s4722_s4 + $0x70] sm:$0xff] }
  0x7a   : > { %566 = vmax.xlane.f32.xlu1 %v565_v41 }
  0x7d   : > { %386 = vadd.xlane.f32.xlu0 %v385_v44 }
  0x7e   : > { %518 = vmax.xlane.f32.xlu1 %v517_v45  ;;  %v764_v45 = vld [vmem:[%s4722_s4 + $0x10] sm:$0xff] }
  0x81   : > { %431 = vadd.xlane.f32.xlu0 %v430_v48 }
  0x82   : > { %563 = vmax.xlane.f32.xlu1 %v562_v49 }
  0x85   : > { %383 = vadd.xlane.f32.xlu0 %v382_v52  ;;  %v780_v52 = vld [vmem:[%s4722_s4 + $0x90] sm:$0xff] }
  0x86   : > { %515 = vmax.xlane.f32.xlu1 %v514_v53 }
  0x89   : > { %428 = vadd.xlane.f32.xlu0 %v427_v56 }
  0x8a   : > { %560 = vmax.xlane.f32.xlu1 %v559_v57  ;;  %v772_v57 = vld [vmem:[%s4722_s4 + $0x50] sm:$0xff] }
  0x8d   : > { %380 = vadd.xlane.f32.xlu0 %v379_v60 }
  0x8e   : > { %512 = vmax.xlane.f32.xlu1 %v511_v61 }
  0x91   : > { %557 = vmax.xlane.f32.xlu0 %v556_v62 }
  0x92   : > { %509 = vmax.xlane.f32.xlu1 %v508_v63  ;;  %v779_v63 = vld [vmem:[%s4722_s4 + $0x88] sm:$0xff] }
  0x9e   : > { %v474_v1 = vpop.xlane.xlu0 %473 }
  0x9f   : > { %v471_v2 = vpop.xlane.xlu1 %470  ;;  %v507_v5 = vmul.f32 0.00390625, %v474_v1 }
  0xa0   : > { %v506_v17 = vmul.f32 0.00390625, %v471_v2 }
  0xa2   : > { %v426_v6 = vpop.xlane.xlu0 %425 }
  0xa3   : > { %v603_v7 = vpop.xlane.xlu1 %602  ;;  %645 = vperm.xlu1 %2944, %v641_v4   ;;  %v491_v11 = vmul.f32 0.00390625, %v426_v6  ;;  %v791_v6 = vld [vmem:[%s4722_s4 + $0xe8] sm:$0xff] }
  0xa4   : > { %v636_v8 = vsel %vm604_vm0, %v507_v5, %v603_v7  ;;  %v769_v5 = vld [vmem:[%s4722_s4 + $0x38] sm:$0xff] }
  0xa5   : > { %2809 = vmatprep.subr.mxu0 %v636_v8 }
  0xa6   : > { %v423_v12 = vpop.xlane.xlu0 %422 }
  0xa7   : > { %v555_v13 = vpop.xlane.xlu1 %554  ;;  %796 = vperm.xlu1 %2944, %v762_v9   ;;  %650 = vperm.xlu0 %2943, %v642_v10   ;;  %v490_v23 = vmul.f32 0.00390625, %v423_v12  ;;  %v788_v12 = vld [vmem:[%s4722_s4 + $0xd0] sm:$0xff] }
  0xa8   : > { %v620_v14 = vsel %vm604_vm0, %v491_v11, %v555_v13  ;;  %v782_v11 = vld [vmem:[%s4722_s4 + $0xa0] sm:$0xff] }
  0xa9   : > { %2810 = vmatpush3.msra.mxu0 %v620_v14 }
  0xaa   : > { %v468_v18 = vpop.xlane.xlu0 %467 }
  0xab   : > { %v600_v19 = vpop.xlane.xlu1 %599  ;;  %801 = vperm.xlu1 %2944, %v763_v15   ;;  %826 = vperm.xlu0 %2943, %v768_v16   ;;  %v505_v29 = vmul.f32 0.00390625, %v468_v18  ;;  %v792_v18 = vld [vmem:[%s4722_s4 + $0xf0] sm:$0xff] }
  0xac   : > { %v635_v20 = vsel %vm604_vm0, %v506_v17, %v600_v19  ;;  %v773_v17 = vld [vmem:[%s4722_s4 + $0x58] sm:$0xff] }
  0xad   : > { %2811 = vmatprep.subr.mxu0 %v635_v20 }
  0xae   : > { %v420_v24 = vpop.xlane.xlu0 %419 }
  0xaf   : > { %v552_v25 = vpop.xlane.xlu1 %551  ;;  %816 = vperm.xlu1 %2944, %v766_v21   ;;  %861 = vperm.xlu0 %2943, %v775_v22   ;;  %v489_v35 = vmul.f32 0.00390625, %v420_v24  ;;  %v793_v24 = vld [vmem:[%s4722_s4 + $0xf8] sm:$0xff] }
  0xb0   : > { %v619_v26 = vsel %vm604_vm0, %v490_v23, %v552_v25  ;;  %v786_v23 = vld [vmem:[%s4722_s4 + $0xc0] sm:$0xff] }
  0xb1   : > { %2812 = vmatpush3.msra.mxu0 %v619_v26 }
  0xb2   : > { %v465_v30 = vpop.xlane.xlu0 %464 }
  0xb3   : > { %v597_v31 = vpop.xlane.xlu1 %596  ;;  %821 = vperm.xlu1 %2944, %v767_v27   ;;  %876 = vperm.xlu0 %2943, %v778_v28   ;;  %v504_v41 = vmul.f32 0.00390625, %v465_v30 }
  0xb4   : > { %v634_v32 = vsel %vm604_vm0, %v505_v29, %v597_v31  ;;  %v777_v29 = vld [vmem:[%s4722_s4 + $0x78] sm:$0xff] }
  0xb5   : > { %2813 = vmatprep.subr.mxu0 %v634_v32 }
  0xb6   : > { %v417_v36 = vpop.xlane.xlu0 %416 }
  0xb7   : > { %v549_v37 = vpop.xlane.xlu1 %548  ;;  %836 = vperm.xlu1 %2944, %v770_v33   ;;  %811 = vperm.xlu0 %2943, %v765_v34   ;;  %v488_v47 = vmul.f32 0.00390625, %v417_v36  ;;  %v790_v34 = vld [vmem:[%s4722_s4 + $0xe0] sm:$0xff] }
  0xb8   : > { %v618_v38 = vsel %vm604_vm0, %v489_v35, %v549_v37 }
  0xb9   : > { %2814 = vmatpush3.msra.mxu0 %v618_v38 }
  0xba   : > { %v462_v42 = vpop.xlane.xlu0 %461 }
  0xbb   : > { %v594_v43 = vpop.xlane.xlu1 %593  ;;  %841 = vperm.xlu1 %2944, %v771_v39   ;;  %866 = vperm.xlu0 %2943, %v776_v40   ;;  %v503_v53 = vmul.f32 0.00390625, %v462_v42  ;;  %v781_v39 = vld [vmem:[%s4722_s4 + $0x98] sm:$0xff] }
  0xbc   : > { %v633_v44 = vsel %vm604_vm0, %v504_v41, %v594_v43 }
  0xbd   : > { %2815 = vmatprep.subr.mxu0 %v633_v44  ;;  %v785_v44 = vld [vmem:[%s4722_s4 + $0xb8] sm:$0xff] }
  0xbe   : > { %v414_v48 = vpop.xlane.xlu0 %413 }
  0xbf   : > { %v546_v49 = vpop.xlane.xlu1 %545  ;;  %806 = vperm.xlu1 %2944, %v764_v45   ;;  %901 = vperm.xlu0 %2943, %v783_v46   ;;  %v487_v59 = vmul.f32 0.00390625, %v414_v48 }
  0xc0   : > { %v617_v50 = vsel %vm604_vm0, %v488_v47, %v546_v49  ;;  %v789_v49 = vld [vmem:[%s4722_s4 + $0xd8] sm:$0xff] }
  0xc1   : > { %2816 = vmatpush3.msra.mxu0 %v617_v50 }
  0xc2   : > { %v459_v54 = vpop.xlane.xlu0 %458 }
  0xc3   : > { %v591_v55 = vpop.xlane.xlu1 %590  ;;  %856 = vperm.xlu1 %2944, %v774_v51   ;;  %886 = vperm.xlu0 %2943, %v780_v52   ;;  %v502_v1 = vmul.f32 0.00390625, %v459_v54 }
  0xc4   : > { %v632_v56 = vsel %vm604_vm0, %v503_v53, %v591_v55 }
  0xc5   : > { %2817 = vmatprep.subr.mxu0 %v632_v56 }
  0xc6   : > { %v411_v60 = vpop.xlane.xlu0 %410 }
  0xc7   : > { %v543_v61 = vpop.xlane.xlu1 %542  ;;  %846 = vperm.xlu1 %2944, %v772_v57   ;;  %921 = vperm.xlu0 %2943, %v787_v58   ;;  %v486_v7 = vmul.f32 0.00390625, %v411_v60 }
  0xc8   : > { %v616_v62 = vsel %vm604_vm0, %v487_v59, %v543_v61 }
  0xc9   : > { %2818 = vmatpush3.msra.mxu0 %v616_v62 }
  0xca   : > { %v456_v2 = vpop.xlane.xlu0 %455 }
  0xcb   : > { %v588_v3 = vpop.xlane.xlu1 %587  ;;  %881 = vperm.xlu1 %2944, %v779_v63   ;;  %906 = vperm.xlu0 %2943, %v784_v0   ;;  %v501_v13 = vmul.f32 0.00390625, %v456_v2 }
  0xcc   : > { %v631_v4 = vsel %vm604_vm0, %v502_v1, %v588_v3 }
  0xcd   : > { %2819 = vmatprep.subr.mxu0 %v631_v4 }
  0xce   : > { %v408_v8 = vpop.xlane.xlu0 %407 }
  0xcf   : > { %v540_v9 = vpop.xlane.xlu1 %539  ;;  %831 = vperm.xlu1 %2944, %v769_v5   ;;  %941 = vperm.xlu0 %2943, %v791_v6   ;;  %v485_v19 = vmul.f32 0.00390625, %v408_v8 }
  0xd0   : > { %v615_v10 = vsel %vm604_vm0, %v486_v7, %v540_v9 }
  0xd1   : > { %2820 = vmatpush3.msra.mxu0 %v615_v10 }
  0xd2   : > { %v453_v14 = vpop.xlane.xlu0 %452 }
  0xd3   : > { %v585_v15 = vpop.xlane.xlu1 %584  ;;  %896 = vperm.xlu1 %2944, %v782_v11   ;;  %926 = vperm.xlu0 %2943, %v788_v12   ;;  %v500_v25 = vmul.f32 0.00390625, %v453_v14 }
  0xd4   : > { %v630_v16 = vsel %vm604_vm0, %v501_v13, %v585_v15 }
  0xd5   : > { %2821 = vmatprep.subr.mxu0 %v630_v16 }
  0xd6   : > { %v405_v20 = vpop.xlane.xlu0 %404 }
  0xd7   : > { %v537_v21 = vpop.xlane.xlu1 %536  ;;  %851 = vperm.xlu1 %2944, %v773_v17   ;;  %946 = vperm.xlu0 %2943, %v792_v18   ;;  %v484_v30 = vmul.f32 0.00390625, %v405_v20 }
  0xd8   : > { %v614_v22 = vsel %vm604_vm0, %v485_v19, %v537_v21 }
  0xd9   : > { %2822 = vmatpush3.msra.mxu0 %v614_v22 }
  0xda   : > { %v450_v26 = vpop.xlane.xlu0 %449 }
  0xdb   : > { %v582_v27 = vpop.xlane.xlu1 %581  ;;  %916 = vperm.xlu1 %2944, %v786_v23   ;;  %951 = vperm.xlu0 %2943, %v793_v24   ;;  %v499_v35 = vmul.f32 0.00390625, %v450_v26 }
  0xdc   : > { %v629_v28 = vsel %vm604_vm0, %v500_v25, %v582_v27 }
  0xdd   : > { %2823 = vmatprep.subr.mxu0 %v629_v28 }
  0xde   : > { %v402_v31 = vpop.xlane.xlu0 %401 }
  0xdf   : > { %v534_v32 = vpop.xlane.xlu1 %533  ;;  %871 = vperm.xlu1 %2944, %v777_v29   ;;  %v483_v40 = vmul.f32 0.00390625, %v402_v31 }
  0xe0   : > { %v613_v33 = vsel %vm604_vm0, %v484_v30, %v534_v32 }
  0xe1   : > { %2824 = vmatpush3.msra.mxu0 %v613_v33 }
  0xe2   : > { %v447_v36 = vpop.xlane.xlu0 %446 }
  0xe3   : > { %v579_v37 = vpop.xlane.xlu1 %578  ;;  %936 = vperm.xlu1 %2944, %v790_v34   ;;  %v498_v45 = vmul.f32 0.00390625, %v447_v36 }
  0xe4   : > { %v628_v38 = vsel %vm604_vm0, %v499_v35, %v579_v37  ;;  %v637_v35 = vld [vmem:[%s4719_s1] sm:$0xff]  ;;  %v640_v37 = vld [vmem:[%s4719_s1 + $0x18] sm:$0xff] }
  0xe5   : > { %2825 = vmatprep.subr.mxu0 %v628_v38  ;;  %v639_v38 = vld [vmem:[%s4719_s1 + $0x10] sm:$0xff] }
  0xe6   : > { %v399_v41 = vpop.xlane.xlu0 %398 }
  0xe7   : > { %v531_v42 = vpop.xlane.xlu1 %530  ;;  %891 = vperm.xlu1 %2944, %v781_v39   ;;  %v482_v50 = vmul.f32 0.00390625, %v399_v41  ;;  %v730_v39 = vld [vmem:[%s4721_s3] sm:$0xff] }
  0xe8   : > { %v612_v43 = vsel %vm604_vm0, %v483_v40, %v531_v42  ;;  %2885 = vmatprep.mubr.msk.f32.mxu1 %vm954_vm1, %v730_v39 }
  0xe9   : > { %2826 = vmatpush3.msra.mxu0 %v612_v43 }
  0xea   : > { %v444_v46 = vpop.xlane.xlu0 %443 }
  0xeb   : > { %v576_v47 = vpop.xlane.xlu1 %575  ;;  %911 = vperm.xlu1 %2944, %v785_v44   ;;  %v497_v54 = vmul.f32 0.00390625, %v444_v46 }
  0xec   : > { %v627_v48 = vsel %vm604_vm0, %v498_v45, %v576_v47 }
  0xed   : > { %2827 = vmatprep.subr.mxu0 %v627_v48 }
  0xee   : > { %v396_v51 = vpop.xlane.xlu0 %395 }
  0xef   : > { %v528_v52 = vpop.xlane.xlu1 %527  ;;  %931 = vperm.xlu1 %2944, %v789_v49   ;;  %v481_v58 = vmul.f32 0.00390625, %v396_v51 }
  0xf0   : > { %v611_v53 = vsel %vm604_vm0, %v482_v50, %v528_v52  ;;  %v731_v52 = vld [vmem:[%s4721_s3 + $0x8] sm:$0xff] }
  0xf1   : > { %2828 = vmatpush3.msra.mxu0 %v611_v53  ;;  %v732_v53 = vld [vmem:[%s4721_s3 + $0x10] sm:$0xff] }
  0xf2   : > { %v441_v55 = vpop.xlane.xlu0 %440 }
  0xf3   : > { %v573_v56 = vpop.xlane.xlu1 %572  ;;  %v496_v62 = vmul.f32 0.00390625, %v441_v55  ;;  %v734_v55 = vld [vmem:[%s4721_s3 + $0x20] sm:$0xff] }
  0xf4   : > { %v626_v57 = vsel %vm604_vm0, %v497_v54, %v573_v56  ;;  %v733_v54 = vld [vmem:[%s4721_s3 + $0x18] sm:$0xff]  ;;  %v735_v56 = vld [vmem:[%s4721_s3 + $0x28] sm:$0xff] }
  0xf5   : > { %2829 = vmatprep.subr.mxu0 %v626_v57  ;;  %v736_v57 = vld [vmem:[%s4721_s3 + $0x30] sm:$0xff] }
  0xf6   : > { %v393_v59 = vpop.xlane.xlu0 %392 }
  0xf7   : > { %v525_v60 = vpop.xlane.xlu1 %524  ;;  %v480_v2 = vmul.f32 0.00390625, %v393_v59  ;;  %v738_v59 = vld [vmem:[%s4721_s3 + $0x40] sm:$0xff] }
  0xf8   : > { %v610_v61 = vsel %vm604_vm0, %v481_v58, %v525_v60  ;;  %v737_v58 = vld [vmem:[%s4721_s3 + $0x38] sm:$0xff]  ;;  %v739_v60 = vld [vmem:[%s4721_s3 + $0x48] sm:$0xff] }
  0xf9   : > { %2830 = vmatpush3.msra.mxu0 %v610_v61  ;;  %v740_v61 = vld [vmem:[%s4721_s3 + $0x50] sm:$0xff] }
  0xfa   : > { %v438_v63 = vpop.xlane.xlu0 %437 }
  0xfb   : > { %v570_v0 = vpop.xlane.xlu1 %569  ;;  %v495_v6 = vmul.f32 0.00390625, %v438_v63  ;;  %v742_v63 = vld [vmem:[%s4721_s3 + $0x60] sm:$0xff] }
  0xfc   : > { %v625_v1 = vsel %vm604_vm0, %v496_v62, %v570_v0  ;;  %v741_v62 = vld [vmem:[%s4721_s3 + $0x58] sm:$0xff]  ;;  %v743_v0 = vld [vmem:[%s4721_s3 + $0x68] sm:$0xff] }
  0xfd   : > { %2831 = vmatprep.subr.mxu0 %v625_v1  ;;  %v744_v1 = vld [vmem:[%s4721_s3 + $0x70] sm:$0xff] }
  0xfe   : > { %v390_v3 = vpop.xlane.xlu0 %389 }
  0xff   : > { %v522_v4 = vpop.xlane.xlu1 %521  ;;  %v479_v10 = vmul.f32 0.00390625, %v390_v3  ;;  %v746_v3 = vld [vmem:[%s4721_s3 + $0x80] sm:$0xff] }
 0x100   : > { %v609_v5 = vsel %vm604_vm0, %v480_v2, %v522_v4  ;;  %v745_v2 = vld [vmem:[%s4721_s3 + $0x78] sm:$0xff]  ;;  %v747_v4 = vld [vmem:[%s4721_s3 + $0x88] sm:$0xff] }
 0x101   : > { %2832 = vmatpush3.msra.mxu0 %v609_v5  ;;  %v748_v5 = vld [vmem:[%s4721_s3 + $0x90] sm:$0xff] }
 0x102   : > { %v435_v7 = vpop.xlane.xlu0 %434 }
 0x103   : > { %v567_v8 = vpop.xlane.xlu1 %566  ;;  %v494_v14 = vmul.f32 0.00390625, %v435_v7  ;;  %v750_v7 = vld [vmem:[%s4721_s3 + $0xa0] sm:$0xff] }
 0x104   : > { %v624_v9 = vsel %vm604_vm0, %v495_v6, %v567_v8  ;;  %v749_v6 = vld [vmem:[%s4721_s3 + $0x98] sm:$0xff]  ;;  %v751_v8 = vld [vmem:[%s4721_s3 + $0xa8] sm:$0xff] }
 0x105   : > { %2833 = vmatprep.subr.mxu0 %v624_v9  ;;  %v752_v9 = vld [vmem:[%s4721_s3 + $0xb0] sm:$0xff] }
 0x106   : > { %v387_v11 = vpop.xlane.xlu0 %386 }
 0x107   : > { %v519_v12 = vpop.xlane.xlu1 %518  ;;  %v478_v18 = vmul.f32 0.00390625, %v387_v11  ;;  %v754_v11 = vld [vmem:[%s4721_s3 + $0xc0] sm:$0xff] }
 0x108   : > { %v608_v13 = vsel %vm604_vm0, %v479_v10, %v519_v12  ;;  %v753_v10 = vld [vmem:[%s4721_s3 + $0xb8] sm:$0xff]  ;;  %v755_v12 = vld [vmem:[%s4721_s3 + $0xc8] sm:$0xff] }
 0x109   : > { %2834 = vmatpush3.msra.mxu0 %v608_v13  ;;  %v756_v13 = vld [vmem:[%s4721_s3 + $0xd0] sm:$0xff] }
 0x10a   : > { %v432_v15 = vpop.xlane.xlu0 %431 }
 0x10b   : > { %v564_v16 = vpop.xlane.xlu1 %563  ;;  %v493_v22 = vmul.f32 0.00390625, %v432_v15  ;;  %v758_v15 = vld [vmem:[%s4721_s3 + $0xe0] sm:$0xff] }
 0x10c   : > { %v623_v17 = vsel %vm604_vm0, %v494_v14, %v564_v16  ;;  %v757_v14 = vld [vmem:[%s4721_s3 + $0xd8] sm:$0xff]  ;;  %v759_v16 = vld [vmem:[%s4721_s3 + $0xe8] sm:$0xff] }
 0x10d   : > { %2835 = vmatprep.subr.mxu0 %v623_v17  ;;  %v760_v17 = vld [vmem:[%s4721_s3 + $0xf0] sm:$0xff] }
 0x10e   : > { %v384_v19 = vpop.xlane.xlu0 %383 }
 0x10f   : > { %v516_v20 = vpop.xlane.xlu1 %515  ;;  %v477_v26 = vmul.f32 0.00390625, %v384_v19 }
 0x110   : > { %v607_v21 = vsel %vm604_vm0, %v478_v18, %v516_v20  ;;  %v761_v18 = vld [vmem:[%s4721_s3 + $0xf8] sm:$0xff] }
 0x111   : > { %2836 = vmatpush3.msra.mxu0 %v607_v21 }
 0x112   : > { %v429_v23 = vpop.xlane.xlu0 %428 }
 0x113   : > { %v561_v24 = vpop.xlane.xlu1 %560  ;;  %v492_v30 = vmul.f32 0.00390625, %v429_v23 }
 0x114   : > { %v622_v25 = vsel %vm604_vm0, %v493_v22, %v561_v24 }
 0x115   : > { %2837 = vmatprep.subr.mxu0 %v622_v25 }
 0x116   : > { %v381_v27 = vpop.xlane.xlu0 %380 }
 0x117   : > { %v513_v28 = vpop.xlane.xlu1 %512  ;;  %v476_v31 = vmul.f32 0.00390625, %v381_v27 }
 0x118   : > { %v606_v29 = vsel %vm604_vm0, %v477_v26, %v513_v28 }
 0x119   : > { %2838 = vmatpush3.msra.mxu0 %v606_v29 }
 0x11a   : > { %v558_v32 = vpop.xlane.xlu0 %557 }
 0x11b   : > { %v510_v33 = vpop.xlane.xlu1 %509  ;;  %v621_v34 = vsel %vm604_vm0, %v492_v30, %v558_v32 }
 0x11c   : > { %2839 = vmatprep.subr.mxu0 %v621_v34  ;;  %v605_v36 = vsel %vm604_vm0, %v476_v31, %v510_v33 }
 0x11d   : > { %2840 = vmatpush3.msra.mxu0 %v605_v36 }
 0x11e   : > { %718 = vmatmul.mubr.f32.vlgmr.msra.gmra.mxu0 %v637_v35 }
 0x11f   : > { %722 = vmatprep.mubr.f32.mxu0 %v640_v37  ;;  %v646_v46 = vpop.permute.xlu1 %645 }
 0x122   : > { %723 = vmatmul.mubr.f32.gmra.mxu0 %v639_v38  ;;  %v651_v47 = vpop.permute.xlu0 %650 }
 0x123   : > { %v797_v19 = vpop.permute.xlu1 %796 }
 0x126   : > { %v827_v26 = vpop.permute.xlu0 %826 }
 0x127   : > { %v802_v20 = vpop.permute.xlu1 %801 }
 0x12a   : > { %v862_v28 = vpop.permute.xlu0 %861 }
 0x12b   : > { %v817_v21 = vpop.permute.xlu1 %816 }
 0x12e   : > { %v877_v30 = vpop.permute.xlu0 %876 }
 0x12f   : > { %v822_v22 = vpop.permute.xlu1 %821 }
 0x132   : > { %v812_v36 = vpop.permute.xlu0 %811 }
 0x133   : > { %v837_v23 = vpop.permute.xlu1 %836 }
 0x137   : > { %v842_v24 = vpop.permute.xlu1 %841 }
 0x13b   : > { %v807_v25 = vpop.permute.xlu1 %806 }
 0x13f   : > { %v857_v27 = vpop.permute.xlu1 %856 }
 0x143   : > { %v847_v29 = vpop.permute.xlu1 %846 }
 0x147   : > { %v3559_v31 = vpop.permute.xlu1 %881 }
 0x14b   : > { %v832_v39 = vpop.permute.xlu1 %831 }
 0x1de   : > { %v2841_v40 = vpop.f32.mrf.mxu0 }
 0x1e0   : > { %v2842_v41 = vpop.f32.mrf.mxu0 }
 0x1e1   : > { %v2843_v43 = vadd.f32 %v2842_v41, %v2841_v40 }
 0x1e2   : > { %v2844_v42 = vpop.f32.mrf.mxu0 }
 0x1e3   : > { %v720_v48 = vadd.f32 %v2843_v43, %v646_v46  ;;  %v897_v46 = vpop.permute.xlu1 %896 }
 0x1e4   : > { %v2845_v44 = vpop.f32.mrf.mxu0 }
 0x1e5   : > { %v2846_v45 = vadd.f32 %v2845_v44, %v2844_v42  ;;  %v728_v51 = vmax.f32 %v720_v48, 0.0 }
 0x1e7   : > { %v725_v49 = vadd.f32 %v2846_v45, %v651_v47 }
 0x1e9   : > { %v729_v50 = vmax.f32 %v725_v49, 0.0 }
 0x1eb   : > { %2881 = vmatprep.subr.mxu1 %v729_v50 }
 0x1ec   : > { %2882 = vmatpush3.msra.mxu1 %v729_v50 }
 0x1ed   : > { %2883 = vmatprep.subr.mxu1 %v728_v51 }
 0x1ee   : > { %2884 = vmatpush3.msra.mxu1 %v728_v51 }
 0x1ef   : > { %2886 = vmatmul.mubr.msk.f32.vlgmr.msra.gmra.mxu1 %vm954_vm1, %v731_v52  ;;  %v867_v52 = vpop.permute.xlu0 %866 }
 0x1f0   : > { %2888 = vmatprep.mubr.msk.f32.mxu1 %vm954_vm1, %v732_v53  ;;  %v852_v53 = vpop.permute.xlu1 %851 }
 0x1f3   : > { %2889 = vmatmul.mubr.msk.f32.gmra.mxu1 %vm954_vm1, %v733_v54 }
 0x1f4   : > { %2891 = vmatprep.mubr.msk.f32.mxu1 %vm954_vm1, %v734_v55 }
 0x1f7   : > { %2892 = vmatmul.mubr.msk.f32.gmra.mxu1 %vm954_vm1, %v735_v56 }
 0x1f8   : > { %2894 = vmatprep.mubr.msk.f32.mxu1 %vm954_vm1, %v736_v57 }
 0x1fb   : > { %2895 = vmatmul.mubr.msk.f32.gmra.mxu1 %vm954_vm1, %v737_v58 }
 0x1fc   : > { %2897 = vmatprep.mubr.msk.f32.mxu1 %vm954_vm1, %v738_v59  ;;  %v902_v59 = vpop.permute.xlu0 %901 }
 0x1ff   : > { %2898 = vmatmul.mubr.msk.f32.gmra.mxu1 %vm954_vm1, %v739_v60 }
 0x200   : > { %2900 = vmatprep.mubr.msk.f32.mxu1 %vm954_vm1, %v740_v61  ;;  %v917_v61 = vpop.permute.xlu1 %916 }
 0x203   : > { %2901 = vmatmul.mubr.msk.f32.gmra.mxu1 %vm954_vm1, %v741_v62 }
 0x204   : > { %2903 = vmatprep.mubr.msk.f32.mxu1 %vm954_vm1, %v742_v63 }
 0x207   : > { %2904 = vmatmul.mubr.msk.f32.gmra.mxu1 %vm954_vm1, %v743_v0 }
 0x208   : > { %2906 = vmatprep.mubr.msk.f32.mxu1 %vm954_vm1, %v744_v1 }
 0x20b   : > { %2907 = vmatmul.mubr.msk.f32.gmra.mxu1 %vm954_vm1, %v745_v2 }
 0x20c   : > { %2909 = vmatprep.mubr.msk.f32.mxu1 %vm954_vm1, %v746_v3  ;;  %v887_v3 = vpop.permute.xlu0 %886 }
 0x20f   : > { %2910 = vmatmul.mubr.msk.f32.gmra.mxu1 %vm954_vm1, %v747_v4  ;;  %v872_v4 = vpop.permute.xlu1 %871 }
 0x210   : > { %2912 = vmatprep.mubr.msk.f32.mxu1 %vm954_vm1, %v748_v5 }
 0x213   : > { %2913 = vmatmul.mubr.msk.f32.gmra.mxu1 %vm954_vm1, %v749_v6 }
 0x214   : > { %2915 = vmatprep.mubr.msk.f32.mxu1 %vm954_vm1, %v750_v7 }
 0x217   : > { %2916 = vmatmul.mubr.msk.f32.gmra.mxu1 %vm954_vm1, %v751_v8 }
 0x218   : > { %2918 = vmatprep.mubr.msk.f32.mxu1 %vm954_vm1, %v752_v9 }
 0x21b   : > { %2919 = vmatmul.mubr.msk.f32.gmra.mxu1 %vm954_vm1, %v753_v10  ;;  %v922_v10 = vpop.permute.xlu0 %921 }
 0x21c   : > { %2921 = vmatprep.mubr.msk.f32.mxu1 %vm954_vm1, %v754_v11 }
 0x21f   : > { %2922 = vmatmul.mubr.msk.f32.gmra.mxu1 %vm954_vm1, %v755_v12 }
 0x220   : > { %2924 = vmatprep.mubr.msk.f32.mxu1 %vm954_vm1, %v756_v13  ;;  %v937_v13 = vpop.permute.xlu1 %936 }
 0x223   : > { %2925 = vmatmul.mubr.msk.f32.gmra.mxu1 %vm954_vm1, %v757_v14 }
 0x224   : > { %2927 = vmatprep.mubr.msk.f32.mxu1 %vm954_vm1, %v758_v15 }
 0x227   : > { %2928 = vmatmul.mubr.msk.f32.gmra.mxu1 %vm954_vm1, %v759_v16 }
 0x228   : > { %2930 = vmatprep.mubr.msk.f32.mxu1 %vm954_vm1, %v760_v17 }
 0x22b   : > { %2931 = vmatmul.mubr.msk.f32.gmra.mxu1 %vm954_vm1, %v761_v18 }
 0x2af   : > { %v2887_v32 = vpop.f32.mrf.mxu1 }
 0x2b0   : > { %v3561_v33 = vadd.f32 %v2887_v32, %v802_v20  ;;  %v892_v20 = vpop.permute.xlu1 %891 }
 0x2b1   : > { %v1117_v34 = vpop.f32.mrf.mxu1 }
 0x2b2   : > { %v3563_v35 = vadd.f32 %v1117_v34, %v797_v19  ;;  %1310 = vrot.lane.b32.xlu0 %v3561_v33, %s3154_s20  ;;  %v907_v19 = vpop.permute.xlu0 %906 }
 0x2b3   : > { %v2890_v37 = vpop.f32.mrf.mxu1 }
 0x2b4   : > { %v3567_v38 = vadd.f32 %v2890_v37, %v812_v36  ;;  %1308 = vrot.lane.b32.xlu1 %v3563_v35, %s3154_s20 }
 0x2b5   : > { %v1127_v40 = vpop.f32.mrf.mxu1 }
 0x2b6   : > { %v3571_v41 = vadd.f32 %v1127_v40, %v807_v25  ;;  %1314 = vrot.lane.b32.xlu0 %v3567_v38, %s3154_s20 }
 0x2b7   : > { %v2893_v42 = vpop.f32.mrf.mxu1 }
 0x2b8   : > { %v3575_v43 = vadd.f32 %v2893_v42, %v822_v22  ;;  %1312 = vrot.lane.b32.xlu1 %v3571_v41, %s3154_s20 }
 0x2b9   : > { %v1137_v44 = vpop.f32.mrf.mxu1 }
 0x2ba   : > { %v3579_v45 = vadd.f32 %v1137_v44, %v817_v21  ;;  %1318 = vrot.lane.b32.xlu0 %v3575_v43, %s3154_s20 }
 0x2bb   : > { %v2896_v47 = vpop.f32.mrf.mxu1 }
 0x2bc   : > { %1316 = vrot.lane.b32.xlu1 %v3579_v45, %s3154_s20  ;;  %v3585_v49 = vadd.f32 %v2896_v47, %v832_v39 }
 0x2bd   : > { %v1147_v48 = vpop.f32.mrf.mxu1 }
 0x2be   : > { %v3587_v50 = vadd.f32 %v1147_v48, %v827_v26 }
 0x2bf   : > { %v2899_v51 = vpop.f32.mrf.mxu1 }
 0x2c0   : > { %1322 = vrot.lane.b32.xlu1 %v3585_v49, %s3154_s20  ;;  %1320 = vrot.lane.b32.xlu0 %v3587_v50, %s3154_s20  ;;  %v3593_v55 = vadd.f32 %v2899_v51, %v842_v24 }
 0x2c1   : > { %v1157_v54 = vpop.f32.mrf.mxu1 }
 0x2c2   : > { %v3595_v56 = vadd.f32 %v1157_v54, %v837_v23 }
 0x2c3   : > { %v2902_v57 = vpop.f32.mrf.mxu1 }
 0x2c4   : > { %1324 = vrot.lane.b32.xlu1 %v3595_v56, %s3154_s20  ;;  %1326 = vrot.lane.b32.xlu0 %v3593_v55, %s3154_s20  ;;  %v3601_v60 = vadd.f32 %v2902_v57, %v852_v53 }
 0x2c5   : > { %v1167_v58 = vpop.f32.mrf.mxu1 }
 0x2c6   : > { %v3607_v1 = vadd.f32 %v1167_v58, %v847_v29 }
 0x2c7   : > { %v2905_v62 = vpop.f32.mrf.mxu1 }
 0x2c8   : > { %v3603_v63 = vadd.f32 %v2905_v62, %v862_v28  ;;  %1330 = vrot.lane.b32.xlu1 %v3601_v60, %s3154_s20  ;;  %v942_v28 = vpop.permute.xlu0 %941 }
 0x2c9   : > { %v1177_v0 = vpop.f32.mrf.mxu1 }
 0x2ca   : > { %1334 = vrot.lane.b32.xlu0 %v3603_v63, %s3154_s20  ;;  %v3613_v6 = vadd.f32 %v1177_v0, %v857_v27 }
 0x2cb   : > { %v2908_v2 = vpop.f32.mrf.mxu1 }
 0x2cc   : > { %1328 = vrot.lane.b32.xlu1 %v3607_v1, %s3154_s20  ;;  %v3621_v11 = vadd.f32 %v2908_v2, %v872_v4  ;;  %v927_v37 = vpop.permute.xlu0 %926 }
 0x2cd   : > { %v1187_v5 = vpop.f32.mrf.mxu1 }
 0x2ce   : > { %v3615_v7 = vadd.f32 %v1187_v5, %v867_v52 }
 0x2cf   : > { %v2911_v8 = vpop.f32.mrf.mxu1 }
 0x2d0   : > { %1332 = vrot.lane.b32.xlu1 %v3613_v6, %s3154_s20  ;;  %1336 = vrot.lane.b32.xlu0 %v3615_v7, %s3154_s20  ;;  %v3630_v16 = vadd.f32 %v2911_v8, %v3559_v31  ;;  %v947_v51 = vpop.permute.xlu0 %946 }
 0x2d1   : > { %v1197_v9 = vpop.f32.mrf.mxu1 }
 0x2d2   : > { %v3623_v12 = vadd.f32 %v1197_v9, %v877_v30  ;;  %v912_v30 = vpop.permute.xlu1 %911 }
 0x2d3   : > { %v2914_v14 = vpop.f32.mrf.mxu1 }
 0x2d4   : > { %1338 = vrot.lane.b32.xlu1 %v3621_v11, %s3154_s20  ;;  %1340 = vrot.lane.b32.xlu0 %v3623_v12, %s3154_s20  ;;  %v3638_v22 = vadd.f32 %v2914_v14, %v892_v20 }
 0x2d5   : > { %v1207_v15 = vpop.f32.mrf.mxu1 }
 0x2d6   : > { %v3632_v17 = vadd.f32 %v1207_v15, %v887_v3  ;;  %v932_v53 = vpop.permute.xlu1 %931 }
 0x2d7   : > { %v2917_v18 = vpop.f32.mrf.mxu1 }
 0x2d8   : > { %1342 = vrot.lane.b32.xlu1 %v3630_v16, %s3154_s20  ;;  %1344 = vrot.lane.b32.xlu0 %v3632_v17, %s3154_s20  ;;  %v3640_v23 = vadd.f32 %v2917_v18, %v902_v59  ;;  %v952_v59 = vpop.permute.xlu0 %951 }
 0x2d9   : > { %v1217_v21 = vpop.f32.mrf.mxu1 }
 0x2da   : > { %v3646_v26 = vadd.f32 %v1217_v21, %v897_v46 }
 0x2db   : > { %v2920_v24 = vpop.f32.mrf.mxu1 }
 0x2dc   : > { %1346 = vrot.lane.b32.xlu1 %v3638_v22, %s3154_s20  ;;  %1350 = vrot.lane.b32.xlu0 %v3640_v23, %s3154_s20  ;;  %v3654_v32 = vadd.f32 %v2920_v24, %v912_v30 }
 0x2dd   : > { %v1227_v25 = vpop.f32.mrf.mxu1 }
 0x2de   : > { %v3648_v27 = vadd.f32 %v1227_v25, %v907_v19 }
 0x2df   : > { %v2923_v29 = vpop.f32.mrf.mxu1 }
 0x2e0   : > { %1348 = vrot.lane.b32.xlu1 %v3646_v26, %s3154_s20  ;;  %1352 = vrot.lane.b32.xlu0 %v3648_v27, %s3154_s20  ;;  %v3656_v34 = vadd.f32 %v2923_v29, %v922_v10 }
 0x2e1   : > { %v1237_v31 = vpop.f32.mrf.mxu1 }
 0x2e2   : > { %v3662_v40 = vadd.f32 %v1237_v31, %v917_v61 }
 0x2e3   : > { %v2926_v36 = vpop.f32.mrf.mxu1 }
 0x2e4   : > { %1354 = vrot.lane.b32.xlu1 %v3654_v32, %s3154_s20  ;;  %1358 = vrot.lane.b32.xlu0 %v3656_v34, %s3154_s20  ;;  %v3678_v57 = vadd.f32 %v2926_v36, %v932_v53 }
 0x2e5   : > { %v1247_v39 = vpop.f32.mrf.mxu1 }
 0x2e6   : > { %v3664_v42 = vadd.f32 %v1247_v39, %v927_v37 }
 0x2e7   : > { %v2929_v44 = vpop.f32.mrf.mxu1 }
 0x2e8   : > { %1356 = vrot.lane.b32.xlu1 %v3662_v40, %s3154_s20  ;;  %1360 = vrot.lane.b32.xlu0 %v3664_v42, %s3154_s20  ;;  %v3670_v47 = vadd.f32 %v2929_v44, %v942_v28 }
 0x2e9   : > { %v1257_v46 = vpop.f32.mrf.mxu1 }
 0x2ea   : > { %v3672_v48 = vadd.f32 %v1257_v46, %v937_v13 }
 0x2eb   : > { %v2932_v52 = vpop.f32.mrf.mxu1 }
 0x2ec   : > { %1364 = vrot.lane.b32.xlu1 %v3672_v48, %s3154_s20  ;;  %1366 = vrot.lane.b32.xlu0 %v3670_v47, %s3154_s20  ;;  %v3686_v61 = vadd.f32 %v2932_v52, %v952_v59 }
 0x2ed   : > { %v1267_v54 = vpop.f32.mrf.mxu1 }
 0x2ee   : > { %v3680_v58 = vadd.f32 %v1267_v54, %v947_v51 }
 0x2f0   : > { %1362 = vrot.lane.b32.xlu1 %v3678_v57, %s3154_s20  ;;  %1368 = vrot.lane.b32.xlu0 %v3680_v58, %s3154_s20 }
 0x2f4   : > { %1370 = vrot.lane.b32.xlu0 %v3686_v61, %s3154_s20 }
 0x324   : > { %v1311_v62 = vpop.permute.xlu0 %1310 }
 0x325   : > { %v1405_v0 = vadd.f32 %v1311_v62, %v3561_v33 }
 0x326   : > { %v1309_v2 = vpop.permute.xlu1 %1308 }
 0x327   : > { %v2772_v3 = vmul.f32 -1.442695, %v1405_v0  ;;  %v1404_v4 = vadd.f32 %v1309_v2, %v3563_v35 }
 0x328   : > { %v1315_v5 = vpop.permute.xlu0 %1314 }
 0x329   : > { %2945 = vpow2.f32 %v2772_v3  ;;  %v2771_v8 = vmul.f32 -1.442695, %v1404_v4  ;;  %v1407_v9 = vadd.f32 %v1315_v5, %v3567_v38 }
 0x32a   : > { %v1313_v10 = vpop.permute.xlu1 %1312 }
 0x32b   : > { %2947 = vpow2.f32 %v2771_v8  ;;  %v2774_v13 = vmul.f32 -1.442695, %v1407_v9  ;;  %v1406_v14 = vadd.f32 %v1313_v10, %v3571_v41 }
 0x32c   : > { %v1319_v15 = vpop.permute.xlu0 %1318 }
 0x32d   : > { %2949 = vpow2.f32 %v2774_v13  ;;  %v2773_v18 = vmul.f32 -1.442695, %v1406_v14  ;;  %v1409_v19 = vadd.f32 %v1319_v15, %v3575_v43 }
 0x32e   : > { %v1317_v33 = vpop.permute.xlu1 %1316 }
 0x32f   : > { %2951 = vpow2.f32 %v2773_v18  ;;  %v2776_v20 = vmul.f32 -1.442695, %v1409_v19  ;;  %v1408_v35 = vadd.f32 %v1317_v33, %v3579_v45 }
 0x331   : > { %2953 = vpow2.f32 %v2776_v20  ;;  %v2775_v21 = vmul.f32 -1.442695, %v1408_v35 }
 0x332   : > { %v1323_v24 = vpop.permute.xlu1 %1322  ;;  %v1321_v25 = vpop.permute.xlu0 %1320 }
 0x333   : > { %2955 = vpow2.f32 %v2775_v21  ;;  %v1411_v38 = vadd.f32 %v1323_v24, %v3585_v49  ;;  %v1410_v28 = vadd.f32 %v1321_v25, %v3587_v50 }
 0x335   : > { %v2778_v41 = vmul.f32 -1.442695, %v1411_v38  ;;  %v2777_v29 = vmul.f32 -1.442695, %v1410_v28 }
 0x336   : > { %v2946_v30 = vpop.eup %2945  ;;  %v1325_v31 = vpop.permute.xlu1 %1324 }
 0x337   : > { %v1327_v36 = vpop.permute.xlu0 %1326  ;;  %v1533_v43 = vadd.f32 1.0, %v2946_v30  ;;  %2957 = vpow2.f32 %v2778_v41  ;;  %v1412_v37 = vadd.f32 %v1325_v31, %v3595_v56 }
 0x338   : > { %v1413_v45 = vadd.f32 %v1327_v36, %v3593_v55  ;;  %v2948_v39 = vpop.eup %2947  ;;  %2959 = vpow2.f32 %v2777_v29 }
 0x339   : > { %2961 = vrcp.f32 %v1533_v43  ;;  %v1532_v44 = vadd.f32 1.0, %v2948_v39  ;;  %v2779_v46 = vmul.f32 -1.442695, %v1412_v37 }
 0x33a   : > { %v2950_v51 = vpop.eup %2949  ;;  %v2780_v49 = vmul.f32 -1.442695, %v1413_v45  ;;  %v1331_v52 = vpop.permute.xlu1 %1330 }
 0x33b   : > { %2963 = vrcp.f32 %v1532_v44  ;;  %v1535_v50 = vadd.f32 1.0, %v2950_v51  ;;  %v1415_v53 = vadd.f32 %v1331_v52, %v3601_v60 }
 0x33c   : > { %v2952_v54 = vpop.eup %2951  ;;  %2965 = vpow2.f32 %v2779_v46  ;;  %v1335_v59 = vpop.permute.xlu0 %1334 }
 0x33d   : > { %2967 = vrcp.f32 %v1535_v50  ;;  %v1534_v62 = vadd.f32 1.0, %v2952_v54  ;;  %v2782_v56 = vmul.f32 -1.442695, %v1415_v53  ;;  %v1417_v55 = vadd.f32 %v1335_v59, %v3603_v63 }
 0x33e   : > { %v2954_v0 = vpop.eup %2953  ;;  %2969 = vpow2.f32 %v2780_v49  ;;  %v1329_v2 = vpop.permute.xlu1 %1328 }
 0x33f   : > { %2971 = vrcp.f32 %v1534_v62  ;;  %v1537_v3 = vadd.f32 1.0, %v2954_v0  ;;  %v2784_v4 = vmul.f32 -1.442695, %v1417_v55  ;;  %v1414_v5 = vadd.f32 %v1329_v2, %v3607_v1 }
 0x340   : > { %v2956_v8 = vpop.eup %2955  ;;  %2973 = vpow2.f32 %v2782_v56 }
 0x341   : > { %2975 = vrcp.f32 %v1537_v3  ;;  %v1536_v60 = vadd.f32 1.0, %v2956_v8  ;;  %v2781_v9 = vmul.f32 -1.442695, %v1414_v5 }
 0x342   : > { %2977 = vpow2.f32 %v2784_v4  ;;  %v1333_v10 = vpop.permute.xlu1 %1332  ;;  %v1337_v13 = vpop.permute.xlu0 %1336 }
 0x343   : > { %2979 = vrcp.f32 %v1536_v60  ;;  %v1416_v14 = vadd.f32 %v1333_v10, %v3613_v6  ;;  %v1418_v63 = vadd.f32 %v1337_v13, %v3615_v7 }
 0x344   : > { %v2958_v15 = vpop.eup %2957  ;;  %2981 = vpow2.f32 %v2781_v9 }
 0x345   : > { %v2960_v18 = vpop.eup %2959  ;;  %v1539_v19 = vadd.f32 1.0, %v2958_v15  ;;  %v2783_v33 = vmul.f32 -1.442695, %v1416_v14  ;;  %v2785_v35 = vmul.f32 -1.442695, %v1418_v63 }
 0x346   : > { %v2962_v20 = vpop.eup %2961  ;;  %v1538_v1 = vadd.f32 1.0, %v2960_v18  ;;  %v1339_v21 = vpop.permute.xlu1 %1338 }
 0x347   : > { %v1341_v24 = vpop.permute.xlu0 %1340  ;;  %2983 = vrcp.f32 %v1539_v19  ;;  %v1419_v25 = vadd.f32 %v1339_v21, %v3621_v11  ;;  %1635 = vperm.xlu0 %2943, %v2962_v20  }
 0x348   : > { %v1420_v38 = vadd.f32 %v1341_v24, %v3623_v12  ;;  %v2964_v28 = vpop.eup %2963  ;;  %2985 = vrcp.f32 %v1538_v1 }
 0x349   : > { %v2966_v6 = vpop.eup %2965  ;;  %2987 = vpow2.f32 %v2783_v33  ;;  %v2786_v7 = vmul.f32 -1.442695, %v1419_v25  ;;  %1630 = vperm.xlu1 %2944, %v2964_v28  }
 0x34a   : > { %v2787_v41 = vmul.f32 -1.442695, %v1420_v38  ;;  %v2968_v29 = vpop.eup %2967  ;;  %v1540_v30 = vadd.f32 1.0, %v2966_v6  ;;  %2989 = vpow2.f32 %v2785_v35  ;;  %v1343_v31 = vpop.permute.xlu1 %1342 }
 0x34b   : > { %v1345_v36 = vpop.permute.xlu0 %1344  ;;  %v2970_v43 = vpop.eup %2969  ;;  %2991 = vpow2.f32 %v2786_v7  ;;  %v1421_v37 = vadd.f32 %v1343_v31, %v3630_v16  ;;  %1645 = vperm.xlu0 %2943, %v2968_v29  }
 0x34c   : > { %v1422_v11 = vadd.f32 %v1345_v36, %v3632_v17  ;;  %v2972_v12 = vpop.eup %2971  ;;  %2993 = vrcp.f32 %v1540_v30  ;;  %v1541_v45 = vadd.f32 1.0, %v2970_v43 }
 0x34d   : > { %v2974_v39 = vpop.eup %2973  ;;  %2995 = vpow2.f32 %v2787_v41  ;;  %v2788_v44 = vmul.f32 -1.442695, %v1421_v37  ;;  %1640 = vperm.xlu1 %2944, %v2972_v12   ;;  %v2287_v12 = vld [vmem:[%s4724_s6 + $0xf8] sm:$0xff] }
 0x34e   : > { %v2789_v46 = vmul.f32 -1.442695, %v1422_v11  ;;  %v2976_v51 = vpop.eup %2975  ;;  %2997 = vrcp.f32 %v1541_v45  ;;  %v1543_v49 = vadd.f32 1.0, %v2974_v39  ;;  %v1347_v52 = vpop.permute.xlu1 %1346  ;;  %v2223_v45 = vld [vmem:[%s4723_s5 + $0xf8] sm:$0xff]  ;;  %2320 = vmatprep.subr.mxu1 %v2287_v12  ;;  %v2274_v12 = vld [vmem:[%s4724_s6 + $0x90] sm:$0xff] }
 0x34f   : > { %v1351_v50 = vpop.permute.xlu0 %1350  ;;  %v2978_v53 = vpop.eup %2977  ;;  %2999 = vpow2.f32 %v2788_v44  ;;  %v1423_v16 = vadd.f32 %v1347_v52, %v3638_v22  ;;  %1655 = vperm.xlu0 %2943, %v2976_v51   ;;  %2391 = vmatprep.subr.mxu0 %v2223_v45  ;;  %v2210_v45 = vld [vmem:[%s4723_s5 + $0x90] sm:$0xff] }
 0x350   : > { %v1425_v17 = vadd.f32 %v1351_v50, %v3640_v23  ;;  %v2980_v54 = vpop.eup %2979  ;;  %3001 = vrcp.f32 %v1543_v49  ;;  %v1545_v59 = vadd.f32 1.0, %v2978_v53  ;;  %v2285_v50 = vld [vmem:[%s4724_s6 + $0xe8] sm:$0xff]  ;;  %v2222_v53 = vld [vmem:[%s4723_s5 + $0xf0] sm:$0xff] }
 0x351   : > { %v2982_v62 = vpop.eup %2981  ;;  %3003 = vpow2.f32 %v2789_v46  ;;  %v2790_v56 = vmul.f32 -1.442695, %v1423_v16  ;;  %1650 = vperm.xlu1 %2944, %v2980_v54   ;;  %v2221_v16 = vld [vmem:[%s4723_s5 + $0xe8] sm:$0xff]  ;;  %2392 = vmatpush1.msra.mxu0 %v2222_v53  ;;  %v2207_v53 = vld [vmem:[%s4723_s5 + $0x78] sm:$0xff] }
 0x352   : > { %v2792_v55 = vmul.f32 -1.442695, %v1425_v17  ;;  %3005 = vrcp.f32 %v1545_v59  ;;  %v1542_v0 = vadd.f32 1.0, %v2982_v62  ;;  %v1349_v2 = vpop.permute.xlu1 %1348  ;;  %v2284_v62 = vld [vmem:[%s4724_s6 + $0xe0] sm:$0xff]  ;;  %2393 = vmatprep.subr.mxu0 %v2221_v16 }
 0x353   : > { %v1353_v3 = vpop.permute.xlu0 %1352  ;;  %3007 = vpow2.f32 %v2790_v56  ;;  %v1424_v4 = vadd.f32 %v1349_v2, %v3646_v26  ;;  %v2220_v56 = vld [vmem:[%s4723_s5 + $0xe0] sm:$0xff] }
 0x354   : > { %v1426_v22 = vadd.f32 %v1353_v3, %v3648_v27  ;;  %v2984_v5 = vpop.eup %2983  ;;  %3009 = vrcp.f32 %v1542_v0  ;;  %2394 = vmatpush1.msra.mxu0 %v2220_v56 }
 0x355   : > { %v2986_v23 = vpop.eup %2985  ;;  %3011 = vpow2.f32 %v2792_v55  ;;  %v2791_v8 = vmul.f32 -1.442695, %v1424_v4  ;;  %1665 = vperm.xlu1 %2944, %v2984_v5   ;;  %v2282_v4 = vld [vmem:[%s4724_s6 + $0xd0] sm:$0xff] }
 0x356   : > { %v2793_v60 = vmul.f32 -1.442695, %v1426_v22  ;;  %v2988_v9 = vpop.eup %2987  ;;  %1660 = vperm.xlu0 %2943, %v2986_v23   ;;  %v1355_v10 = vpop.permute.xlu1 %1354 }
 0x357   : > { %v1359_v13 = vpop.permute.xlu0 %1358  ;;  %v2990_v14 = vpop.eup %2989  ;;  %v1544_v63 = vadd.f32 1.0, %v2988_v9  ;;  %3013 = vpow2.f32 %v2791_v8  ;;  %v1427_v15 = vadd.f32 %v1355_v10, %v3654_v32  ;;  %v2218_v9 = vld [vmem:[%s4723_s5 + $0xd0] sm:$0xff]  ;;  %v2217_v10 = vld [vmem:[%s4723_s5 + $0xc8] sm:$0xff] }
 0x358   : > { %v1429_v26 = vadd.f32 %v1359_v13, %v3656_v34  ;;  %v2992_v18 = vpop.eup %2991  ;;  %v1546_v27 = vadd.f32 1.0, %v2990_v14  ;;  %3015 = vpow2.f32 %v2793_v60  ;;  %v2281_v60 = vld [vmem:[%s4724_s6 + $0xc8] sm:$0xff] }
 0x359   : > { %v2994_v19 = vpop.eup %2993  ;;  %3017 = vrcp.f32 %v1544_v63  ;;  %v1547_v33 = vadd.f32 1.0, %v2992_v18  ;;  %v2794_v20 = vmul.f32 -1.442695, %v1427_v15  ;;  %v2280_v63 = vld [vmem:[%s4724_s6 + $0xc0] sm:$0xff]  ;;  %v2279_v18 = vld [vmem:[%s4724_s6 + $0xb8] sm:$0xff] }
 0x35a   : > { %v2996_v1 = vpop.eup %2995  ;;  %3019 = vrcp.f32 %v1546_v27  ;;  %v2796_v35 = vmul.f32 -1.442695, %v1429_v26  ;;  %1670 = vperm.xlu1 %2944, %v2994_v19   ;;  %v1357_v21 = vpop.permute.xlu1 %1356  ;;  %v2216_v15 = vld [vmem:[%s4723_s5 + $0xc0] sm:$0xff]  ;;  %v2278_v19 = vld [vmem:[%s4724_s6 + $0xb0] sm:$0xff] }
 0x35b   : > { %v1361_v24 = vpop.permute.xlu0 %1360  ;;  %v2998_v25 = vpop.eup %2997  ;;  %3021 = vrcp.f32 %v1547_v33  ;;  %v1548_v38 = vadd.f32 1.0, %v2996_v1  ;;  %v1428_v32 = vadd.f32 %v1357_v21, %v3662_v40  ;;  %v2215_v33 = vld [vmem:[%s4723_s5 + $0xb8] sm:$0xff]  ;;  %v2214_v21 = vld [vmem:[%s4723_s5 + $0xb0] sm:$0xff] }
 0x35c   : > { %v1430_v34 = vadd.f32 %v1361_v24, %v3664_v42  ;;  %v3000_v28 = vpop.eup %2999  ;;  %3023 = vpow2.f32 %v2794_v20  ;;  %1675 = vperm.xlu0 %2943, %v2998_v25   ;;  %v2276_v25 = vld [vmem:[%s4724_s6 + $0xa0] sm:$0xff] }
 0x35d   : > { %v3002_v6 = vpop.eup %3001  ;;  %3025 = vrcp.f32 %v1548_v38  ;;  %v1549_v7 = vadd.f32 1.0, %v3000_v28  ;;  %v2795_v41 = vmul.f32 -1.442695, %v1428_v32  ;;  %v2213_v38 = vld [vmem:[%s4723_s5 + $0xa8] sm:$0xff]  ;;  %v2275_v28 = vld [vmem:[%s4724_s6 + $0x98] sm:$0xff] }
 0x35e   : > { %v3004_v29 = vpop.eup %3003  ;;  %3027 = vpow2.f32 %v2796_v35  ;;  %v2797_v30 = vmul.f32 -1.442695, %v1430_v34  ;;  %1685 = vperm.xlu1 %2944, %v3002_v6   ;;  %v1365_v31 = vpop.permute.xlu1 %1364  ;;  %v2277_v35 = vld [vmem:[%s4724_s6 + $0xa8] sm:$0xff] }
 0x35f   : > { %v1367_v36 = vpop.permute.xlu0 %1366  ;;  %v3006_v43 = vpop.eup %3005  ;;  %3029 = vrcp.f32 %v1549_v7  ;;  %v1550_v37 = vadd.f32 1.0, %v3004_v29  ;;  %v1432_v40 = vadd.f32 %v1365_v31, %v3672_v48  ;;  %v2212_v7 = vld [vmem:[%s4723_s5 + $0xa0] sm:$0xff] }
 0x360   : > { %v1433_v42 = vadd.f32 %v1367_v36, %v3670_v47  ;;  %v3008_v11 = vpop.eup %3007  ;;  %3031 = vpow2.f32 %v2795_v41  ;;  %1695 = vperm.xlu0 %2943, %v3006_v43   ;;  %v2286_v47 = vld [vmem:[%s4724_s6 + $0xf0] sm:$0xff] }
 0x361   : > { %v3010_v39 = vpop.eup %3009  ;;  %3033 = vrcp.f32 %v1550_v37  ;;  %v1551_v44 = vadd.f32 1.0, %v3008_v11  ;;  %v2799_v46 = vmul.f32 -1.442695, %v1432_v40  ;;  %2321 = vmatpush1.msra.mxu1 %v2286_v47  ;;  %v2209_v47 = vld [vmem:[%s4723_s5 + $0x88] sm:$0xff] }
 0x362   : > { %v3012_v48 = vpop.eup %3011  ;;  %3035 = vpow2.f32 %v2797_v30  ;;  %v2800_v51 = vmul.f32 -1.442695, %v1433_v42  ;;  %1680 = vperm.xlu1 %2944, %v3010_v39   ;;  %v1363_v49 = vpop.permute.xlu1 %1362  ;;  %2322 = vmatprep.subr.mxu1 %v2285_v50  ;;  %v2211_v42 = vld [vmem:[%s4723_s5 + $0x98] sm:$0xff] }
 0x363   : > { %v1369_v52 = vpop.permute.xlu0 %1368  ;;  %3037 = vrcp.f32 %v1551_v44  ;;  %v1553_v17 = vadd.f32 1.0, %v3012_v48  ;;  %v1431_v54 = vadd.f32 %v1363_v49, %v3678_v57  ;;  %2323 = vmatpush1.msra.mxu1 %v2284_v62  ;;  %v2283_v57 = vld [vmem:[%s4724_s6 + $0xd8] sm:$0xff]  ;;  %v2208_v49 = vld [vmem:[%s4723_s5 + $0x80] sm:$0xff] }
 0x364   : > { %v1434_v59 = vadd.f32 %v1369_v52, %v3680_v58  ;;  %v3014_v55 = vpop.eup %3013  ;;  %3039 = vpow2.f32 %v2799_v46  ;;  %v2219_v58 = vld [vmem:[%s4723_s5 + $0xd8] sm:$0xff]  ;;  %2324 = vmatprep.subr.mxu1 %v2283_v57  ;;  %v2273_v46 = vld [vmem:[%s4724_s6 + $0x88] sm:$0xff] }
 0x365   : > { %v3016_v0 = vpop.eup %3015  ;;  %3041 = vrcp.f32 %v1553_v17  ;;  %v1552_v2 = vadd.f32 1.0, %v3014_v55  ;;  %v2798_v3 = vmul.f32 -1.442695, %v1431_v54  ;;  %2325 = vmatpush1.msra.mxu1 %v2282_v4  ;;  %2395 = vmatprep.subr.mxu0 %v2219_v58  ;;  %v2271_v50 = vld [vmem:[%s4724_s6 + $0x78] sm:$0xff]  ;;  %v2270_v54 = vld [vmem:[%s4724_s6 + $0x70] sm:$0xff]  ;;  %v2269_v55 = vld [vmem:[%s4724_s6 + $0x68] sm:$0xff] }
 0x366   : > { %v3018_v22 = vpop.eup %3017  ;;  %v1554_v5 = vadd.f32 1.0, %v3016_v0  ;;  %3043 = vpow2.f32 %v2800_v51  ;;  %v2801_v23 = vmul.f32 -1.442695, %v1434_v59  ;;  %2326 = vmatprep.subr.mxu1 %v2281_v60  ;;  %2396 = vmatpush1.msra.mxu0 %v2218_v9  ;;  %v2272_v51 = vld [vmem:[%s4724_s6 + $0x80] sm:$0xff]  ;;  %v2206_v59 = vld [vmem:[%s4723_s5 + $0x70] sm:$0xff]  ;;  %v2265_v60 = vld [vmem:[%s4724_s6 + $0x48] sm:$0xff] }
 0x367   : > { %v1371_v8 = vpop.permute.xlu0 %1370  ;;  %v3020_v13 = vpop.eup %3019  ;;  %3045 = vrcp.f32 %v1552_v2  ;;  %1690 = vperm.xlu1 %2944, %v3018_v22   ;;  %2327 = vmatpush1.msra.mxu1 %v2280_v63  ;;  %v2268_v0 = vld [vmem:[%s4724_s6 + $0x60] sm:$0xff]  ;;  %v2205_v2 = vld [vmem:[%s4723_s5 + $0x68] sm:$0xff]  ;;  %v2202_v9 = vld [vmem:[%s4723_s5 + $0x50] sm:$0xff] }
 0x368   : > { %v1435_v14 = vadd.f32 %v1371_v8, %v3686_v61  ;;  %v3022_v26 = vpop.eup %3021  ;;  %3047 = vrcp.f32 %v1554_v5  ;;  %1700 = vperm.xlu0 %2943, %v3020_v13   ;;  %2397 = vmatprep.subr.mxu0 %v2217_v10  ;;  %v2204_v4 = vld [vmem:[%s4723_s5 + $0x60] sm:$0xff]  ;;  %v2203_v5 = vld [vmem:[%s4723_s5 + $0x58] sm:$0xff]  ;;  %v2201_v13 = vld [vmem:[%s4723_s5 + $0x48] sm:$0xff] }
 0x369   : > { %v3024_v27 = vpop.eup %3023  ;;  %3049 = vpow2.f32 %v2798_v3  ;;  %2328 = vmatprep.subr.mxu1 %v2279_v18  ;;  %2398 = vmatpush1.msra.mxu0 %v2216_v15  ;;  %v2267_v3 = vld [vmem:[%s4724_s6 + $0x58] sm:$0xff]  ;;  %v2264_v10 = vld [vmem:[%s4724_s6 + $0x40] sm:$0xff] }
 0x36a   : > { %v2802_v61 = vmul.f32 -1.442695, %v1435_v14  ;;  %v3026_v20 = vpop.eup %3025  ;;  %v1555_v1 = vadd.f32 1.0, %v3024_v27  ;;  %3051 = vpow2.f32 %v2801_v23  ;;  %2329 = vmatpush1.msra.mxu1 %v2278_v19  ;;  %2399 = vmatprep.subr.mxu0 %v2215_v33  ;;  %v2266_v23 = vld [vmem:[%s4724_s6 + $0x50] sm:$0xff]  ;;  %v2263_v63 = vld [vmem:[%s4724_s6 + $0x38] sm:$0xff]  ;;  %v2200_v15 = vld [vmem:[%s4723_s5 + $0x40] sm:$0xff] }
 0x36b   : > { %v3028_v24 = vpop.eup %3027  ;;  %1705 = vperm.xlu1 %2944, %v3022_v26   ;;  %2330 = vmatprep.subr.mxu1 %v2277_v35  ;;  %v2262_v26 = vld [vmem:[%s4724_s6 + $0x30] sm:$0xff]  ;;  %v2199_v27 = vld [vmem:[%s4723_s5 + $0x38] sm:$0xff] }
 0x36c   : > { %3053 = vpow2.f32 %v2802_v61  ;;  %v3030_v32 = vpop.eup %3029  ;;  %v1557_v34 = vadd.f32 1.0, %v3028_v24  ;;  %1710 = vperm.xlu0 %2943, %v3026_v20   ;;  %2400 = vmatpush1.msra.mxu0 %v2214_v21  ;;  %v2261_v61 = vld [vmem:[%s4724_s6 + $0x28] sm:$0xff]  ;;  %v2198_v19 = vld [vmem:[%s4723_s5 + $0x30] sm:$0xff]  ;;  %v2260_v20 = vld [vmem:[%s4724_s6 + $0x20] sm:$0xff] }
 0x36d   : > { %3055 = vrcp.f32 %v1555_v1  ;;  %v3032_v6 = vpop.eup %3031  ;;  %2331 = vmatpush1.msra.mxu1 %v2276_v25  ;;  %2401 = vmatprep.subr.mxu0 %v2213_v38  ;;  %v2197_v1 = vld [vmem:[%s4723_s5 + $0x28] sm:$0xff]  ;;  %v2259_v35 = vld [vmem:[%s4724_s6 + $0x18] sm:$0xff]  ;;  %v2196_v21 = vld [vmem:[%s4723_s5 + $0x20] sm:$0xff] }
 0x36e   : > { %v3034_v41 = vpop.eup %3033  ;;  %3057 = vrcp.f32 %v1557_v34  ;;  %v1556_v29 = vadd.f32 1.0, %v3032_v6  ;;  %2332 = vmatprep.subr.mxu1 %v2275_v28  ;;  %2402 = vmatpush1.msra.mxu0 %v2212_v7  ;;  %v2195_v38 = vld [vmem:[%s4723_s5 + $0x18] sm:$0xff]  ;;  %v2258_v34 = vld [vmem:[%s4724_s6 + $0x10] sm:$0xff]  ;;  %v2257_v6 = vld [vmem:[%s4724_s6 + $0x8] sm:$0xff] }
 0x36f   : > { %v3036_v30 = vpop.eup %3035  ;;  %1715 = vperm.xlu1 %2944, %v3030_v32   ;;  %2403 = vmatprep.subr.mxu0 %v2211_v42  ;;  %v2194_v28 = vld [vmem:[%s4723_s5 + $0x10] sm:$0xff]  ;;  %v2193_v7 = vld [vmem:[%s4723_s5 + $0x8] sm:$0xff]  ;;  %v2316_v42 = vld [vmem:[%s4724_s6 + $0x1e0] sm:$0xff] }
 0x370   : > { %v3038_v31 = vpop.eup %3037  ;;  %3059 = vrcp.f32 %v1556_v29  ;;  %v1558_v36 = vadd.f32 1.0, %v3036_v30  ;;  %1720 = vperm.xlu0 %2943, %v3034_v41   ;;  %2333 = vmatpush1.msra.mxu1 %v2274_v12  ;;  %v2256_v41 = vld [vmem:[%s4724_s6] sm:$0xff]  ;;  %v2319_v30 = vld [vmem:[%s4724_s6 + $0x1f8] sm:$0xff] }
 0x371   : > { %v3040_v43 = vpop.eup %3039  ;;  %2334 = vmatprep.subr.mxu1 %v2273_v46  ;;  %2404 = vmatpush1.msra.mxu0 %v2210_v45  ;;  %v2192_v29 = vld [vmem:[%s4723_s5] sm:$0xff]  ;;  %v2315_v12 = vld [vmem:[%s4724_s6 + $0x1d8] sm:$0xff]  ;;  %v2313_v46 = vld [vmem:[%s4724_s6 + $0x1c8] sm:$0xff] }
 0x372   : > { %v3042_v37 = vpop.eup %3041  ;;  %3061 = vrcp.f32 %v1558_v36  ;;  %v1560_v40 = vadd.f32 1.0, %v3040_v43  ;;  %2335 = vmatpush1.msra.mxu1 %v2272_v51  ;;  %2405 = vmatprep.subr.mxu0 %v2209_v47  ;;  %v2318_v36 = vld [vmem:[%s4724_s6 + $0x1f0] sm:$0xff]  ;;  %v2251_v45 = vld [vmem:[%s4723_s5 + $0x1d8] sm:$0xff]  ;;  %v2312_v47 = vld [vmem:[%s4724_s6 + $0x1c0] sm:$0xff] }
 0x373   : > { %v3044_v11 = vpop.eup %3043  ;;  %1725 = vperm.xlu1 %2944, %v3038_v31   ;;  %2336 = vmatprep.subr.mxu1 %v2271_v50  ;;  %v2255_v31 = vld [vmem:[%s4723_s5 + $0x1f8] sm:$0xff]  ;;  %v2254_v43 = vld [vmem:[%s4723_s5 + $0x1f0] sm:$0xff] }
 0x374   : > { %v3046_v39 = vpop.eup %3045  ;;  %3063 = vrcp.f32 %v1560_v40  ;;  %v1561_v44 = vadd.f32 1.0, %v3044_v11  ;;  %1735 = vperm.xlu0 %2943, %v3042_v37   ;;  %2406 = vmatpush1.msra.mxu0 %v2208_v49  ;;  %v2317_v37 = vld [vmem:[%s4724_s6 + $0x1e8] sm:$0xff]  ;;  %v2252_v11 = vld [vmem:[%s4723_s5 + $0x1e0] sm:$0xff]  ;;  %v2311_v51 = vld [vmem:[%s4724_s6 + $0x1b8] sm:$0xff] }
 0x375   : > { %v3048_v48 = vpop.eup %3047  ;;  %2337 = vmatpush1.msra.mxu1 %v2270_v54  ;;  %2407 = vmatprep.subr.mxu0 %v2207_v53  ;;  %v2253_v40 = vld [vmem:[%s4723_s5 + $0x1e8] sm:$0xff]  ;;  %v2248_v49 = vld [vmem:[%s4723_s5 + $0x1c0] sm:$0xff]  ;;  %v2310_v50 = vld [vmem:[%s4724_s6 + $0x1b0] sm:$0xff] }
 0x376   : > { %v3050_v52 = vpop.eup %3049  ;;  %3065 = vrcp.f32 %v1561_v44  ;;  %2338 = vmatprep.subr.mxu1 %v2269_v55  ;;  %2408 = vmatpush1.msra.mxu0 %v2206_v59  ;;  %v2250_v44 = vld [vmem:[%s4723_s5 + $0x1d0] sm:$0xff]  ;;  %v2308_v54 = vld [vmem:[%s4724_s6 + $0x1a0] sm:$0xff] }
 0x377   : > { %v3052_v16 = vpop.eup %3051  ;;  %v1559_v17 = vadd.f32 1.0, %v3050_v52  ;;  %1730 = vperm.xlu1 %2944, %v3046_v39   ;;  %2339 = vmatpush1.msra.mxu1 %v2268_v0  ;;  %v2314_v39 = vld [vmem:[%s4724_s6 + $0x1d0] sm:$0xff]  ;;  %v2247_v52 = vld [vmem:[%s4723_s5 + $0x1b8] sm:$0xff]  ;;  %v2244_v59 = vld [vmem:[%s4723_s5 + $0x1a0] sm:$0xff] }
 0x378   : > { %v1562_v56 = vadd.f32 1.0, %v3052_v16  ;;  %1740 = vperm.xlu0 %2943, %v3048_v48   ;;  %2409 = vmatprep.subr.mxu0 %v2205_v2  ;;  %v2249_v48 = vld [vmem:[%s4723_s5 + $0x1c8] sm:$0xff]  ;;  %v2246_v53 = vld [vmem:[%s4723_s5 + $0x1b0] sm:$0xff]  ;;  %v2304_v2 = vld [vmem:[%s4724_s6 + $0x180] sm:$0xff] }
 0x379   : > { %v3054_v62 = vpop.eup %3053  ;;  %3067 = vrcp.f32 %v1559_v17  ;;  %2340 = vmatprep.subr.mxu1 %v2267_v3  ;;  %2410 = vmatpush1.msra.mxu0 %v2204_v4  ;;  %v2309_v16 = vld [vmem:[%s4724_s6 + $0x1a8] sm:$0xff]  ;;  %v2306_v55 = vld [vmem:[%s4724_s6 + $0x190] sm:$0xff]  ;;  %v2240_v3 = vld [vmem:[%s4723_s5 + $0x180] sm:$0xff] }
 0x37a   : > { %v3056_v57 = vpop.eup %3055  ;;  %v1563_v58 = vadd.f32 1.0, %v3054_v62  ;;  %3069 = vrcp.f32 %v1562_v56  ;;  %2341 = vmatpush1.msra.mxu1 %v2266_v23  ;;  %2411 = vmatprep.subr.mxu0 %v2203_v5  ;;  %v2245_v17 = vld [vmem:[%s4723_s5 + $0x1a8] sm:$0xff]  ;;  %v2307_v62 = vld [vmem:[%s4724_s6 + $0x198] sm:$0xff]  ;;  %v2302_v5 = vld [vmem:[%s4724_s6 + $0x170] sm:$0xff] }
 0x37b   : > { %v3058_v22 = vpop.eup %3057  ;;  %1745 = vperm.xlu1 %2944, %v3056_v57   ;;  %2342 = vmatprep.subr.mxu1 %v2265_v60  ;;  %v2243_v56 = vld [vmem:[%s4723_s5 + $0x198] sm:$0xff]  ;;  %v2242_v57 = vld [vmem:[%s4723_s5 + $0x190] sm:$0xff]  ;;  %v2241_v0 = vld [vmem:[%s4723_s5 + $0x188] sm:$0xff] }
 0x37c   : > { %3071 = vrcp.f32 %v1563_v58  ;;  %1755 = vperm.xlu0 %2943, %v3058_v22   ;;  %2412 = vmatpush1.msra.mxu0 %v2202_v9  ;;  %v2305_v58 = vld [vmem:[%s4724_s6 + $0x188] sm:$0xff]  ;;  %v2303_v4 = vld [vmem:[%s4724_s6 + $0x178] sm:$0xff]  ;;  %v2238_v23 = vld [vmem:[%s4723_s5 + $0x170] sm:$0xff] }
 0x37d   : > { %v3060_v8 = vpop.eup %3059  ;;  %2343 = vmatpush1.msra.mxu1 %v2264_v10  ;;  %2413 = vmatprep.subr.mxu0 %v2201_v13  ;;  %v2239_v22 = vld [vmem:[%s4723_s5 + $0x178] sm:$0xff]  ;;  %v2237_v60 = vld [vmem:[%s4723_s5 + $0x168] sm:$0xff]  ;;  %v2300_v9 = vld [vmem:[%s4724_s6 + $0x160] sm:$0xff] }
 0x37e   : > { %2344 = vmatprep.subr.mxu1 %v2263_v63  ;;  %2414 = vmatpush1.msra.mxu0 %v2200_v15  ;;  %v2236_v10 = vld [vmem:[%s4723_s5 + $0x160] sm:$0xff]  ;;  %v2299_v13 = vld [vmem:[%s4724_s6 + $0x158] sm:$0xff]  ;;  %v2298_v63 = vld [vmem:[%s4724_s6 + $0x150] sm:$0xff] }
 0x37f   : > { %v3062_v14 = vpop.eup %3061  ;;  %1750 = vperm.xlu1 %2944, %v3060_v8   ;;  %2345 = vmatpush1.msra.mxu1 %v2262_v26  ;;  %v2301_v8 = vld [vmem:[%s4724_s6 + $0x168] sm:$0xff]  ;;  %v2234_v15 = vld [vmem:[%s4723_s5 + $0x150] sm:$0xff] }
 0x380   : > { %1760 = vperm.xlu0 %2943, %v3062_v14   ;;  %2415 = vmatprep.subr.mxu0 %v2199_v27  ;;  %v2235_v14 = vld [vmem:[%s4723_s5 + $0x158] sm:$0xff]  ;;  %v2297_v26 = vld [vmem:[%s4724_s6 + $0x148] sm:$0xff] }
 0x381   : > { %v3064_v18 = vpop.eup %3063  ;;  %2346 = vmatprep.subr.mxu1 %v2261_v61  ;;  %2416 = vmatpush1.msra.mxu0 %v2198_v19  ;;  %v2233_v27 = vld [vmem:[%s4723_s5 + $0x148] sm:$0xff]  ;;  %v2295_v61 = vld [vmem:[%s4724_s6 + $0x138] sm:$0xff]  ;;  %v2232_v19 = vld [vmem:[%s4723_s5 + $0x140] sm:$0xff] }
 0x382   : > { %2347 = vmatpush1.msra.mxu1 %v2260_v20  ;;  %2417 = vmatprep.subr.mxu0 %v2197_v1  ;;  %v2231_v20 = vld [vmem:[%s4723_s5 + $0x138] sm:$0xff]  ;;  %v2293_v1 = vld [vmem:[%s4724_s6 + $0x128] sm:$0xff] }
 0x383   : > { %v3066_v33 = vpop.eup %3065  ;;  %1770 = vperm.xlu1 %2944, %v3064_v18   ;;  %2348 = vmatprep.subr.mxu1 %v2259_v35  ;;  %v2296_v18 = vld [vmem:[%s4724_s6 + $0x140] sm:$0xff]  ;;  %v2230_v35 = vld [vmem:[%s4723_s5 + $0x130] sm:$0xff] }
 0x384   : > { %1775 = vperm.xlu0 %2943, %v3066_v33   ;;  %2418 = vmatpush1.msra.mxu0 %v2196_v21  ;;  %v2294_v33 = vld [vmem:[%s4724_s6 + $0x130] sm:$0xff]  ;;  %v2292_v21 = vld [vmem:[%s4724_s6 + $0x120] sm:$0xff] }
 0x385   : > { %2419 = vmatprep.subr.mxu0 %v2195_v38  ;;  %2349 = vmatpush1.msra.mxu1 %v2258_v34  ;;  %v2228_v38 = vld [vmem:[%s4723_s5 + $0x120] sm:$0xff]  ;;  %v2227_v34 = vld [vmem:[%s4723_s5 + $0x118] sm:$0xff] }
 0x386   : > { %v3068_v24 = vpop.eup %3067  ;;  %2420 = vmatpush1.msra.mxu0 %v2194_v28  ;;  %2350 = vmatprep.subr.mxu1 %v2257_v6  ;;  %v2289_v28 = vld [vmem:[%s4724_s6 + $0x108] sm:$0xff]  ;;  %v2226_v6 = vld [vmem:[%s4723_s5 + $0x110] sm:$0xff] }
 0x387   : > { %v3070_v25 = vpop.eup %3069  ;;  %1765 = vperm.xlu1 %2944, %v3068_v24   ;;  %2421 = vmatprep.subr.mxu0 %v2193_v7  ;;  %v2229_v24 = vld [vmem:[%s4723_s5 + $0x128] sm:$0xff]  ;;  %v2288_v7 = vld [vmem:[%s4724_s6 + $0x100] sm:$0xff] }
 0x388   : > { %1780 = vperm.xlu0 %2943, %v3070_v25   ;;  %2351 = vmatpush1.msra.mxu1 %v2256_v41  ;;  %v2291_v25 = vld [vmem:[%s4724_s6 + $0x118] sm:$0xff]  ;;  %v2225_v41 = vld [vmem:[%s4723_s5 + $0x108] sm:$0xff] }
 0x389   : > { %v3072_v32 = vpop.eup %3071  ;;  %2352 = vmatprep.subr.mxu1 %v2319_v30  ;;  %2422 = vmatpush1.msra.mxu0 %v2192_v29  ;;  %v2224_v29 = vld [vmem:[%s4723_s5 + $0x100] sm:$0xff] }
 0x38a   : > { %2353 = vmatpush2.msra.mxu1 %v2318_v36  ;;  %2423 = vmatprep.subr.mxu0 %v2255_v31  ;;  %v3081_v36 = vld [vmem:[%s3219_s12] sm:$0xff] }
 0x38b   : > { %2354 = vmatprep.subr.mxu1 %v2317_v37  ;;  %2424 = vmatpush2.msra.mxu0 %v2254_v43  ;;  %v3082_v37 = vld [vmem:[%s3219_s12 + $0x8] sm:$0xff] }
 0x38c   : > { %1785 = vperm.xlu0 %2943, %v3072_v32   ;;  %2355 = vmatpush2.msra.mxu1 %v2316_v42  ;;  %v2290_v32 = vld [vmem:[%s4724_s6 + $0x110] sm:$0xff] }
 0x38d   : > { %2425 = vmatprep.subr.mxu0 %v2253_v40  ;;  %2356 = vmatprep.subr.mxu1 %v2315_v12 }
 0x38e   : > { %2426 = vmatpush2.msra.mxu0 %v2252_v11  ;;  %2357 = vmatpush2.msra.mxu1 %v2314_v39  ;;  %v3083_v11 = vld [vmem:[%s3219_s12 + $0x10] sm:$0xff] }
 0x38f   : > { %2427 = vmatprep.subr.mxu0 %v2251_v45  ;;  %2358 = vmatprep.subr.mxu1 %v2313_v46  ;;  %v3084_v45 = vld [vmem:[%s3219_s12 + $0x18] sm:$0xff] }
 0x390   : > { %2428 = vmatpush2.msra.mxu0 %v2250_v44  ;;  %2359 = vmatpush2.msra.mxu1 %v2312_v47  ;;  %v3085_v44 = vld [vmem:[%s3219_s12 + $0x30] sm:$0xff]  ;;  %v3086_v47 = vld [vmem:[%s3219_s12 + $0x38] sm:$0xff] }
 0x391   : > { %2429 = vmatprep.subr.mxu0 %v2249_v48  ;;  %2360 = vmatprep.subr.mxu1 %v2311_v51 }
 0x392   : > { %2430 = vmatpush2.msra.mxu0 %v2248_v49  ;;  %2361 = vmatpush2.msra.mxu1 %v2310_v50  ;;  %v3087_v50 = vld [vmem:[%s3219_s12 + $0x20] sm:$0xff] }
 0x393   : > { %2431 = vmatprep.subr.mxu0 %v2247_v52  ;;  %2362 = vmatprep.subr.mxu1 %v2309_v16  ;;  %v3088_v16 = vld [vmem:[%s3219_s12 + $0x28] sm:$0xff] }
 0x394   : > { %2432 = vmatpush2.msra.mxu0 %v2246_v53  ;;  %2363 = vmatpush2.msra.mxu1 %v2308_v54 }
 0x395   : > { %2433 = vmatprep.subr.mxu0 %v2245_v17  ;;  %2364 = vmatprep.subr.mxu1 %v2307_v62 }
 0x396   : > { %2434 = vmatpush2.msra.mxu0 %v2244_v59  ;;  %2365 = vmatpush2.msra.mxu1 %v2306_v55 }
 0x397   : > { %2435 = vmatprep.subr.mxu0 %v2243_v56  ;;  %2366 = vmatprep.subr.mxu1 %v2305_v58 }
 0x398   : > { %2436 = vmatpush2.msra.mxu0 %v2242_v57  ;;  %2367 = vmatpush2.msra.mxu1 %v2304_v2 }
 0x399   : > { %2437 = vmatprep.subr.mxu0 %v2241_v0  ;;  %2368 = vmatprep.subr.mxu1 %v2303_v4 }
 0x39a   : > { %2438 = vmatpush2.msra.mxu0 %v2240_v3  ;;  %2369 = vmatpush2.msra.mxu1 %v2302_v5  ;;  %v3089_v5 = vld [vmem:[%s3219_s12 + $0x50] sm:$0xff] }
 0x39b   : > { %2439 = vmatprep.subr.mxu0 %v2239_v22  ;;  %2370 = vmatprep.subr.mxu1 %v2301_v8  ;;  %v3090_v8 = vld [vmem:[%s3219_s12 + $0x58] sm:$0xff] }
 0x39c   : > { %2440 = vmatpush2.msra.mxu0 %v2238_v23  ;;  %2371 = vmatpush2.msra.mxu1 %v2300_v9  ;;  %v3091_v9 = vld [vmem:[%s3219_s12 + $0x40] sm:$0xff] }
 0x39d   : > { %2441 = vmatprep.subr.mxu0 %v2237_v60  ;;  %2372 = vmatprep.subr.mxu1 %v2299_v13  ;;  %v3092_v13 = vld [vmem:[%s3219_s12 + $0x48] sm:$0xff] }
 0x39e   : > { %2442 = vmatpush2.msra.mxu0 %v2236_v10  ;;  %2373 = vmatpush2.msra.mxu1 %v2298_v63 }
 0x39f   : > { %2443 = vmatprep.subr.mxu0 %v2235_v14  ;;  %2374 = vmatprep.subr.mxu1 %v2297_v26 }
 0x3a0   : > { %2444 = vmatpush2.msra.mxu0 %v2234_v15  ;;  %2375 = vmatpush2.msra.mxu1 %v2296_v18 }
 0x3a1   : > { %2445 = vmatprep.subr.mxu0 %v2233_v27  ;;  %2376 = vmatprep.subr.mxu1 %v2295_v61 }
 0x3a2   : > { %2446 = vmatpush2.msra.mxu0 %v2232_v19  ;;  %2377 = vmatpush2.msra.mxu1 %v2294_v33 }
 0x3a3   : > { %2447 = vmatprep.subr.mxu0 %v2231_v20  ;;  %2378 = vmatprep.subr.mxu1 %v2293_v1 }
 0x3a4   : > { %2448 = vmatpush2.msra.mxu0 %v2230_v35  ;;  %2379 = vmatpush2.msra.mxu1 %v2292_v21 }
 0x3a5   : > { %2449 = vmatprep.subr.mxu0 %v2229_v24  ;;  %2380 = vmatprep.subr.mxu1 %v2291_v25  ;;  %v3093_v24 = vld [vmem:[%s3219_s12 + $0x70] sm:$0xff] }
 0x3a6   : > { %2450 = vmatpush2.msra.mxu0 %v2228_v38  ;;  %2381 = vmatpush2.msra.mxu1 %v2290_v32  ;;  %v3094_v38 = vld [vmem:[%s3219_s12 + $0x78] sm:$0xff] }
 0x3a7   : > { %2451 = vmatprep.subr.mxu0 %v2227_v34  ;;  %2382 = vmatprep.subr.mxu1 %v2289_v28  ;;  %v3095_v34 = vld [vmem:[%s3219_s12 + $0x60] sm:$0xff] }
 0x3a8   : > { %2452 = vmatpush2.msra.mxu0 %v2226_v6  ;;  %2383 = vmatpush2.msra.mxu1 %v2288_v7  ;;  %v3096_v6 = vld [vmem:[%s3219_s12 + $0x68] sm:$0xff] }
 0x3a9   : > { %2453 = vmatprep.subr.mxu0 %v2225_v41 }
 0x3aa   : > { %2454 = vmatpush2.msra.mxu0 %v2224_v29 }
 0x3c2   : > { %v1636_v30 = vpop.permute.xlu0 %1635 }
 0x3c3   : > { %v4113_v12 = vmul.f32 %v3083_v11, %v1636_v30  ;;  %v4116_v39 = vmul.f32 %v3084_v45, %v1636_v30 }
 0x3c4   : > { %v1631_v31 = vpop.permute.xlu1 %1630 }
 0x3c5   : > { %v4107_v43 = vmul.f32 %v3081_v36, %v1631_v31  ;;  %v4110_v40 = vmul.f32 %v3082_v37, %v1631_v31  ;;  %4780 = vst [vmem:[#allocation4_spill] sm:$0xff] %v4116_v39 }
 0x3c6   : > { %v1646_v42 = vpop.permute.xlu0 %1645 }
 0x3c7   : > { %4779 = vst [vmem:[#allocation3_spill] sm:$0xff] %v4110_v40  ;;  %v4119_v46 = vmul.f32 %v3085_v44, %v1646_v42  ;;  %v4122_v48 = vmul.f32 %v3086_v47, %v1646_v42  ;;  %v1870_v49 = vadd.f32 %v4113_v12, %v4107_v43  ;;  %v1879_v52 = vadd.f32 %v4116_v39, %v4110_v40 }
 0x3c8   : > { %v1641_v51 = vpop.permute.xlu1 %1640 }
 0x3c9   : > { %4781 = vst [vmem:[#allocation5_spill] sm:$0xff] %v4122_v48  ;;  %v4129_v53 = vmul.f32 %v3087_v50, %v1641_v51  ;;  %v4132_v17 = vmul.f32 %v3088_v16, %v1641_v51  ;;  %v1853_v54 = vmax.f32 %v4113_v12, %v4119_v46  ;;  %v1862_v59 = vmax.f32 %v4116_v39, %v4122_v48 }
 0x3ca   : > { %v1656_v58 = vpop.permute.xlu0 %1655 }
 0x3cb   : > { %4782 = vst [vmem:[#allocation6_spill] sm:$0xff] %v4132_v17  ;;  %v1852_v62 = vmax.f32 %v4107_v43, %v4129_v53  ;;  %v1861_v56 = vmax.f32 %v4110_v40, %v4132_v17  ;;  %v1871_v55 = vadd.f32 %v1870_v49, %v4129_v53  ;;  %v1880_v57 = vadd.f32 %v1879_v52, %v4132_v17  ;;  %v3126_v17 = vld [vmem:[%s3219_s12 + $0x168] sm:$0xff] }
 0x3cc   : > { %v1651_v0 = vpop.permute.xlu1 %1650  ;;  %v4147_v23 = vmul.f32 %v3089_v5, %v1656_v58  ;;  %v4150_v60 = vmul.f32 %v3090_v8, %v1656_v58 }
 0x3cd   : > { %v1854_v2 = vmax.f32 %v1852_v62, %v1853_v54  ;;  %v1863_v3 = vmax.f32 %v1861_v56, %v1862_v59  ;;  %v1872_v4 = vadd.f32 %v1871_v55, %v4119_v46  ;;  %v1881_v22 = vadd.f32 %v1880_v57, %v4122_v48 }
 0x3ce   : > { %4783 = vst [vmem:[#allocation7_spill] sm:$0xff] %v4150_v60  ;;  %v4153_v10 = vmul.f32 %v3091_v9, %v1651_v0  ;;  %v4156_v14 = vmul.f32 %v3092_v13, %v1651_v0 }
 0x3cf   : > { %v1855_v63 = vrot.slane %v1854_v2, 4  ;;  %v1864_v15 = vrot.slane %v1863_v3, 4  ;;  %v1873_v26 = vrot.slane %v1872_v4, 4  ;;  %v1882_v18 = vrot.slane %v1881_v22, 4 }
 0x3d0   : > { %4784 = vst [vmem:[#allocation8_spill] sm:$0xff] %v4156_v14  ;;  %v1909_v27 = vadd.f32 %v4147_v23, %v4153_v10  ;;  %v1918_v61 = vadd.f32 %v4150_v60, %v4156_v14  ;;  %v1666_v19 = vpop.permute.xlu1 %1665 }
 0x3d1   : > { %v1856_v33 = vmax.f32 %v1854_v2, %v1855_v63  ;;  %v1865_v20 = vmax.f32 %v1863_v3, %v1864_v15  ;;  %v1874_v1 = vadd.f32 %v1873_v26, %v1872_v4  ;;  %v1883_v35 = vadd.f32 %v1882_v18, %v1881_v22  ;;  %v1661_v21 = vpop.permute.xlu0 %1660  ;;  %v3097_v18 = vld [vmem:[%s3219_s12 + $0x80] sm:$0xff] }
 0x3d2   : > { %v4163_v25 = vmul.f32 %v3093_v24, %v1666_v19  ;;  %v4166_v32 = vmul.f32 %v3094_v38, %v1666_v19  ;;  %v4169_v28 = vmul.f32 %v3095_v34, %v1661_v21  ;;  %v4172_v7 = vmul.f32 %v3096_v6, %v1661_v21  ;;  %v3099_v21 = vld [vmem:[%s3219_s12 + $0x90] sm:$0xff]  ;;  %v3100_v38 = vld [vmem:[%s3219_s12 + $0x98] sm:$0xff] }
 0x3d3   : > { %v1857_v41 = vrot.slane %v1856_v33, 2  ;;  %v1866_v29 = vrot.slane %v1865_v20, 2  ;;  %v1875_v30 = vrot.slane %v1874_v1, 2  ;;  %v1884_v31 = vrot.slane %v1883_v35, 2  ;;  %v3101_v6 = vld [vmem:[%s3219_s12 + $0xb0] sm:$0xff] }
 0x3d4   : > { %4785 = vst [vmem:[#allocation9_spill] sm:$0xff] %v4166_v32  ;;  %4786 = vst [vmem:[#allocation10_spill] sm:$0xff] %v4172_v7  ;;  %v1892_v36 = vmax.f32 %v4147_v23, %v4163_v25  ;;  %v1901_v37 = vmax.f32 %v4150_v60, %v4166_v32  ;;  %v1891_v42 = vmax.f32 %v4153_v10, %v4169_v28 }
 0x3d5   : > { %v1900_v11 = vmax.f32 %v4156_v14, %v4172_v7  ;;  %v1858_v45 = vmax.f32 %v1856_v33, %v1857_v41  ;;  %v1867_v44 = vmax.f32 %v1865_v20, %v1866_v29  ;;  %v1876_v47 = vadd.f32 %v1875_v30, %v1874_v1  ;;  %v1671_v49 = vpop.permute.xlu1 %1670  ;;  %v3102_v29 = vld [vmem:[%s3219_s12 + $0xb8] sm:$0xff] }
 0x3d6   : > { %v1885_v51 = vadd.f32 %v1884_v31, %v1883_v35  ;;  %v1893_v52 = vmax.f32 %v1891_v42, %v1892_v36  ;;  %v1910_v16 = vadd.f32 %v1909_v27, %v4169_v28  ;;  %v1919_v54 = vadd.f32 %v1918_v61, %v4172_v7  ;;  %v3098_v61 = vld [vmem:[%s3219_s12 + $0x88] sm:$0xff] }
 0x3d7   : > { %v1902_v50 = vmax.f32 %v1900_v11, %v1901_v37  ;;  %v1859_v59 = vrot.slane %v1858_v45, 1  ;;  %v1868_v62 = vrot.slane %v1867_v44, 1  ;;  %v1877_v56 = vrot.slane %v1876_v47, 1  ;;  %v1676_v63 = vpop.permute.xlu0 %1675 }
 0x3d8   : > { %v1886_v55 = vrot.slane %v1885_v51, 1  ;;  %v1894_v57 = vrot.slane %v1893_v52, 4  ;;  %v1911_v0 = vadd.f32 %v1910_v16, %v4163_v25  ;;  %v1920_v2 = vadd.f32 %v1919_v54, %v4166_v32 }
 0x3d9   : > { %v1903_v58 = vrot.slane %v1902_v50, 4  ;;  %v4186_v3 = vmax.f32 %v1858_v45, %v1859_v59  ;;  %v4188_v4 = vmax.f32 %v1867_v44, %v1868_v62  ;;  %v1686_v22 = vpop.permute.xlu1 %1685  ;;  %v1878_v15 = vadd.f32 %v1877_v56, %v1876_v47  ;;  %v3103_v56 = vld [vmem:[%s3219_s12 + $0xa0] sm:$0xff] }
 0x3da   : > { %v1895_v5 = vmax.f32 %v1893_v52, %v1894_v57  ;;  %v1912_v9 = vrot.slane %v1911_v0, 4  ;;  %v1921_v13 = vrot.slane %v1920_v2, 4  ;;  %v1887_v26 = vadd.f32 %v1886_v55, %v1885_v51  ;;  %v3104_v57 = vld [vmem:[%s3219_s12 + $0xa8] sm:$0xff] }
 0x3db   : > { %v1904_v8 = vmax.f32 %v1902_v50, %v1903_v58  ;;  %v4191_v27 = vmul.f32 %v3097_v18, %v1671_v49  ;;  %v4194_v19 = vmul.f32 %v3098_v61, %v1671_v49  ;;  %v4197_v24 = vmul.f32 %v3099_v21, %v1676_v63  ;;  %v1696_v49 = vpop.permute.xlu0 %1695 }
 0x3dc   : > { %v1896_v33 = vrot.slane %v1895_v5, 2  ;;  %v1913_v1 = vadd.f32 %v1912_v9, %v1911_v0  ;;  %v1922_v35 = vadd.f32 %v1921_v13, %v1920_v2  ;;  %v4200_v34 = vmul.f32 %v3100_v38, %v1676_v63 }
 0x3dd   : > { %4787 = vst [vmem:[#allocation11_spill] sm:$0xff] %v4194_v19  ;;  %v1905_v20 = vrot.slane %v1904_v8, 2  ;;  %v4203_v41 = vmul.f32 %v3101_v6, %v1686_v22  ;;  %v4206_v30 = vmul.f32 %v3102_v29, %v1686_v22  ;;  %v1681_v31 = vpop.permute.xlu1 %1680  ;;  %v4208_v45 = vmul.f32 0.03125, %v1878_v15 }
 0x3de   : > { %4788 = vst [vmem:[#allocation12_spill] sm:$0xff] %v4200_v34  ;;  %v1897_v36 = vmax.f32 %v1895_v5, %v1896_v33  ;;  %v1914_v42 = vrot.slane %v1913_v1, 2  ;;  %v1923_v11 = vrot.slane %v1922_v35, 2  ;;  %v4210_v44 = vmul.f32 0.03125, %v1887_v26  ;;  %v3105_v5 = vld [vmem:[%s3219_s12 + $0xd0] sm:$0xff] }
 0x3df   : > { %4789 = vst [vmem:[#allocation13_spill] sm:$0xff] %v4203_v41  ;;  %4790 = vst [vmem:[#allocation14_spill] sm:$0xff] %v4206_v30  ;;  %v1906_v37 = vmax.f32 %v1904_v8, %v1905_v20  ;;  %v1947_v47 = vadd.f32 %v4197_v24, %v4191_v27  ;;  %v1956_v51 = vadd.f32 %v4200_v34, %v4194_v19  ;;  %v3106_v20 = vld [vmem:[%s3219_s12 + $0xd8] sm:$0xff] }
 0x3e0   : > { %v1898_v52 = vrot.slane %v1897_v36, 1  ;;  %v1915_v16 = vadd.f32 %v1914_v42, %v1913_v1  ;;  %v1924_v54 = vadd.f32 %v1923_v11, %v1922_v35  ;;  %v1930_v59 = vmax.f32 %v4197_v24, %v4203_v41  ;;  %v3107_v35 = vld [vmem:[%s3219_s12 + $0xc0] sm:$0xff]  ;;  %v3108_v42 = vld [vmem:[%s3219_s12 + $0xc8] sm:$0xff] }
 0x3e1   : > { %v1907_v50 = vrot.slane %v1906_v37, 1  ;;  %v1939_v62 = vmax.f32 %v4200_v34, %v4206_v30  ;;  %v4221_v55 = vmul.f32 %v3103_v56, %v1681_v31  ;;  %v4224_v58 = vmul.f32 %v3104_v57, %v1681_v31 }
 0x3e2   : > { %v1899_v0 = vmax.f32 %v1897_v36, %v1898_v52  ;;  %v1916_v2 = vrot.slane %v1915_v16, 1  ;;  %v1925_v22 = vrot.slane %v1924_v54, 1  ;;  %v4227_v8 = vmul.f32 %v3105_v5, %v1696_v49  ;;  %v1691_v9 = vpop.permute.xlu1 %1690 }
 0x3e3   : > { %4791 = vst [vmem:[#allocation15_spill] sm:$0xff] %v4224_v58  ;;  %v1929_v13 = vmax.f32 %v4191_v27, %v4221_v55  ;;  %v1938_v63 = vmax.f32 %v4194_v19, %v4224_v58  ;;  %v1948_v15 = vadd.f32 %v1947_v47, %v4221_v55  ;;  %v1957_v26 = vadd.f32 %v1956_v51, %v4224_v58  ;;  %v1701_v18 = vpop.permute.xlu0 %1700 }
 0x3e4   : > { %4792 = vst [vmem:[#allocation16_spill] sm:$0xff] %v4227_v8  ;;  %v4235_v61 = vmax.f32 %v1906_v37, %v1907_v50  ;;  %v1917_v33 = vadd.f32 %v1916_v2, %v1915_v16  ;;  %v4238_v1 = vmul.f32 %v3106_v20, %v1696_v49  ;;  %v4241_v21 = vmul.f32 %v3107_v35, %v1691_v9 }
 0x3e5   : > { %v1931_v38 = vmax.f32 %v1929_v13, %v1930_v59  ;;  %v1940_v6 = vmax.f32 %v1938_v63, %v1939_v62  ;;  %v1949_v29 = vadd.f32 %v1948_v15, %v4203_v41  ;;  %v1958_v31 = vadd.f32 %v1957_v26, %v4206_v30  ;;  %v3109_v62 = vld [vmem:[%s3219_s12 + $0xe0] sm:$0xff] }
 0x3e6   : > { %4793 = vst [vmem:[#allocation17_spill] sm:$0xff] %v4238_v1  ;;  %4794 = vst [vmem:[#allocation18_spill] sm:$0xff] %v4241_v21  ;;  %v1926_v36 = vadd.f32 %v1925_v22, %v1924_v54  ;;  %v4247_v37 = vsel %vm2157_vm2, %v4186_v3, %v1899_v0  ;;  %v4250_v11 = vmul.f32 %v3108_v42, %v1691_v9  ;;  %v1706_v51 = vpop.permute.xlu1 %1705  ;;  %v3110_v3 = vld [vmem:[%s3219_s12 + $0xe8] sm:$0xff]  ;;  %v3111_v0 = vld [vmem:[%s3219_s12 + $0xf0] sm:$0xff]  ;;  %v4265_v63 = vmul.f32 0.03125, %v1917_v33 }
 0x3e7   : > { %v1985_v47 = vadd.f32 %v4227_v8, %v4241_v21  ;;  %v1932_v49 = vrot.slane %v1931_v38, 4  ;;  %v1941_v52 = vrot.slane %v1940_v6, 4  ;;  %v1950_v50 = vrot.slane %v1949_v29, 4  ;;  %v1711_v59 = vpop.permute.xlu0 %1710 }
 0x3e8   : > { %4795 = vst [vmem:[#allocation19_spill] sm:$0xff] %v4250_v11  ;;  %v1959_v16 = vrot.slane %v1958_v31, 4  ;;  %v1994_v54 = vadd.f32 %v4238_v1, %v4250_v11  ;;  %v4257_v56 = vmul.f32 %v3109_v62, %v1701_v18  ;;  %v4260_v57 = vmul.f32 %v3110_v3, %v1701_v18 }
 0x3e9   : > { %v4263_v2 = vmul.f32 %v3111_v0, %v1706_v51  ;;  %v1933_v22 = vmax.f32 %v1931_v38, %v1932_v49  ;;  %v1942_v5 = vmax.f32 %v1940_v6, %v1941_v52  ;;  %v1951_v9 = vadd.f32 %v1950_v50, %v1949_v29  ;;  %v3112_v6 = vld [vmem:[%s3219_s12 + $0xf8] sm:$0xff] }
 0x3ea   : > { %4796 = vst [vmem:[#allocation20_spill] sm:$0xff] %v4257_v56  ;;  %4797 = vst [vmem:[#allocation21_spill] sm:$0xff] %v4260_v57  ;;  %v1960_v13 = vadd.f32 %v1959_v16, %v1958_v31  ;;  %v1967_v15 = vmax.f32 %v4241_v21, %v4257_v56  ;;  %v1986_v26 = vadd.f32 %v1985_v47, %v4257_v56  ;;  %v1716_v35 = vpop.permute.xlu1 %1715 }
 0x3eb   : > { %4798 = vst [vmem:[#allocation22_spill] sm:$0xff] %v4263_v2  ;;  %v1995_v20 = vadd.f32 %v1994_v54, %v4260_v57  ;;  %v1934_v18 = vrot.slane %v1933_v22, 2  ;;  %v1943_v42 = vrot.slane %v1942_v5, 2  ;;  %v1952_v62 = vrot.slane %v1951_v9, 2  ;;  %v1721_v0 = vpop.permute.xlu0 %1720 }
 0x3ec   : > { %v1961_v3 = vrot.slane %v1960_v13, 2  ;;  %v1976_v38 = vmax.f32 %v4250_v11, %v4260_v57  ;;  %v4274_v29 = vmul.f32 %v3112_v6, %v1706_v51  ;;  %v1968_v33 = vmax.f32 %v4227_v8, %v4263_v2 }
 0x3ed   : > { %v1987_v31 = vadd.f32 %v1986_v26, %v4263_v2  ;;  %v1935_v47 = vmax.f32 %v1933_v22, %v1934_v18  ;;  %v1944_v49 = vmax.f32 %v1942_v5, %v1943_v42  ;;  %v1953_v52 = vadd.f32 %v1952_v62, %v1951_v9 }
 0x3ee   : > { %4799 = vst [vmem:[#allocation23_spill] sm:$0xff] %v4274_v29  ;;  %v1962_v50 = vadd.f32 %v1961_v3, %v1960_v13  ;;  %v1969_v16 = vmax.f32 %v1967_v15, %v1968_v33  ;;  %v1977_v54 = vmax.f32 %v4238_v1, %v4274_v29  ;;  %v1996_v57 = vadd.f32 %v1995_v20, %v4274_v29  ;;  %v1726_v13 = vpop.permute.xlu1 %1725  ;;  %v3113_v20 = vld [vmem:[%s3219_s12 + $0x100] sm:$0xff] }
 0x3ef   : > { %v1988_v30 = vrot.slane %v1987_v31, 4  ;;  %v1936_v11 = vrot.slane %v1935_v47, 1  ;;  %v1945_v51 = vrot.slane %v1944_v49, 1  ;;  %v1954_v6 = vrot.slane %v1953_v52, 1  ;;  %v4282_v34 = vpop.permute.xlu0 %1735 }
 0x3f0   : > { %v1963_v58 = vrot.slane %v1962_v50, 1  ;;  %v1970_v19 = vrot.slane %v1969_v16, 4  ;;  %v1978_v22 = vmax.f32 %v1976_v38, %v1977_v54  ;;  %v1997_v9 = vrot.slane %v1996_v57, 4 }
 0x3f1   : > { %v1989_v5 = vadd.f32 %v1988_v30, %v1987_v31  ;;  %v4284_v15 = vmul.f32 0.03125, %v1926_v36  ;;  %v4286_v26 = vmax.f32 %v1935_v47, %v1936_v11  ;;  %v4288_v18 = vmax.f32 %v1944_v49, %v1945_v51  ;;  %v3114_v31 = vld [vmem:[%s3219_s12 + $0x108] sm:$0xff]  ;;  %v3115_v36 = vld [vmem:[%s3219_s12 + $0x110] sm:$0xff] }
 0x3f2   : > { %v4291_v42 = vmul.f32 %v3113_v20, %v1711_v59  ;;  %v1971_v62 = vmax.f32 %v1969_v16, %v1970_v19  ;;  %v1979_v3 = vrot.slane %v1978_v22, 4  ;;  %v1998_v29 = vadd.f32 %v1997_v9, %v1996_v57  ;;  %v3116_v20 = vld [vmem:[%s3219_s12 + $0x118] sm:$0xff]  ;;  %v3117_v57 = vld [vmem:[%s3219_s12 + $0x120] sm:$0xff]  ;;  %v1731_v9 = vpop.permute.xlu1 %1730 }
 0x3f3   : > { %v1990_v33 = vrot.slane %v1989_v5, 2  ;;  %v1955_v30 = vadd.f32 %v1954_v6, %v1953_v52  ;;  %v1964_v38 = vadd.f32 %v1963_v58, %v1962_v50  ;;  %v4294_v54 = vmul.f32 %v3114_v31, %v1711_v59  ;;  %v3118_v58 = vld [vmem:[%s3219_s12 + $0x128] sm:$0xff]  ;;  %v1741_v59 = vpop.permute.xlu0 %1740 }
 0x3f4   : > { %4800 = vst [vmem:[#allocation24_spill] sm:$0xff] %v4291_v42  ;;  %v4297_v11 = vmul.f32 %v3115_v36, %v1716_v35  ;;  %v1972_v47 = vrot.slane %v1971_v62, 2  ;;  %v1980_v49 = vmax.f32 %v1978_v22, %v1979_v3  ;;  %v1999_v1 = vrot.slane %v1998_v29, 2 }
 0x3f5   : > { %4801 = vst [vmem:[#allocation25_spill] sm:$0xff] %v4294_v54  ;;  %v1991_v51 = vadd.f32 %v1990_v33, %v1989_v5  ;;  %v4300_v32 = vmul.f32 %v3116_v20, %v1716_v35  ;;  %v4305_v16 = vmul.f32 %v3117_v57, %v1721_v0  ;;  %v4308_v52 = vmul.f32 %v3118_v58, %v1721_v0 }
 0x3f6   : > { %4802 = vst [vmem:[#allocation26_spill] sm:$0xff] %v4297_v11  ;;  %v2023_v19 = vadd.f32 %v4297_v11, %v4291_v42  ;;  %v1973_v50 = vmax.f32 %v1971_v62, %v1972_v47  ;;  %v1981_v6 = vrot.slane %v1980_v49, 2  ;;  %v2000_v5 = vadd.f32 %v1999_v1, %v1998_v29  ;;  %v3119_v29 = vld [vmem:[%s3219_s12 + $0x130] sm:$0xff]  ;;  %v1746_v60 = vpop.permute.xlu1 %1745 }
 0x3f7   : > { %4803 = vst [vmem:[#allocation27_spill] sm:$0xff] %v4300_v32  ;;  %4804 = vst [vmem:[#allocation28_spill] sm:$0xff] %v4305_v16  ;;  %v1992_v22 = vrot.slane %v1991_v51, 1  ;;  %v4310_v3 = vmul.f32 0.03125, %v1955_v30  ;;  %v4312_v35 = vmul.f32 0.03125, %v1964_v38  ;;  %v2032_v33 = vadd.f32 %v4300_v32, %v4294_v54  ;;  %v3120_v38 = vld [vmem:[%s3219_s12 + $0x138] sm:$0xff] }
 0x3f8   : > { %4805 = vst [vmem:[#allocation29_spill] sm:$0xff] %v4308_v52  ;;  %v2024_v31 = vadd.f32 %v2023_v19, %v4305_v16  ;;  %v1974_v0 = vrot.slane %v1973_v50, 1  ;;  %v1982_v36 = vmax.f32 %v1980_v49, %v1981_v6  ;;  %v2001_v57 = vrot.slane %v2000_v5, 1 }
 0x3f9   : > { %v1993_v20 = vadd.f32 %v1992_v22, %v1991_v51  ;;  %v2005_v62 = vmax.f32 %v4291_v42, %v4305_v16  ;;  %v2033_v1 = vadd.f32 %v2032_v33, %v4308_v52  ;;  %v4321_v30 = vmul.f32 %v3119_v29, %v1726_v13  ;;  %v3121_v51 = vld [vmem:[%s3219_s12 + $0x150] sm:$0xff] }
 0x3fa   : > { %v4324_v47 = vmul.f32 %v3120_v38, %v1726_v13  ;;  %v4326_v58 = vmax.f32 %v1973_v50, %v1974_v0  ;;  %v1983_v19 = vrot.slane %v1982_v36, 1  ;;  %v2014_v49 = vmax.f32 %v4294_v54, %v4308_v52  ;;  %v4340_v0 = vpop.permute.xlu0 %1755  ;;  %v3123_v54 = vld [vmem:[%s3219_s12 + $0x140] sm:$0xff] }
 0x3fb   : > { %4806 = vst [vmem:[#allocation30_spill] sm:$0xff] %v4321_v30  ;;  %v4332_v6 = vmul.f32 %v3121_v51, %v4282_v34  ;;  %v2006_v22 = vmax.f32 %v4297_v11, %v4321_v30  ;;  %v2025_v13 = vadd.f32 %v2024_v31, %v4321_v30  ;;  %v2002_v29 = vadd.f32 %v2001_v57, %v2000_v5  ;;  %v3122_v51 = vld [vmem:[%s3219_s12 + $0x158] sm:$0xff]  ;;  %v3129_v11 = vld [vmem:[%s3219_s12 + $0x190] sm:$0xff] }
 0x3fc   : > { %4807 = vst [vmem:[#allocation31_spill] sm:$0xff] %v4324_v47  ;;  %v2015_v33 = vmax.f32 %v4300_v32, %v4324_v47  ;;  %v2034_v50 = vadd.f32 %v2033_v1, %v4324_v47  ;;  %v4342_v38 = vmul.f32 0.03125, %v1993_v20  ;;  %v4346_v52 = vmul.f32 %v3122_v51, %v4282_v34  ;;  %v3124_v1 = vld [vmem:[%s3219_s12 + $0x148] sm:$0xff]  ;;  %v3125_v20 = vld [vmem:[%s3219_s12 + $0x160] sm:$0xff] }
 0x3fd   : > { %4808 = vst [vmem:[#allocation32_spill] sm:$0xff] %v4332_v6  ;;  %v4349_v7 = vmul.f32 %v3123_v54, %v1731_v9  ;;  %v2007_v32 = vmax.f32 %v2005_v62, %v2006_v22  ;;  %v2026_v31 = vrot.slane %v2025_v13, 4  ;;  %v4352_v47 = vmul.f32 %v3124_v1, %v1731_v9 }
 0x3fe   : > { %4809 = vst [vmem:[#allocation33_spill] sm:$0xff] %v4346_v52  ;;  %v2016_v14 = vmax.f32 %v2014_v49, %v2015_v33  ;;  %v2035_v48 = vrot.slane %v2034_v50, 4  ;;  %v4357_v57 = vmul.f32 %v3125_v20, %v1741_v59  ;;  %v4360_v34 = vmul.f32 %v3126_v17, %v1741_v59  ;;  %v1761_v40 = vpop.permute.xlu0 %1760 }
 0x3ff   : > { %4810 = vst [vmem:[#allocation34_spill] sm:$0xff] %v4349_v7  ;;  %4811 = vst [vmem:[#allocation35_spill] sm:$0xff] %v4352_v47  ;;  %v2061_v5 = vadd.f32 %v4332_v6, %v4349_v7  ;;  %v2008_v54 = vrot.slane %v2007_v32, 4  ;;  %v2027_v62 = vadd.f32 %v2026_v31, %v2025_v13  ;;  %v4362_v22 = vmax.f32 %v1982_v36, %v1983_v19  ;;  %v3127_v36 = vld [vmem:[%s3219_s12 + $0x170] sm:$0xff]  ;;  %v3128_v13 = vld [vmem:[%s3219_s12 + $0x178] sm:$0xff]  ;;  %v1751_v31 = vpop.permute.xlu1 %1750 }
 0x400   : > { %4812 = vst [vmem:[#allocation36_spill] sm:$0xff] %v4357_v57  ;;  %4813 = vst [vmem:[#allocation37_spill] sm:$0xff] %v4360_v34  ;;  %v2017_v51 = vrot.slane %v2016_v14, 4  ;;  %v2036_v49 = vadd.f32 %v2035_v48, %v2034_v50  ;;  %v2070_v9 = vadd.f32 %v4346_v52, %v4352_v47  ;;  %v2043_v33 = vmax.f32 %v4349_v7, %v4357_v57 }
 0x401   : > { %v2062_v1 = vadd.f32 %v2061_v5, %v4357_v57  ;;  %v2009_v20 = vmax.f32 %v2007_v32, %v2008_v54  ;;  %v2028_v17 = vrot.slane %v2027_v62, 2  ;;  %v2052_v30 = vmax.f32 %v4352_v47, %v4360_v34 }
 0x402   : > { %v2018_v39 = vmax.f32 %v2016_v14, %v2017_v51  ;;  %v2037_v59 = vrot.slane %v2036_v49, 2  ;;  %v2071_v48 = vadd.f32 %v2070_v9, %v4360_v34  ;;  %v4373_v19 = vmul.f32 %v3127_v36, %v1746_v60 }
 0x403   : > { %v4376_v50 = vmul.f32 %v3128_v13, %v1746_v60  ;;  %v2010_v7 = vrot.slane %v2009_v20, 2  ;;  %v2029_v5 = vadd.f32 %v2028_v17, %v2027_v62  ;;  %v4386_v17 = vmul.f32 0.03125, %v2002_v29  ;;  %v3137_v29 = vld [vmem:[%s3219_s12 + $0x1d0] sm:$0xff] }
 0x404   : > { %4814 = vst [vmem:[#allocation38_spill] sm:$0xff] %v4373_v19  ;;  %v2019_v16 = vrot.slane %v2018_v39, 2  ;;  %v2038_v32 = vadd.f32 %v2037_v59, %v2036_v49  ;;  %v2044_v14 = vmax.f32 %v4332_v6, %v4373_v19  ;;  %v2063_v51 = vadd.f32 %v2062_v1, %v4373_v19  ;;  %v1776_v1 = vpop.permute.xlu0 %1775  ;;  %v3131_v19 = vld [vmem:[%s3219_s12 + $0x180] sm:$0xff] }
 0x405   : > { %4815 = vst [vmem:[#allocation39_spill] sm:$0xff] %v4376_v50  ;;  %v2053_v54 = vmax.f32 %v4346_v52, %v4376_v50  ;;  %v2072_v9 = vadd.f32 %v2071_v48, %v4376_v50  ;;  %v2011_v36 = vmax.f32 %v2009_v20, %v2010_v7  ;;  %v2030_v60 = vrot.slane %v2029_v5, 1 }
 0x406   : > { %v4384_v34 = vmax.f32 %v2018_v39, %v2019_v16  ;;  %v2039_v13 = vrot.slane %v2038_v32, 1  ;;  %v2045_v47 = vmax.f32 %v2043_v33, %v2044_v14  ;;  %v2064_v62 = vrot.slane %v2063_v51, 4 }
 0x407   : > { %v2054_v57 = vmax.f32 %v2052_v30, %v2053_v54  ;;  %v2073_v49 = vrot.slane %v2072_v9, 4  ;;  %v2012_v59 = vrot.slane %v2011_v36, 1  ;;  %v2031_v6 = vadd.f32 %v2030_v60, %v2029_v5  ;;  %v1771_v30 = vpop.permute.xlu1 %1770  ;;  %v3130_v5 = vld [vmem:[%s3219_s12 + $0x198] sm:$0xff] }
 0x408   : > { %v4390_v52 = vmul.f32 %v3129_v11, %v4340_v0  ;;  %v2046_v7 = vrot.slane %v2045_v47, 4  ;;  %v2065_v16 = vadd.f32 %v2064_v62, %v2063_v51  ;;  %v2040_v48 = vadd.f32 %v2039_v13, %v2038_v32  ;;  %v3132_v51 = vld [vmem:[%s3219_s12 + $0x188] sm:$0xff]  ;;  %v3133_v62 = vld [vmem:[%s3219_s12 + $0x1a0] sm:$0xff] }
 0x409   : > { %v2055_v39 = vrot.slane %v2054_v57, 4  ;;  %v2074_v33 = vadd.f32 %v2073_v49, %v2072_v9  ;;  %v4392_v20 = vmax.f32 %v2011_v36, %v2012_v59  ;;  %v4397_v14 = vmul.f32 %v3130_v5, %v4340_v0  ;;  %v3134_v49 = vld [vmem:[%s3219_s12 + $0x1a8] sm:$0xff] }
 0x40a   : > { %4816 = vst [vmem:[#allocation40_spill] sm:$0xff] %v4390_v52  ;;  %v2047_v11 = vmax.f32 %v2045_v47, %v2046_v7  ;;  %v2066_v60 = vrot.slane %v2065_v16, 2  ;;  %v4400_v42 = vmul.f32 %v3131_v19, %v1751_v31  ;;  %v4403_v9 = vmul.f32 %v3132_v51, %v1751_v31 }
 0x40b   : > { %4817 = vst [vmem:[#allocation41_spill] sm:$0xff] %v4397_v14  ;;  %v2056_v54 = vmax.f32 %v2054_v57, %v2055_v39  ;;  %v2075_v50 = vrot.slane %v2074_v33, 2  ;;  %v4406_v36 = vmul.f32 %v3133_v62, %v1761_v40  ;;  %v4409_v59 = vmul.f32 %v3134_v49, %v1761_v40  ;;  %v1781_v39 = vpop.permute.xlu0 %1780  ;;  %v3136_v49 = vld [vmem:[%s3219_s12 + $0x1c8] sm:$0xff] }
 0x40c   : > { %4818 = vst [vmem:[#allocation42_spill] sm:$0xff] %v4400_v42  ;;  %4819 = vst [vmem:[#allocation43_spill] sm:$0xff] %v4403_v9  ;;  %v4411_v32 = vmul.f32 0.03125, %v2031_v6  ;;  %v2048_v0 = vrot.slane %v2047_v11, 2  ;;  %v2067_v57 = vadd.f32 %v2066_v60, %v2065_v16  ;;  %v4413_v13 = vmul.f32 0.03125, %v2040_v48 }
 0x40d   : > { %4820 = vst [vmem:[#allocation44_spill] sm:$0xff] %v4406_v36  ;;  %4821 = vst [vmem:[#allocation45_spill] sm:$0xff] %v4409_v59  ;;  %v2057_v47 = vrot.slane %v2056_v54, 2  ;;  %v2076_v19 = vadd.f32 %v2075_v50, %v2074_v33  ;;  %v2099_v31 = vadd.f32 %v4390_v52, %v4400_v42  ;;  %v2108_v7 = vadd.f32 %v4397_v14, %v4403_v9  ;;  %v1766_v50 = vpop.permute.xlu1 %1765 }
 0x40e   : > { %v4419_v40 = vmax.f32 %v2047_v11, %v2048_v0  ;;  %v2068_v6 = vrot.slane %v2067_v57, 1  ;;  %v2081_v16 = vmax.f32 %v4400_v42, %v4406_v36  ;;  %v2090_v48 = vmax.f32 %v4403_v9, %v4409_v59  ;;  %v3135_v11 = vld [vmem:[%s3219_s12 + $0x1c0] sm:$0xff]  ;;  %v3138_v9 = vld [vmem:[%s3219_s12 + $0x1d8] sm:$0xff] }
 0x40f   : > { %v4425_v33 = vmax.f32 %v2056_v54, %v2057_v47  ;;  %v2100_v5 = vadd.f32 %v2099_v31, %v4406_v36  ;;  %v2109_v60 = vadd.f32 %v2108_v7, %v4409_v59  ;;  %v4430_v51 = vmul.f32 %v3135_v11, %v1771_v30  ;;  %v3139_v54 = vld [vmem:[%s3219_s12 + $0x1b0] sm:$0xff]  ;;  %v3140_v31 = vld [vmem:[%s3219_s12 + $0x1b8] sm:$0xff]  ;;  %v3141_v7 = vld [vmem:[%s3219_s12 + $0x1e0] sm:$0xff] }
 0x410   : > { %v2069_v62 = vadd.f32 %v2068_v6, %v2067_v57  ;;  %v4433_v0 = vmul.f32 %v3136_v49, %v1771_v30  ;;  %v4436_v42 = vmul.f32 %v3137_v29, %v1776_v1  ;;  %v4439_v2 = vmul.f32 %v3138_v9, %v1776_v1  ;;  %v3142_v11 = vld [vmem:[%s3219_s12 + $0x1e8] sm:$0xff] }
 0x411   : > { %4822 = vst [vmem:[#allocation46_spill] sm:$0xff] %v4430_v51  ;;  %v4442_v47 = vmul.f32 %v3139_v54, %v1766_v50  ;;  %v4445_v36 = vmul.f32 %v3140_v31, %v1766_v50  ;;  %v4448_v59 = vmul.f32 %v3141_v7, %v1781_v39  ;;  %v4451_v57 = vmul.f32 %v3142_v11, %v1781_v39  ;;  %v1786_v54 = vpop.permute.xlu0 %1785 }
 0x412   : > { %4823 = vst [vmem:[#allocation47_spill] sm:$0xff] %v4433_v0  ;;  %4824 = vst [vmem:[#allocation48_spill] sm:$0xff] %v4439_v2  ;;  %v2077_v6 = vrot.slane %v2076_v19, 1  ;;  %v4454_v29 = vmul.f32 0.03125, %v2069_v62  ;;  %v2137_v1 = vadd.f32 %v4436_v42, %v4430_v51  ;;  %v2146_v62 = vadd.f32 %v4439_v2, %v4433_v0 }
 0x413   : > { %4825 = vst [vmem:[#allocation49_spill] sm:$0xff] %v4442_v47  ;;  %4826 = vst [vmem:[#allocation50_spill] sm:$0xff] %v4445_v36  ;;  %v2082_v9 = vmax.f32 %v4390_v52, %v4442_v47  ;;  %v2091_v50 = vmax.f32 %v4397_v14, %v4445_v36  ;;  %v2101_v49 = vadd.f32 %v2100_v5, %v4442_v47  ;;  %v3144_v47 = vld [vmem:[%s3219_s12 + $0x1f8] sm:$0xff] }
 0x414   : > { %4827 = vst [vmem:[#allocation51_spill] sm:$0xff] %v4448_v59  ;;  %4828 = vst [vmem:[#allocation52_spill] sm:$0xff] %v4451_v57  ;;  %v2110_v39 = vadd.f32 %v2109_v60, %v4445_v36  ;;  %v2119_v31 = vmax.f32 %v4430_v51, %v4448_v59  ;;  %v2128_v7 = vmax.f32 %v4433_v0, %v4451_v57  ;;  %v3143_v60 = vld [vmem:[%s3219_s12 + $0x1f0] sm:$0xff]  ;;  %s2462_s12 = sld [smem:[#allocation2]] }
 0x415   : > { %v2138_v11 = vadd.f32 %v2137_v1, %v4448_v59  ;;  %v2083_v30 = vmax.f32 %v2081_v16, %v2082_v9  ;;  %v2092_v52 = vmax.f32 %v2090_v48, %v2091_v50  ;;  %v2102_v14 = vrot.slane %v2101_v49, 4 }
 0x416   : > { %v2111_v56 = vrot.slane %v2110_v39, 4  ;;  %v2147_v5 = vadd.f32 %v2146_v62, %v4451_v57  ;;  %v4473_v36 = vmul.f32 %v3143_v60, %v1786_v54  ;;  %v4476_v8 = vmul.f32 %v3144_v47, %v1786_v54 }
 0x417   : > { %v2078_v21 = vadd.f32 %v2077_v6, %v2076_v19  ;;  %v2084_v51 = vrot.slane %v2083_v30, 4  ;;  %v2093_v0 = vrot.slane %v2092_v52, 4  ;;  %v2103_v41 = vadd.f32 %v2102_v14, %v2101_v49 }
 0x418   : > { %4829 = vst [vmem:[#allocation53_spill] sm:$0xff] %v4473_v36  ;;  %4830 = vst [vmem:[#allocation54_spill] sm:$0xff] %v4476_v8  ;;  %v2112_v1 = vadd.f32 %v2111_v56, %v2110_v39  ;;  %v2120_v16 = vmax.f32 %v4436_v42, %v4473_v36  ;;  %v2129_v48 = vmax.f32 %v4439_v2, %v4476_v8 }
 0x419   : > { %v2139_v9 = vadd.f32 %v2138_v11, %v4473_v36  ;;  %v2148_v50 = vadd.f32 %v2147_v5, %v4476_v8  ;;  %v2085_v47 = vmax.f32 %v2083_v30, %v2084_v51  ;;  %v2094_v54 = vmax.f32 %v2092_v52, %v2093_v0 }
 0x41a   : > { %v2104_v19 = vrot.slane %v2103_v41, 2  ;;  %v2113_v6 = vrot.slane %v2112_v1, 2  ;;  %v2121_v62 = vmax.f32 %v2119_v31, %v2120_v16  ;;  %v2130_v60 = vmax.f32 %v2128_v7, %v2129_v48 }
 0x41b   : > { %v2140_v57 = vrot.slane %v2139_v9, 4  ;;  %v2149_v14 = vrot.slane %v2148_v50, 4  ;;  %v2086_v56 = vrot.slane %v2085_v47, 2  ;;  %v2179_v2 = vsel %vm2157_vm2, %v4210_v44, %v4284_v15 }
 0x41c   : > { %v2105_v49 = vadd.f32 %v2104_v19, %v2103_v41  ;;  %v2114_v39 = vadd.f32 %v2113_v6, %v2112_v1  ;;  %v2122_v11 = vrot.slane %v2121_v62, 4  ;;  %v2131_v36 = vrot.slane %v2130_v60, 4 }
 0x41d   : > { %v2141_v5 = vadd.f32 %v2140_v57, %v2139_v9  ;;  %v2150_v8 = vadd.f32 %v2149_v14, %v2148_v50  ;;  %v2087_v51 = vmax.f32 %v2085_v47, %v2086_v56  ;;  %v2095_v52 = vrot.slane %v2094_v54, 2 }
 0x41e   : > { %v2106_v0 = vrot.slane %v2105_v49, 1  ;;  %v2115_v30 = vrot.slane %v2114_v39, 1  ;;  %v2123_v31 = vmax.f32 %v2121_v62, %v2122_v11  ;;  %v2080_v48 = vmul.f32 0.03125, %v2078_v21 }
 0x41f   : > { %v2142_v7 = vrot.slane %v2141_v5, 2  ;;  %v2151_v16 = vrot.slane %v2150_v8, 2  ;;  %v2132_v1 = vmax.f32 %v2130_v60, %v2131_v36  ;;  %v2181_v6 = vsel %vm2160_vm4, %v2179_v2, %v4312_v35 }
 0x420   : > { %v2107_v41 = vadd.f32 %v2106_v0, %v2105_v49  ;;  %v2116_v19 = vadd.f32 %v2115_v30, %v2114_v39  ;;  %v2124_v44 = vrot.slane %v2123_v31, 2  ;;  %v2183_v57 = vsel %vm2163_vm3, %v2181_v6, %v4386_v17 }
 0x421   : > { %v2143_v15 = vadd.f32 %v2142_v7, %v2141_v5  ;;  %v2152_v59 = vadd.f32 %v2151_v16, %v2150_v8  ;;  %v2088_v9 = vrot.slane %v2087_v51, 1  ;;  %v2185_v62 = vsel %vm2166_vm5, %v2183_v57, %v4413_v13 }
 0x422   : > { %v2117_v50 = vmul.f32 0.03125, %v2107_v41  ;;  %v2118_v47 = vmul.f32 0.03125, %v2116_v19  ;;  %v2125_v14 = vmax.f32 %v2123_v31, %v2124_v44  ;;  %v4831_v36 = vrot.slane %v4384_v34, 1 }
 0x423   : > { %v2144_v21 = vrot.slane %v2143_v15, 1  ;;  %v2153_v56 = vrot.slane %v2152_v59, 1  ;;  %v2187_v2 = vsel %vm2169_vm6, %v2185_v62, %v2080_v48  ;;  %v2059_v8 = vrot.slane %v4425_v33, 1 }
 0x424   : > { %v2022_v60 = vmax.f32 %v4384_v34, %v4831_v36  ;;  %v2096_v35 = vmax.f32 %v2094_v54, %v2095_v52  ;;  %v2133_v49 = vrot.slane %v2132_v1, 2  ;;  %v2159_v39 = vsel %vm2157_vm2, %v4188_v4, %v4235_v61 }
 0x425   : > { %v2154_v17 = vadd.f32 %v2153_v56, %v2152_v59  ;;  %v2145_v11 = vadd.f32 %v2144_v21, %v2143_v15  ;;  %v2178_v13 = vsel %vm2157_vm2, %v4208_v45, %v4265_v63  ;;  %v2060_v5 = vmax.f32 %v4425_v33, %v2059_v8 }
 0x426   : > { %v2097_v0 = vrot.slane %v2096_v35, 1  ;;  %v2134_v34 = vmax.f32 %v2132_v1, %v2133_v49  ;;  %v2162_v30 = vsel %vm2160_vm4, %v2159_v39, %v4288_v18  ;;  %v2189_v54 = vsel %vm2172_vm7, %v2187_v2, %v2118_v47 }
 0x427   : > { %v2156_v31 = vmul.f32 0.03125, %v2154_v17  ;;  %v2165_v59 = vsel %vm2163_vm3, %v2162_v30, %v4362_v22  ;;  %v2180_v4 = vsel %vm2160_vm4, %v2178_v13, %v4310_v3  ;;  %v2155_v7 = vmul.f32 0.03125, %v2145_v11 }
 0x428   : > { %v2098_v61 = vmax.f32 %v2096_v35, %v2097_v0  ;;  %v2135_v52 = vrot.slane %v2134_v34, 1  ;;  %v2182_v45 = vsel %vm2163_vm3, %v2180_v4, %v4342_v38  ;;  %v4832_v63 = vrot.slane %v4419_v40, 1 }
 0x429   : > { %v2191_v18 = vsel %vm2175_vm8, %v2189_v54, %v2156_v31  ;;  %v2168_v16 = vsel %vm2166_vm5, %v2165_v59, %v2022_v60  ;;  %v2184_v22 = vsel %vm2166_vm5, %v2182_v45, %v4411_v32  ;;  %v2126_v1 = vrot.slane %v2125_v14, 1 }
 0x42a   : > { %v2051_v33 = vmax.f32 %v4419_v40, %v4832_v63  ;;  %2384 = vmatprep.mubr.f32.mxu1 %v2191_v18  ;;  %v2136_v48 = vmax.f32 %v2134_v34, %v2135_v52  ;;  %v2171_v3 = vsel %vm2169_vm6, %v2168_v16, %v2060_v5  ;;  %v2186_v41 = vsel %vm2169_vm6, %v2184_v22, %v4454_v29 }
 0x42b   : > { %v2174_v38 = vsel %vm2172_vm7, %v2171_v3, %v2098_v61  ;;  %v2188_v19 = vsel %vm2172_vm7, %v2186_v41, %v2117_v50  ;;  %v2089_v40 = vmax.f32 %v2087_v51, %v2088_v9  ;;  %v2161_v6 = vsel %vm2160_vm4, %v4247_v37, %v4286_v26 }
 0x42c   : > { %v2177_v44 = vsel %vm2175_vm8, %v2174_v38, %v2136_v48  ;;  %v2190_v32 = vsel %vm2175_vm8, %v2188_v19, %v2155_v7  ;;  %v2127_v15 = vmax.f32 %v2125_v14, %v2126_v1  ;;  %v2164_v57 = vsel %vm2163_vm3, %v2161_v6, %v4326_v58  ;;  %v4836_v6 = vld [vmem:[#allocation20_spill] sm:$0xff] }
 0x42d   : > { %2455 = vmatprep.mubr.f32.mxu0 %v2177_v44  ;;  %2385 = vmatmul.mubr.f32.vlgmr.msra.gmra.mxu1 %v2190_v32  ;;  %v2167_v29 = vsel %vm2166_vm5, %v2164_v57, %v4392_v20  ;;  %v2463_v47 = vstv %s2462_s12  ;;  %v2478_v49 = vlaneseq  ;;  %v4837_v44 = vld [vmem:[#allocation22_spill] sm:$0xff] }
 0x42e   : > { %v2170_v50 = vsel %vm2169_vm6, %v2167_v29, %v2051_v33  ;;  %v4840_v29 = vld [vmem:[#allocation28_spill] sm:$0xff] }
 0x42f   : > { %v2173_v51 = vsel %vm2172_vm7, %v2170_v50, %v2089_v40  ;;  %v4538_v39 = vshrl.u32 %v2478_v49, 7 }
 0x430   : > { %v2176_v9 = vsel %vm2175_vm8, %v2173_v51, %v2127_v15  ;;  %v4839_v15 = vld [vmem:[#allocation26_spill] sm:$0xff] }
 0x431   : > { %2456 = vmatmul.mubr.f32.vlgmr.msra.gmra.mxu0 %v2176_v9  ;;  %v2480_v11 = vsub.s32 0, %v4538_v39  ;;  %v2504_v13 = vsub.s32 1, %v4538_v39  ;;  %v2528_v5 = vsub.s32 2, %v4538_v39  ;;  %v2552_v0 = vsub.s32 3, %v4538_v39  ;;  %v4841_v51 = vld [vmem:[#allocation30_spill] sm:$0xff] }
 0x432   : > { %v2576_v34 = vsub.s32 4, %v4538_v39  ;;  %v2600_v30 = vsub.s32 5, %v4538_v39  ;;  %v2624_v31 = vsub.s32 6, %v4538_v39  ;;  %v2648_v54 = vsub.s32 7, %v4538_v39  ;;  %v4860_v39 = vld [vmem:[#allocation9_spill] sm:$0xff] }
 0x4ed   : > { %v2386_v37 = vpop.f32.mrf.mxu1 }
 0x4ef   : > { %v2388_v62 = vpop.f32.mrf.mxu1 }
 0x4f1   : > { %v2457_v26 = vpop.f32.mrf.mxu0 }
 0x4f2   : > { %v2458_v14 = vadd.f32 %v2457_v26, %v2386_v37  ;;  %v4842_v26 = vld [vmem:[#allocation34_spill] sm:$0xff] }
 0x4f3   : > { %v2459_v21 = vpop.f32.mrf.mxu0 }
 0x4f4   : > { %v2464_v58 = vadd.f32 %v2463_v47, %v2458_v14  ;;  %v2460_v56 = vadd.f32 %v2459_v21, %v2388_v62  ;;  %v4843_v62 = vld [vmem:[#allocation32_spill] sm:$0xff] }
 0x4f5   : > { %v4844_v21 = vld [vmem:[#allocation36_spill] sm:$0xff] }
 0x4f6   : > { %v2803_v36 = vmul.f32 -1.442695, %v2464_v58  ;;  %v2465_v60 = vadd.f32 %v2463_v47, %v2460_v56  ;;  %v4845_v56 = vld [vmem:[#allocation38_spill] sm:$0xff] }
 0x4f8   : > { %3073 = vpow2.f32 %v2803_v36  ;;  %v2804_v20 = vmul.f32 -1.442695, %v2465_v60  ;;  %v4846_v60 = vld [vmem:[#allocation42_spill] sm:$0xff] }
 0x4fa   : > { %3075 = vpow2.f32 %v2804_v20 }
 0x505   : > { %v3074_v2 = vpop.eup %3073 }
 0x506   : > { %v2472_v8 = vadd.f32 1.0, %v3074_v2  ;;  %v4847_v2 = vld [vmem:[#allocation40_spill] sm:$0xff] }
 0x507   : > { %v3076_v35 = vpop.eup %3075 }
 0x508   : > { %3077 = vrcp.f32 %v2472_v8  ;;  %v2473_v17 = vadd.f32 1.0, %v3076_v35  ;;  %v4848_v35 = vld [vmem:[#allocation44_spill] sm:$0xff] }
 0x50a   : > { %3079 = vrcp.f32 %v2473_v17  ;;  %v4849_v17 = vld [vmem:[#allocation49_spill] sm:$0xff] }
 0x515   : > { %v3078_v59 = vpop.eup %3077 }
 0x516   : > { %v2481_v4 = vrot.slane %v3078_v59, %v2480_v11  ;;  %v2505_v61 = vrot.slane %v3078_v59, %v2504_v13  ;;  %v2529_v52 = vrot.slane %v3078_v59, %v2528_v5  ;;  %v2553_v7 = vrot.slane %v3078_v59, %v2552_v0 }
 0x517   : > { %v2577_v45 = vrot.slane %v3078_v59, %v2576_v34  ;;  %v2601_v63 = vrot.slane %v3078_v59, %v2600_v30  ;;  %v2625_v33 = vrot.slane %v3078_v59, %v2624_v31  ;;  %v2649_v18 = vrot.slane %v3078_v59, %v2648_v54  ;;  %v3080_v37 = vpop.eup %3079 }
 0x518   : > { %v2486_v16 = vmul.f32 %v2481_v4, %v4107_v43  ;;  %v2488_v22 = vmul.f32 %v2481_v4, %v4113_v12  ;;  %v2490_v48 = vmul.f32 %v2481_v4, %v4129_v53  ;;  %v2492_v3 = vmul.f32 %v2481_v4, %v4119_v46  ;;  %v4833_v53 = vld [vmem:[#allocation13_spill] sm:$0xff]  ;;  %v4850_v4 = vld [vmem:[#allocation46_spill] sm:$0xff] }
 0x519   : > { %v2510_v41 = vmul.f32 %v2505_v61, %v4153_v10  ;;  %v2512_v1 = vmul.f32 %v2505_v61, %v4147_v23  ;;  %v2514_v38 = vmul.f32 %v2505_v61, %v4169_v28  ;;  %v2516_v19 = vmul.f32 %v2505_v61, %v4163_v25  ;;  %v4834_v10 = vld [vmem:[#allocation18_spill] sm:$0xff]  ;;  %v4835_v28 = vld [vmem:[#allocation16_spill] sm:$0xff] }
 0x51a   : > { %2494 = vst [vmem:[%s4561_s13] sm:$0xff] %v2486_v16  ;;  %2496 = vst [vmem:[%s4561_s13 + $0x10] sm:$0xff] %v2488_v22  ;;  %v2534_v43 = vmul.f32 %v2529_v52, %v4191_v27  ;;  %v2536_v12 = vmul.f32 %v2529_v52, %v4197_v24  ;;  %v2538_v46 = vmul.f32 %v2529_v52, %v4221_v55  ;;  %v4838_v55 = vld [vmem:[#allocation24_spill] sm:$0xff] }
 0x51b   : > { %2498 = vst [vmem:[%s4561_s13 + $0x20] sm:$0xff] %v2490_v48  ;;  %2500 = vst [vmem:[%s4561_s13 + $0x30] sm:$0xff] %v2492_v3  ;;  %v2540_v23 = vmul.f32 %v2529_v52, %v4833_v53  ;;  %v2558_v25 = vmul.f32 %v2553_v7, %v4834_v10  ;;  %v2560_v40 = vmul.f32 %v2553_v7, %v4835_v28  ;;  %v4861_v10 = vld [vmem:[#allocation11_spill] sm:$0xff]  ;;  %v4862_v28 = vld [vmem:[#allocation12_spill] sm:$0xff] }
 0x51c   : > { %2518 = vst [vmem:[%s4561_s13 + $0x40] sm:$0xff] %v2510_v41  ;;  %2520 = vst [vmem:[%s4561_s13 + $0x50] sm:$0xff] %v2512_v1  ;;  %v2562_v27 = vmul.f32 %v2553_v7, %v4836_v6  ;;  %v2564_v24 = vmul.f32 %v2553_v7, %v4837_v44  ;;  %v2582_v32 = vmul.f32 %v2577_v45, %v4838_v55  ;;  %v4851_v7 = vld [vmem:[#allocation51_spill] sm:$0xff]  ;;  %v4854_v41 = vld [vmem:[#allocation4_spill] sm:$0xff] }
 0x51d   : > { %2522 = vst [vmem:[%s4561_s13 + $0x60] sm:$0xff] %v2514_v38  ;;  %2524 = vst [vmem:[%s4561_s13 + $0x70] sm:$0xff] %v2516_v19  ;;  %v2584_v57 = vmul.f32 %v2577_v45, %v4839_v15  ;;  %v2586_v50 = vmul.f32 %v2577_v45, %v4840_v29  ;;  %v2588_v9 = vmul.f32 %v2577_v45, %v4841_v51  ;;  %v4855_v38 = vld [vmem:[#allocation6_spill] sm:$0xff]  ;;  %v4863_v6 = vld [vmem:[#allocation15_spill] sm:$0xff] }
 0x51e   : > { %2542 = vst [vmem:[%s4561_s13 + $0x80] sm:$0xff] %v2534_v43  ;;  %2544 = vst [vmem:[%s4561_s13 + $0x90] sm:$0xff] %v2536_v12  ;;  %v2606_v47 = vmul.f32 %v2601_v63, %v4842_v26  ;;  %v2608_v14 = vmul.f32 %v2601_v63, %v4843_v62  ;;  %v2610_v58 = vmul.f32 %v2601_v63, %v4844_v21  ;;  %v4856_v43 = vld [vmem:[#allocation5_spill] sm:$0xff]  ;;  %v4857_v12 = vld [vmem:[#allocation8_spill] sm:$0xff] }
 0x51f   : > { %2546 = vst [vmem:[%s4561_s13 + $0xa0] sm:$0xff] %v2538_v46  ;;  %2548 = vst [vmem:[%s4561_s13 + $0xb0] sm:$0xff] %v2540_v23  ;;  %v2612_v36 = vmul.f32 %v2601_v63, %v4845_v56  ;;  %v2630_v20 = vmul.f32 %v2625_v33, %v4846_v60  ;;  %v2632_v8 = vmul.f32 %v2625_v33, %v4847_v2  ;;  %v4852_v63 = vld [vmem:[#allocation53_spill] sm:$0xff]  ;;  %v4858_v46 = vld [vmem:[#allocation7_spill] sm:$0xff] }
 0x520   : > { %2566 = vst [vmem:[%s4561_s13 + $0xc0] sm:$0xff] %v2558_v25  ;;  %2568 = vst [vmem:[%s4561_s13 + $0xd0] sm:$0xff] %v2560_v40  ;;  %v2634_v49 = vmul.f32 %v2625_v33, %v4848_v35  ;;  %v2636_v59 = vmul.f32 %v2625_v33, %v4849_v17  ;;  %v2654_v61 = vmul.f32 %v2649_v18, %v4850_v4  ;;  %v4864_v44 = vld [vmem:[#allocation14_spill] sm:$0xff]  ;;  %v4865_v55 = vld [vmem:[#allocation19_spill] sm:$0xff] }
 0x521   : > { %2570 = vst [vmem:[%s4561_s13 + $0xe0] sm:$0xff] %v2562_v27  ;;  %2572 = vst [vmem:[%s4561_s13 + $0xf0] sm:$0xff] %v2564_v24  ;;  %v2656_v52 = vmul.f32 %v2649_v18, %v4436_v42  ;;  %v2658_v45 = vmul.f32 %v2649_v18, %v4851_v7  ;;  %v2660_v16 = vmul.f32 %v2649_v18, %v4852_v63  ;;  %v4853_v18 = vld [vmem:[#allocation3_spill] sm:$0xff]  ;;  %v4866_v15 = vld [vmem:[#allocation17_spill] sm:$0xff] }
 0x522   : > { %2590 = vst [vmem:[%s4561_s13 + $0x100] sm:$0xff] %v2582_v32  ;;  %2592 = vst [vmem:[%s4561_s13 + $0x110] sm:$0xff] %v2584_v57  ;;  %v2485_v33 = vrot.slane %v3080_v37, %v2480_v11  ;;  %v2509_v22 = vrot.slane %v3080_v37, %v2504_v13  ;;  %v2533_v48 = vrot.slane %v3080_v37, %v2528_v5  ;;  %v4867_v29 = vld [vmem:[#allocation21_spill] sm:$0xff]  ;;  %v4868_v51 = vld [vmem:[#allocation23_spill] sm:$0xff] }
 0x523   : > { %2594 = vst [vmem:[%s4561_s13 + $0x120] sm:$0xff] %v2586_v50  ;;  %2596 = vst [vmem:[%s4561_s13 + $0x130] sm:$0xff] %v2588_v9  ;;  %v2557_v42 = vrot.slane %v3080_v37, %v2552_v0  ;;  %v2581_v11 = vrot.slane %v3080_v37, %v2576_v34  ;;  %v2605_v13 = vrot.slane %v3080_v37, %v2600_v30  ;;  %v4879_v7 = vld [vmem:[#allocation45_spill] sm:$0xff]  ;;  %v4880_v63 = vld [vmem:[#allocation50_spill] sm:$0xff] }
 0x524   : > { %2614 = vst [vmem:[%s4561_s13 + $0x140] sm:$0xff] %v2606_v47  ;;  %2616 = vst [vmem:[%s4561_s13 + $0x150] sm:$0xff] %v2608_v14  ;;  %v2629_v5 = vrot.slane %v3080_v37, %v2624_v31  ;;  %v2653_v0 = vrot.slane %v3080_v37, %v2648_v54  ;;  %v2487_v3 = vmul.f32 %v2485_v33, %v4853_v18  ;;  %v4859_v31 = vld [vmem:[#allocation10_spill] sm:$0xff]  ;;  %v4869_v37 = vld [vmem:[#allocation25_spill] sm:$0xff] }
 0x525   : > { %2618 = vst [vmem:[%s4561_s13 + $0x160] sm:$0xff] %v2610_v58  ;;  %2620 = vst [vmem:[%s4561_s13 + $0x170] sm:$0xff] %v2612_v36  ;;  %v2489_v1 = vmul.f32 %v2485_v33, %v4854_v41  ;;  %v2491_v19 = vmul.f32 %v2485_v33, %v4855_v38  ;;  %v2493_v34 = vmul.f32 %v2485_v33, %v4856_v43  ;;  %v4870_v47 = vld [vmem:[#allocation27_spill] sm:$0xff]  ;;  %v4871_v14 = vld [vmem:[#allocation29_spill] sm:$0xff] }
 0x526   : > { %2638 = vst [vmem:[%s4561_s13 + $0x180] sm:$0xff] %v2630_v20  ;;  %2640 = vst [vmem:[%s4561_s13 + $0x190] sm:$0xff] %v2632_v8  ;;  %v2511_v30 = vmul.f32 %v2509_v22, %v4857_v12  ;;  %v2513_v53 = vmul.f32 %v2509_v22, %v4858_v46  ;;  %v2515_v23 = vmul.f32 %v2509_v22, %v4859_v31  ;;  %v4872_v58 = vld [vmem:[#allocation31_spill] sm:$0xff]  ;;  %v4874_v20 = vld [vmem:[#allocation33_spill] sm:$0xff] }
 0x527   : > { %2642 = vst [vmem:[%s4561_s13 + $0x1a0] sm:$0xff] %v2634_v49  ;;  %2644 = vst [vmem:[%s4561_s13 + $0x1b0] sm:$0xff] %v2636_v59  ;;  %v2517_v54 = vmul.f32 %v2509_v22, %v4860_v39  ;;  %v2535_v25 = vmul.f32 %v2533_v48, %v4861_v10  ;;  %v2537_v40 = vmul.f32 %v2533_v48, %v4862_v28  ;;  %v4873_v36 = vld [vmem:[#allocation35_spill] sm:$0xff]  ;;  %v4875_v8 = vld [vmem:[#allocation37_spill] sm:$0xff] }
 0x528   : > { %2662 = vst [vmem:[%s4561_s13 + $0x1c0] sm:$0xff] %v2654_v61  ;;  %2664 = vst [vmem:[%s4561_s13 + $0x1d0] sm:$0xff] %v2656_v52  ;;  %v2539_v27 = vmul.f32 %v2533_v48, %v4863_v6  ;;  %v2541_v24 = vmul.f32 %v2533_v48, %v4864_v44  ;;  %v2559_v32 = vmul.f32 %v2557_v42, %v4865_v55  ;;  %v4876_v49 = vld [vmem:[#allocation39_spill] sm:$0xff]  ;;  %v4878_v61 = vld [vmem:[#allocation41_spill] sm:$0xff] }
 0x529   : > { %2666 = vst [vmem:[%s4561_s13 + $0x1e0] sm:$0xff] %v2658_v45  ;;  %2668 = vst [vmem:[%s4561_s13 + $0x1f0] sm:$0xff] %v2660_v16  ;;  %v2561_v57 = vmul.f32 %v2557_v42, %v4866_v15  ;;  %v2563_v50 = vmul.f32 %v2557_v42, %v4867_v29  ;;  %v2565_v9 = vmul.f32 %v2557_v42, %v4868_v51  ;;  %v4877_v59 = vld [vmem:[#allocation43_spill] sm:$0xff]  ;;  %v4882_v48 = vld [vmem:[#allocation48_spill] sm:$0xff] }
 0x52a   : > { %2495 = vst [vmem:[%s4561_s13 + $0x8] sm:$0xff] %v2487_v3  ;;  %2497 = vst [vmem:[%s4561_s13 + $0x18] sm:$0xff] %v2489_v1  ;;  %v2583_v26 = vmul.f32 %v2581_v11, %v4869_v37  ;;  %v2585_v62 = vmul.f32 %v2581_v11, %v4870_v47  ;;  %v2587_v21 = vmul.f32 %v2581_v11, %v4871_v14  ;;  %v4881_v33 = vld [vmem:[#allocation47_spill] sm:$0xff]  ;;  %v4884_v18 = vld [vmem:[#allocation54_spill] sm:$0xff] }
 0x52b   : > { %2499 = vst [vmem:[%s4561_s13 + $0x28] sm:$0xff] %v2491_v19  ;;  %2501 = vst [vmem:[%s4561_s13 + $0x38] sm:$0xff] %v2493_v34  ;;  %v2589_v56 = vmul.f32 %v2581_v11, %v4872_v58  ;;  %v2607_v60 = vmul.f32 %v2605_v13, %v4873_v36  ;;  %v2609_v2 = vmul.f32 %v2605_v13, %v4874_v20  ;;  %v4883_v11 = vld [vmem:[#allocation52_spill] sm:$0xff] }
 0x52c   : > { %2519 = vst [vmem:[%s4561_s13 + $0x48] sm:$0xff] %v2511_v30  ;;  %2521 = vst [vmem:[%s4561_s13 + $0x58] sm:$0xff] %v2513_v53  ;;  %v2611_v35 = vmul.f32 %v2605_v13, %v4875_v8  ;;  %v2613_v17 = vmul.f32 %v2605_v13, %v4876_v49  ;;  %v2631_v4 = vmul.f32 %v2629_v5, %v4877_v59 }
 0x52d   : > { %2523 = vst [vmem:[%s4561_s13 + $0x68] sm:$0xff] %v2515_v23  ;;  %2525 = vst [vmem:[%s4561_s13 + $0x78] sm:$0xff] %v2517_v54  ;;  %v2633_v52 = vmul.f32 %v2629_v5, %v4878_v61  ;;  %v2635_v45 = vmul.f32 %v2629_v5, %v4879_v7  ;;  %v2637_v16 = vmul.f32 %v2629_v5, %v4880_v63 }
 0x52e   : > { %2543 = vst [vmem:[%s4561_s13 + $0x88] sm:$0xff] %v2535_v25  ;;  %2545 = vst [vmem:[%s4561_s13 + $0x98] sm:$0xff] %v2537_v40  ;;  %v2655_v22 = vmul.f32 %v2653_v0, %v4881_v33  ;;  %v2657_v42 = vmul.f32 %v2653_v0, %v4882_v48  ;;  %v2659_v13 = vmul.f32 %v2653_v0, %v4883_v11 }
 0x52f   : > { %2547 = vst [vmem:[%s4561_s13 + $0xa8] sm:$0xff] %v2539_v27  ;;  %2549 = vst [vmem:[%s4561_s13 + $0xb8] sm:$0xff] %v2541_v24  ;;  %v2661_v3 = vmul.f32 %v2653_v0, %v4884_v18 }
 0x530   : > { %2567 = vst [vmem:[%s4561_s13 + $0xc8] sm:$0xff] %v2559_v32  ;;  %2569 = vst [vmem:[%s4561_s13 + $0xd8] sm:$0xff] %v2561_v57 }
 0x531   : > { %2571 = vst [vmem:[%s4561_s13 + $0xe8] sm:$0xff] %v2563_v50  ;;  %2573 = vst [vmem:[%s4561_s13 + $0xf8] sm:$0xff] %v2565_v9 }
 0x532   : > { %2591 = vst [vmem:[%s4561_s13 + $0x108] sm:$0xff] %v2583_v26  ;;  %2593 = vst [vmem:[%s4561_s13 + $0x118] sm:$0xff] %v2585_v62 }
 0x533   : > { %2595 = vst [vmem:[%s4561_s13 + $0x128] sm:$0xff] %v2587_v21  ;;  %2597 = vst [vmem:[%s4561_s13 + $0x138] sm:$0xff] %v2589_v56 }
 0x534   : > { %2615 = vst [vmem:[%s4561_s13 + $0x148] sm:$0xff] %v2607_v60  ;;  %2617 = vst [vmem:[%s4561_s13 + $0x158] sm:$0xff] %v2609_v2 }
 0x535   : > { %2619 = vst [vmem:[%s4561_s13 + $0x168] sm:$0xff] %v2611_v35  ;;  %2621 = vst [vmem:[%s4561_s13 + $0x178] sm:$0xff] %v2613_v17 }
 0x536   : > { %2639 = vst [vmem:[%s4561_s13 + $0x188] sm:$0xff] %v2631_v4  ;;  %2641 = vst [vmem:[%s4561_s13 + $0x198] sm:$0xff] %v2633_v52 }
 0x537   : > { %2643 = vst [vmem:[%s4561_s13 + $0x1a8] sm:$0xff] %v2635_v45  ;;  %2645 = vst [vmem:[%s4561_s13 + $0x1b8] sm:$0xff] %v2637_v16 }
 0x538   : > { %2663 = vst [vmem:[%s4561_s13 + $0x1c8] sm:$0xff] %v2655_v22  ;;  %2665 = vst [vmem:[%s4561_s13 + $0x1d8] sm:$0xff] %v2657_v42 }
 0x539   : > { %2667 = vst [vmem:[%s4561_s13 + $0x1e8] sm:$0xff] %v2659_v13  ;;  %2669 = vst [vmem:[%s4561_s13 + $0x1f8] sm:$0xff] %v2661_v3 }
 0x53a PF: > { %s19_s29 = sadd.s32 1, %s3151_s29  }
 0x53b   : > { %p16_p4 = scmp.ge.s32.totalorder %s19_s29, 4  }
 0x53d   :  { %18 = sbr.rel (!%p16_p4) target bundleno = 2 (0x2), region = 82 }

</bundles_post_ra>
